<compile_context>
chip_gen: v5e
topology: v5e:2x2
jax: 0.10.0
libtpu: 0.0.40
codegen_flags: <defaults>
</compile_context>

<pallas_src>
import jax
import jax.numpy as jnp
from jax import lax
from jax.experimental import pallas as pl
from jax.experimental.pallas import tpu as pltpu

n_embd = 128
block_size = 256


def _head_kernel(x_ref, wqkv_ref, o_ref):
    # x_ref:    (Bt, T, C)      bf16, Bt batch elements per grid step
    # wqkv_ref: (C, 3H)         bf16, [Wq*scale | Wk | Wv] (pre-fused in wrapper)
    # o_ref:    (1, T, Bt*H)    lane-packed output (unpacked in the wrapper)
    Bt, T, C = x_ref.shape
    H = wqkv_ref.shape[1] // 3

    # Fused QKV projection on the flattened (Bt*T, C) slab; bf16 MXU inputs,
    # f32 accumulation. One slab cast back to bf16 for the downstream matmuls.
    xb = x_ref[...].reshape(Bt * T, C)                                  # bf16
    qkv = jnp.dot(xb, wqkv_ref[...], preferred_element_type=jnp.float32)
    qkv = qkv.astype(jnp.bfloat16).reshape(Bt, T, 3 * H)                # (Bt,T,3H)

    # Batched slices (3 total, not 3 per batch element).
    q = qkv[:, :, 0 * H:1 * H]                                          # (Bt,T,H)
    k = qkv[:, :, 1 * H:2 * H]
    v = qkv[:, :, 2 * H:3 * H]

    # scores = q @ k^T (scale already folded into Wq); contract last dims of
    # both operands with a batch dim -> no XLU transpose / materialized k.T.
    scores = lax.dot_general(
        q, k, dimension_numbers=(((2,), (2,)), ((0,), (0,))),
        preferred_element_type=jnp.float32)                             # (Bt,T,T) f32

    # Causal mask, shared across the Bt elements of this block.
    row = lax.broadcasted_iota(jnp.int32, (T, T), 0)
    col = lax.broadcasted_iota(jnp.int32, (T, T), 1)
    causal = (row >= col)[None, :, :]
    scores = jnp.where(causal, scores, -jnp.inf)

    # Numerically stable softmax, normalization deferred until after PV.
    m = jnp.max(scores, axis=-1, keepdims=True)
    e = jnp.exp(scores - m)                                             # (Bt,T,T) f32
    denom = jnp.sum(e, axis=-1, keepdims=True)                          # (Bt,T,1)

    pv = lax.dot_general(
        e.astype(jnp.bfloat16), v,
        dimension_numbers=(((2,), (1,)), ((0,), (0,))),
        preferred_element_type=jnp.float32)                             # (Bt,T,H) f32

    out = pv * pl.reciprocal(denom, approx=True)                        # (Bt,T,H)

    # Lane-dense store: pack the Bt results along lanes -> (T, Bt*H).
    o_ref[0] = jnp.concatenate([out[b] for b in range(Bt)],
                               axis=-1).astype(o_ref.dtype)


def _cores_per_chip():
    """Best-effort TensorCores-per-chip (v7x has 2; v5e/v6e have 1)."""
    try:
        kind = jax.devices()[0].device_kind.lower()
    except Exception:
        return 1
    return 2 if "v7" in kind else 1


def _pick_grid(B):
    """As few grid steps as possible; one step per TensorCore on v7x."""
    cores = _cores_per_chip()
    if cores > 1 and B % cores == 0 and B >= cores:
        return cores
    return 1


def head_forward(x, wq, wk, wv):
    """x: (B, T, C) float32; wq/wk/wv: (head_size, C) PyTorch-Linear-style weights."""
    B, T, C = x.shape
    H = wq.shape[0]

    # Faithful to the reference: scale is C ** (-5) (literal), not C ** (-0.5).
    scale = float(C) ** (-5.0)

    # Fold the scale into Wq and fuse Q/K/V into a single (C, 3H) bf16 RHS
    # (one MXU RHS push, half the DMA bytes, no in-kernel casts or scaling).
    w_qkv = jnp.concatenate([(wq * scale).T, wk.T, wv.T],
                            axis=1).astype(jnp.bfloat16)                # (C, 3H)
    x_bf = x.astype(jnp.bfloat16)

    Bb = _pick_grid(B)
    Bt = B // Bb

    out_packed = pl.pallas_call(
        _head_kernel,
        out_shape=jax.ShapeDtypeStruct((Bb, T, Bt * H), x.dtype),
        grid_spec=pltpu.PrefetchScalarGridSpec(
            num_scalar_prefetch=0,
            grid=(Bb,),
            in_specs=[
                pl.BlockSpec((Bt, T, C), lambda i: (i, 0, 0)),
                pl.BlockSpec((C, 3 * H), lambda i: (0, 0)),
            ],
            out_specs=pl.BlockSpec((1, T, Bt * H), lambda i: (i, 0, 0)),
        ),
        compiler_params=pltpu.CompilerParams(
            dimension_semantics=("parallel",)),
    )(x_bf, w_qkv)

    # Unpack the lane-packed layout (Bb, T, Bt*H) -> (B, T, H).
    out = out_packed.reshape(Bb, T, Bt, H)
    out = jnp.transpose(out, (0, 2, 1, 3)).reshape(B, T, H)
    return out


def head_reference(x, wq, wk, wv):
    """Pure-JAX f32 reference mirroring the PyTorch forward (eval mode)."""
    B, T, C = x.shape
    q = x @ wq.T
    k = x @ wk.T
    v = x @ wv.T
    scores = (q @ jnp.swapaxes(k, -2, -1)) * (float(C) ** (-5.0))
    row = jnp.arange(T)[:, None]
    col = jnp.arange(T)[None, :]
    scores = jnp.where(row >= col, scores, -jnp.inf)
    weights = jax.nn.softmax(scores, axis=-1)
    return weights @ v


if __name__ == "__main__":
    key = jax.random.PRNGKey(0)
    B, T, C = 8, 64, n_embd          # T <= block_size
    head_size = 32

    kx, kq, kk, kv = jax.random.split(key, 4)
    x = jax.random.normal(kx, (B, T, C), dtype=jnp.float32)
    # deterministic "Linear(bias=False)"-shaped weights: (head_size, n_embd)
    wq = jax.random.normal(kq, (head_size, C), dtype=jnp.float32) * 0.02
    wk = jax.random.normal(kk, (head_size, C), dtype=jnp.float32) * 0.02
    wv = jax.random.normal(kv, (head_size, C), dtype=jnp.float32) * 0.02

    out = jax.block_until_ready(head_forward(x, wq, wk, wv))
    ref = head_reference(x, wq, wk, wv)

    assert out.shape == (B, T, head_size)
    # bf16 MXU inputs (f32 accumulation) vs f32 reference -> loosened tolerance.
    assert jnp.allclose(out, ref, atol=2e-2, rtol=2e-2), "mismatch vs reference"

    print("KERNEL_OK")
</pallas_src>

<mosaic_0001>
module attributes {stable_mosaic.version = 11 : i64} {
  func.func @_head_kernel(%arg0: i32, %arg1: memref<8x64x128xbf16, #tpu.memory_space<vmem>>, %arg2: memref<128x96xbf16, #tpu.memory_space<vmem>>, %arg3: memref<1x64x256xf32, #tpu.memory_space<vmem>>) attributes {dimension_semantics = [#tpu.dimension_semantics<parallel>], iteration_bounds = array<i64: 1>, scalar_prefetch = 0 : i64, scratch_operands = 0 : i64, tpu.core_type = #tpu.core_type<tc>, window_params = [{transform_indices = @transform_0, window_bounds = array<i64: 8, 64, 128>}, {pipeline_mode = #tpu.pipeline_mode<synchronous>, transform_indices = @transform_1, window_bounds = array<i64: 128, 96>}, {transform_indices = @transform_2, window_bounds = array<i64: 1, 64, 256>}]} {
    %c0 = arith.constant 0 : index
    %c0_0 = arith.constant 0 : index
    %c0_1 = arith.constant 0 : index
    %0 = vector.load %arg1[%c0, %c0_0, %c0_1] : memref<8x64x128xbf16, #tpu.memory_space<vmem>>, vector<8x64x128xbf16>
    %1 = vector.shape_cast %0 : vector<8x64x128xbf16> to vector<512x128xbf16>
    %c0_2 = arith.constant 0 : index
    %c0_3 = arith.constant 0 : index
    %2 = vector.load %arg2[%c0_2, %c0_3] : memref<128x96xbf16, #tpu.memory_space<vmem>>, vector<128x96xbf16>
    %cst = arith.constant dense<0.000000e+00> : vector<512x96xf32>
    %3 = tpu.matmul %1, %2, %cst {dimension_numbers = #tpu.dot_dimension_numbers<[1], [0], [0], [1], [0, 0, 1, 1], [], []>} : vector<512x128xbf16>, vector<128x96xbf16>, vector<512x96xf32> -> vector<512x96xf32>
    %4 = arith.truncf %3 : vector<512x96xf32> to vector<512x96xbf16>
    %5 = vector.shape_cast %4 : vector<512x96xbf16> to vector<8x64x96xbf16>
    %6 = vector.extract_strided_slice %5 {offsets = [0, 0, 0], sizes = [8, 64, 32], strides = [1, 1, 1]} : vector<8x64x96xbf16> to vector<8x64x32xbf16>
    %7 = vector.extract_strided_slice %5 {offsets = [0, 0, 32], sizes = [8, 64, 32], strides = [1, 1, 1]} : vector<8x64x96xbf16> to vector<8x64x32xbf16>
    %8 = vector.extract_strided_slice %5 {offsets = [0, 0, 64], sizes = [8, 64, 32], strides = [1, 1, 1]} : vector<8x64x96xbf16> to vector<8x64x32xbf16>
    %cst_4 = arith.constant dense<0.000000e+00> : vector<8x64x64xf32>
    %9 = tpu.matmul %6, %7, %cst_4 {dimension_numbers = #tpu.dot_dimension_numbers<[2], [2], [1], [1], [0, 0, 0, 1, 1, 1], [0], [0]>} : vector<8x64x32xbf16>, vector<8x64x32xbf16>, vector<8x64x64xf32> -> vector<8x64x64xf32>
    %10 = tpu.iota {dimensions = array<i32: 0>} : vector<64x64xi32>
    %11 = tpu.iota {dimensions = array<i32: 1>} : vector<64x64xi32>
    %12 = arith.cmpi sge, %10, %11 : vector<64x64xi32>
    %13 = vector.shape_cast %12 : vector<64x64xi1> to vector<1x64x64xi1>
    %cst_5 = arith.constant 0xFF800000 : f32
    %14 = vector.shape_cast %13 : vector<1x64x64xi1> to vector<1x64x64xi1>
    %15 = vector.broadcast %14 : vector<1x64x64xi1> to vector<8x64x64xi1>
    %16 = vector.broadcast %cst_5 : f32 to vector<8x64x64xf32>
    %17 = arith.select %15, %9, %16 : vector<8x64x64xi1>, vector<8x64x64xf32>
    %cst_6 = arith.constant dense<0xFF800000> : vector<8x64xf32>
    %18 = vector.multi_reduction <maximumf>, %17, %cst_6 [2] : vector<8x64x64xf32> to vector<8x64xf32>
    %19 = vector.shape_cast %18 : vector<8x64xf32> to vector<8x64x1xf32>
    %20 = vector.broadcast %19 : vector<8x64x1xf32> to vector<8x64x64xf32>
    %21 = arith.subf %17, %20 : vector<8x64x64xf32>
    %22 = math.exp %21 : vector<8x64x64xf32>
    %cst_7 = arith.constant dense<0.000000e+00> : vector<8x64xf32>
    %23 = vector.multi_reduction <add>, %22, %cst_7 [2] : vector<8x64x64xf32> to vector<8x64xf32>
    %24 = vector.shape_cast %23 : vector<8x64xf32> to vector<8x64x1xf32>
    %25 = arith.truncf %22 : vector<8x64x64xf32> to vector<8x64x64xbf16>
    %cst_8 = arith.constant dense<0.000000e+00> : vector<8x64x32xf32>
    %26 = tpu.matmul %25, %8, %cst_8 {dimension_numbers = #tpu.dot_dimension_numbers<[2], [1], [1], [2], [0, 0, 0, 1, 1, 2], [0], [0]>} : vector<8x64x64xbf16>, vector<8x64x32xbf16>, vector<8x64x32xf32> -> vector<8x64x32xf32>
    %27 = tpu.reciprocal %24 {approx = true} : vector<8x64x1xf32> -> vector<8x64x1xf32>
    %28 = vector.broadcast %27 : vector<8x64x1xf32> to vector<8x64x32xf32>
    %29 = arith.mulf %26, %28 : vector<8x64x32xf32>
    %30 = vector.extract_strided_slice %29 {offsets = [0, 0, 0], sizes = [1, 64, 32], strides = [1, 1, 1]} : vector<8x64x32xf32> to vector<1x64x32xf32>
    %31 = vector.shape_cast %30 : vector<1x64x32xf32> to vector<64x32xf32>
    %32 = vector.extract_strided_slice %29 {offsets = [1, 0, 0], sizes = [1, 64, 32], strides = [1, 1, 1]} : vector<8x64x32xf32> to vector<1x64x32xf32>
    %33 = vector.shape_cast %32 : vector<1x64x32xf32> to vector<64x32xf32>
    %34 = vector.extract_strided_slice %29 {offsets = [2, 0, 0], sizes = [1, 64, 32], strides = [1, 1, 1]} : vector<8x64x32xf32> to vector<1x64x32xf32>
    %35 = vector.shape_cast %34 : vector<1x64x32xf32> to vector<64x32xf32>
    %36 = vector.extract_strided_slice %29 {offsets = [3, 0, 0], sizes = [1, 64, 32], strides = [1, 1, 1]} : vector<8x64x32xf32> to vector<1x64x32xf32>
    %37 = vector.shape_cast %36 : vector<1x64x32xf32> to vector<64x32xf32>
    %38 = vector.extract_strided_slice %29 {offsets = [4, 0, 0], sizes = [1, 64, 32], strides = [1, 1, 1]} : vector<8x64x32xf32> to vector<1x64x32xf32>
    %39 = vector.shape_cast %38 : vector<1x64x32xf32> to vector<64x32xf32>
    %40 = vector.extract_strided_slice %29 {offsets = [5, 0, 0], sizes = [1, 64, 32], strides = [1, 1, 1]} : vector<8x64x32xf32> to vector<1x64x32xf32>
    %41 = vector.shape_cast %40 : vector<1x64x32xf32> to vector<64x32xf32>
    %42 = vector.extract_strided_slice %29 {offsets = [6, 0, 0], sizes = [1, 64, 32], strides = [1, 1, 1]} : vector<8x64x32xf32> to vector<1x64x32xf32>
    %43 = vector.shape_cast %42 : vector<1x64x32xf32> to vector<64x32xf32>
    %44 = vector.extract_strided_slice %29 {offsets = [7, 0, 0], sizes = [1, 64, 32], strides = [1, 1, 1]} : vector<8x64x32xf32> to vector<1x64x32xf32>
    %45 = vector.shape_cast %44 : vector<1x64x32xf32> to vector<64x32xf32>
    %46 = tpu.concatenate %31, %33, %35, %37, %39, %41, %43, %45 in 1 : vector<64x32xf32>, vector<64x32xf32>, vector<64x32xf32>, vector<64x32xf32>, vector<64x32xf32>, vector<64x32xf32>, vector<64x32xf32>, vector<64x32xf32> -> vector<64x256xf32>
    %c0_9 = arith.constant 0 : index
    %c0_10 = arith.constant 0 : index
    %c0_11 = arith.constant 0 : index
    %47 = vector.load %arg3[%c0_9, %c0_10, %c0_11] : memref<1x64x256xf32, #tpu.memory_space<vmem>>, vector<1x64x256xf32>
    %48 = vector.shape_cast %47 : vector<1x64x256xf32> to vector<64x256xf32>
    %49 = vector.shape_cast %46 : vector<64x256xf32> to vector<1x64x256xf32>
    tpu.vector_store %arg3[%c0_9, %c0_10, %c0_11], %49 {strides = array<i32>} : memref<1x64x256xf32, #tpu.memory_space<vmem>>, vector<1x64x256xf32>,
    return
  }
  func.func @transform_0(%arg0: i32) -> (i32, i32, i32) {
    %c0_i32 = arith.constant 0 : i32
    %c0_i32_0 = arith.constant 0 : i32
    %c0_i32_1 = arith.constant 0 : i32
    return %arg0, %c0_i32, %c0_i32_0 : i32, i32, i32
  }
  func.func @transform_1(%arg0: i32) -> (i32, i32) {
    %c0_i32 = arith.constant 0 : i32
    %c0_i32_0 = arith.constant 0 : i32
    %c0_i32_1 = arith.constant 0 : i32
    return %c0_i32, %c0_i32_0 : i32, i32
  }
  func.func @transform_2(%arg0: i32) -> (i32, i32, i32) {
    %c0_i32 = arith.constant 0 : i32
    %c0_i32_0 = arith.constant 0 : i32
    %c0_i32_1 = arith.constant 0 : i32
    return %arg0, %c0_i32, %c0_i32_0 : i32, i32, i32
  }
}

</mosaic_0001>

<bundles_post_ra>
// kernel: tpu_custom_call.1
= control target key start
LH: loop header
LB: loop body
LE: loop exit
PB: predicated region body
PF: predicated region fallthrough
CT: control target
= control target key end

     0   :  { %7 = vsyncpa [#allocation3], 0  ;;  %s5366_s0 = inlined_call_operand.hbm [shape: bf16[8,64,128], index: 0, kind: input, shape index: {}]   ;;  %s5367_s1 = inlined_call_operand.vmem [shape: bf16[128,96], index: 1, kind: input, shape index: {}]   ;;  %s5368_s2 = inlined_call_operand.hbm [shape: f32[1,64,256], index: 2, kind: output, shape index: {}]  }
   0x1   :  { %8 = vsyncpa [#allocation4], 0  ;;  %s13_s11 = sshll.u32 %s5366_s0, 4  ;;  %s3555_s12 = smov [#allocation2]   ;;  %s14_s11 = int_to_ptr.hbm [resolvable:$true] %s13_s11 }
   0x2   :  { %s15_s13 = sshll.u32 %s3555_s12, 4  ;;  %s3556_s14 = smov 64   ;;  %s16_s13 = int_to_ptr.vmem [resolvable:$true] %s15_s13 }
   0x3   :  { %s3557_s15 = smov 4  }
   0x4   :  { %21 = dma.hbm_to_vmem [thread:$0]  %s14_s11, 4096, %s16_s13, [#allocation3], %s3556_s14, %s3556_s14, %s3557_s15  }
   0x5   :  { %3551 = dma.done.wait [#allocation3], 4096  }
   0x6   :  { %3552 = vsyncadd [#allocation3], 4294963200  ;;  %v3222_v0 = vld [vmem:[%s5367_s1 + $0x38] sm:$0xff]  ;;  %v3221_v1 = vld [vmem:[%s5367_s1 + $0x30] sm:$0xff]  ;;  %vm610_vm0 = vcmask 261120   ;;  %vm1330_vm5 = vcmask 523264  }
   0x7   :  { %349 = vmatpush.bf16.msra.mxu0 %v3222_v0  ;;  %3224 = vmatpush.bf16.msra.mxu3 %v3222_v0  ;;  %v3220_v2 = vld [vmem:[%s5367_s1 + $0x28] sm:$0xff]  ;;  %v3219_v3 = vld [vmem:[%s5367_s1 + $0x20] sm:$0xff]  ;;  %v3218_v4 = vld [vmem:[%s5367_s1 + $0x18] sm:$0xff]  ;;  %s3559_s3 = smov 32   ;;  %vm2891_vm10 = vcmask 785408   ;;  %s3560_s4 = smov [#allocation5]  }
   0x8   :  { %3223 = vmatpush.bf16.msra.mxu2 %v3222_v0  ;;  %v3217_v5 = vld [vmem:[%s5367_s1 + $0x10] sm:$0xff]  ;;  %v3216_v6 = vld [vmem:[%s5367_s1 + $0x8] sm:$0xff]  ;;  %v3215_v7 = vld [vmem:[%s5367_s1] sm:$0xff]  ;;  %s3558_s1 = smov 96   ;;  %s2944_s5 = sshll.u32 %s3560_s4, 4  ;;  %s2945_s5 = int_to_ptr.vmem [resolvable:$true] %s2944_s5 }
   0x9   :  { %v3183_v8 = vld [vmem:[#allocation2] sm:$0xff]  ;;  %v3184_v11 = vld [vmem:[#allocation2 + $0x8] sm:$0xff]  ;;  %v3185_v14 = vld [vmem:[#allocation2 + $0x10] sm:$0xff]  ;;  %s2946_s8 = sshll.u32 %s5368_s2, 4  ;;  %s3561_s9 = smov 256   ;;  %s2947_s8 = int_to_ptr.hbm [resolvable:$true] %s2946_s8 }
   0xa   :  { %v3211_v9 = vld [vmem:[#allocation2 + $0xe0] sm:$0xff]  ;;  %v3212_v12 = vld [vmem:[#allocation2 + $0xe8] sm:$0xff]  ;;  %v3213_v15 = vld [vmem:[#allocation2 + $0xf0] sm:$0xff]  ;;  %s3562_s10 = smov 16  }
   0xb   :  { %350 = vmatpush.bf16.msra.mxu0 %v3221_v1  ;;  %3226 = vmatpush.bf16.msra.mxu3 %v3221_v1  ;;  %v3207_v10 = vld [vmem:[#allocation2 + $0xc0] sm:$0xff]  ;;  %v3208_v13 = vld [vmem:[#allocation2 + $0xc8] sm:$0xff]  ;;  %v3209_v16 = vld [vmem:[#allocation2 + $0xd0] sm:$0xff] }
   0xc   :  { %3225 = vmatpush.bf16.msra.mxu2 %v3221_v1  ;;  %v3186_v17 = vld [vmem:[#allocation2 + $0x18] sm:$0xff]  ;;  %v3187_v20 = vld [vmem:[#allocation2 + $0x20] sm:$0xff]  ;;  %v3188_v21 = vld [vmem:[#allocation2 + $0x28] sm:$0xff] }
   0xd   :  { %v3214_v18 = vld [vmem:[#allocation2 + $0xf8] sm:$0xff]  ;;  %v3189_v22 = vld [vmem:[#allocation2 + $0x30] sm:$0xff]  ;;  %v3191_v24 = vld [vmem:[#allocation2 + $0x40] sm:$0xff] }
   0xe   :  { %v3210_v19 = vld [vmem:[#allocation2 + $0xd8] sm:$0xff]  ;;  %v3192_v40 = vld [vmem:[#allocation2 + $0x48] sm:$0xff]  ;;  %v3193_v59 = vld [vmem:[#allocation2 + $0x50] sm:$0xff] }
   0xf   :  { %351 = vmatpush.bf16.msra.mxu0 %v3220_v2  ;;  %3228 = vmatpush.bf16.msra.mxu3 %v3220_v2  ;;  %v3190_v23 = vld [vmem:[#allocation2 + $0x38] sm:$0xff] }
  0x10   :  { %3227 = vmatpush.bf16.msra.mxu2 %v3220_v2 }
  0x13   :  { %352 = vmatpush.bf16.msra.mxu0 %v3219_v3  ;;  %3230 = vmatpush.bf16.msra.mxu3 %v3219_v3 }
  0x14   :  { %3229 = vmatpush.bf16.msra.mxu2 %v3219_v3 }
  0x17   :  { %353 = vmatpush.bf16.msra.mxu0 %v3218_v4  ;;  %3232 = vmatpush.bf16.msra.mxu3 %v3218_v4 }
  0x18   :  { %3231 = vmatpush.bf16.msra.mxu2 %v3218_v4 }
  0x1b   :  { %354 = vmatpush.bf16.msra.mxu0 %v3217_v5  ;;  %3234 = vmatpush.bf16.msra.mxu3 %v3217_v5 }
  0x1c   :  { %3233 = vmatpush.bf16.msra.mxu2 %v3217_v5 }
  0x1f   :  { %355 = vmatpush.bf16.msra.mxu0 %v3216_v6  ;;  %3236 = vmatpush.bf16.msra.mxu3 %v3216_v6 }
  0x20   :  { %3235 = vmatpush.bf16.msra.mxu2 %v3216_v6 }
  0x23   :  { %356 = vmatpush.bf16.msra.mxu0 %v3215_v7  ;;  %3238 = vmatpush.bf16.msra.mxu3 %v3215_v7 }
  0x24   :  { %3237 = vmatpush.bf16.msra.mxu2 %v3215_v7 }
  0x26   :  { %357 = vmatmul.bf16.vlgmr.msra.gmra.mxu0 %v3183_v8  ;;  %497 = vmatmul.bf16.vlgmr.msra.gmra.mxu3 %v3211_v9 }
  0x27   :  { %477 = vmatmul.bf16.vlgmr.msra.gmra.mxu2 %v3207_v10 }
  0x36   :  { %362 = vmatmul.bf16.gmra.mxu0 %v3184_v11  ;;  %502 = vmatmul.bf16.gmra.mxu3 %v3212_v12 }
  0x37   :  { %482 = vmatmul.bf16.gmra.mxu2 %v3208_v13 }
  0x46   :  { %367 = vmatmul.bf16.gmra.mxu0 %v3185_v14  ;;  %507 = vmatmul.bf16.gmra.mxu3 %v3213_v15 }
  0x47   :  { %487 = vmatmul.bf16.gmra.mxu2 %v3209_v16 }
  0x56   :  { %372 = vmatmul.bf16.gmra.mxu0 %v3186_v17  ;;  %512 = vmatmul.bf16.gmra.mxu3 %v3214_v18  ;;  %v3194_v17 = vld [vmem:[#allocation2 + $0x58] sm:$0xff] }
  0x57   :  { %492 = vmatmul.bf16.gmra.mxu2 %v3210_v19 }
  0x66   :  { %377 = vmatmul.bf16.gmra.mxu0 %v3187_v20 }
  0x76   :  { %382 = vmatmul.bf16.gmra.mxu0 %v3188_v21 }
  0x86   :  { %387 = vmatmul.bf16.gmra.mxu0 %v3189_v22 }
  0x96   :  { %392 = vmatmul.bf16.gmra.mxu0 %v3190_v23 }
  0xa3   :  { %v358_v25 = vpop.f32.mrf.mxu0 }
  0xa4   :  { %v518_v27 = vpack.c.bf16 %v358_v25, %v358_v25 }
  0xa6   :  { %397 = vmatmul.bf16.gmra.mxu0 %v3191_v24  ;;  %v590_v31 = vunpack.c.l.b16 %v518_v27 }
  0xa9   :  { %v498_v26 = vpop.f32.mrf.mxu3 }
  0xaa   :  { %v478_v28 = vpop.f32.mrf.mxu2  ;;  %v574_v32 = vpack.c.bf16 %v498_v26, %v498_v26 }
  0xab   :  { %v360_v29 = vpop.f32.mrf.mxu0  ;;  %v566_v34 = vpack.c.bf16 %v478_v28, %v478_v28 }
  0xac   :  { %v519_v30 = vpack.c.bf16 %v360_v29, %v360_v29  ;;  %v1158_v37 = vunpack.c.l.b16 %v574_v32 }
  0xad   :  { %v1077_v41 = vunpack.c.l.b16 %v566_v34 }
  0xae   :  { %v591_v33 = vunpack.c.l.b16 %v519_v30 }
  0xb0   :  { %v3607_v35 = vpack.c.b16 %v591_v33, %v590_v31 }
  0xb1   :  { %v500_v36 = vpop.f32.mrf.mxu3 }
  0xb2   :  { %v575_v38 = vpack.c.bf16 %v500_v36, %v500_v36  ;;  %1991 = vrot.lane.b32.xlu2 %v3607_v35, %s3556_s14  ;;  %602 = vrot.lane.b32.xlu0 %v3607_v35, %s3558_s1  ;;  %v480_v39 = vpop.f32.mrf.mxu2 }
  0xb3   :  { %v363_v42 = vpop.f32.mrf.mxu0  ;;  %v567_v43 = vpack.c.bf16 %v480_v39, %v480_v39 }
  0xb4   :  { %v1159_v44 = vunpack.c.l.b16 %v575_v38  ;;  %v520_v53 = vpack.c.bf16 %v363_v42, %v363_v42 }
  0xb5   :  { %v1078_v45 = vunpack.c.l.b16 %v567_v43 }
  0xb6   :  { %402 = vmatmul.bf16.gmra.mxu0 %v3192_v40  ;;  %v3613_v46 = vpack.c.b16 %v1159_v44, %v1158_v37  ;;  %v592_v61 = vunpack.c.l.b16 %v520_v53  ;;  %v3195_v37 = vld [vmem:[#allocation2 + $0x60] sm:$0xff] }
  0xb7   :  { %v3615_v47 = vpack.c.b16 %v1078_v45, %v1077_v41 }
  0xb8   :  { %1170 = vrot.lane.b32.xlu1 %v3613_v46, %s3558_s1 }
  0xb9   :  { %v503_v48 = vpop.f32.mrf.mxu3 }
  0xba   :  { %1089 = vrot.lane.b32.xlu0 %v3615_v47, %s3558_s1  ;;  %v483_v49 = vpop.f32.mrf.mxu2  ;;  %v576_v51 = vpack.c.bf16 %v503_v48, %v503_v48 }
  0xbb   :  { %v365_v50 = vpop.f32.mrf.mxu0  ;;  %v568_v62 = vpack.c.bf16 %v483_v49, %v483_v49 }
  0xbc   :  { %v521_v52 = vpack.c.bf16 %v365_v50, %v365_v50  ;;  %v1160_v55 = vunpack.c.l.b16 %v576_v51 }
  0xbd   :  { %v1079_v3 = vunpack.c.l.b16 %v568_v62 }
  0xbe   :  { %v593_v56 = vunpack.c.l.b16 %v521_v52 }
  0xc0   :  { %2502 = vrot.lane.b32.xlu1 %v3613_v46, %s3556_s14  ;;  %v3627_v2 = vpack.c.b16 %v593_v56, %v592_v61 }
  0xc1   :  { %v505_v54 = vpop.f32.mrf.mxu3 }
  0xc2   :  { %v577_v57 = vpack.c.bf16 %v505_v54, %v505_v54  ;;  %2429 = vrot.lane.b32.xlu0 %v3615_v47, %s3556_s14  ;;  %v485_v58 = vpop.f32.mrf.mxu2 }
  0xc3   :  { %v368_v60 = vpop.f32.mrf.mxu0  ;;  %v569_v0 = vpack.c.bf16 %v485_v58, %v485_v58  ;;  %v3196_v58 = vld [vmem:[#allocation2 + $0x68] sm:$0xff] }
  0xc4   :  { %v1161_v63 = vunpack.c.l.b16 %v577_v57  ;;  %v522_v11 = vpack.c.bf16 %v368_v60, %v368_v60 }
  0xc5   :  { %v1080_v4 = vunpack.c.l.b16 %v569_v0 }
  0xc6   :  { %407 = vmatmul.bf16.gmra.mxu0 %v3193_v59  ;;  %v3625_v1 = vpack.c.b16 %v1161_v63, %v1160_v55  ;;  %v594_v19 = vunpack.c.l.b16 %v522_v11 }
  0xc7   :  { %v3635_v8 = vpack.c.b16 %v1080_v4, %v1079_v3 }
  0xc8   :  { %1172 = vrot.lane.b32.xlu2 %v3625_v1, %s3558_s1  ;;  %1993 = vrot.lane.b32.xlu1 %v3627_v2, %s3556_s14 }
  0xc9   :  { %v508_v5 = vpop.f32.mrf.mxu3 }
  0xca   :  { %604 = vrot.lane.b32.xlu0 %v3627_v2, %s3558_s1  ;;  %v488_v6 = vpop.f32.mrf.mxu2  ;;  %v578_v10 = vpack.c.bf16 %v508_v5, %v508_v5  ;;  %v3197_v5 = vld [vmem:[#allocation2 + $0x70] sm:$0xff] }
  0xcb   :  { %v370_v7 = vpop.f32.mrf.mxu0  ;;  %v570_v21 = vpack.c.bf16 %v488_v6, %v488_v6 }
  0xcc   :  { %v523_v9 = vpack.c.bf16 %v370_v7, %v370_v7  ;;  %v1162_v14 = vunpack.c.l.b16 %v578_v10 }
  0xcd   :  { %v1081_v25 = vunpack.c.l.b16 %v570_v21 }
  0xce   :  { %v595_v13 = vunpack.c.l.b16 %v523_v9 }
  0xd0   :  { %2504 = vrot.lane.b32.xlu2 %v3625_v1, %s3556_s14  ;;  %1091 = vrot.lane.b32.xlu1 %v3635_v8, %s3558_s1  ;;  %v3643_v23 = vpack.c.b16 %v595_v13, %v594_v19 }
  0xd1   :  { %v510_v12 = vpop.f32.mrf.mxu3 }
  0xd2   :  { %2431 = vrot.lane.b32.xlu0 %v3635_v8, %s3556_s14  ;;  %v490_v15 = vpop.f32.mrf.mxu2  ;;  %v579_v16 = vpack.c.bf16 %v510_v12, %v510_v12 }
  0xd3   :  { %v373_v18 = vpop.f32.mrf.mxu0  ;;  %v571_v22 = vpack.c.bf16 %v490_v15, %v490_v15 }
  0xd4   :  { %v1163_v20 = vunpack.c.l.b16 %v579_v16  ;;  %v524_v33 = vpack.c.bf16 %v373_v18, %v373_v18 }
  0xd5   :  { %v1082_v26 = vunpack.c.l.b16 %v571_v22  ;;  %v3199_v22 = vld [vmem:[#allocation2 + $0x80] sm:$0xff] }
  0xd6   :  { %412 = vmatmul.bf16.gmra.mxu0 %v3194_v17  ;;  %v3645_v24 = vpack.c.b16 %v1163_v20, %v1162_v14  ;;  %v596_v41 = vunpack.c.l.b16 %v524_v33  ;;  %v3198_v14 = vld [vmem:[#allocation2 + $0x78] sm:$0xff] }
  0xd7   :  { %v3653_v30 = vpack.c.b16 %v1082_v26, %v1081_v25 }
  0xd8   :  { %1995 = vrot.lane.b32.xlu2 %v3643_v23, %s3556_s14  ;;  %606 = vrot.lane.b32.xlu1 %v3643_v23, %s3558_s1 }
  0xd9   :  { %v513_v32 = vpop.f32.mrf.mxu3 }
  0xda   :  { %1174 = vrot.lane.b32.xlu0 %v3645_v24, %s3558_s1  ;;  %v493_v27 = vpop.f32.mrf.mxu2  ;;  %v580_v50 = vpack.c.bf16 %v513_v32, %v513_v32 }
  0xdb   :  { %v375_v28 = vpop.f32.mrf.mxu0  ;;  %v572_v31 = vpack.c.bf16 %v493_v27, %v493_v27 }
  0xdc   :  { %v525_v29 = vpack.c.bf16 %v375_v28, %v375_v28  ;;  %v1164_v55 = vunpack.c.l.b16 %v580_v50 }
  0xdd   :  { %v1083_v38 = vunpack.c.l.b16 %v572_v31 }
  0xde   :  { %v597_v34 = vunpack.c.l.b16 %v525_v29 }
  0xe0   :  { %2506 = vrot.lane.b32.xlu1 %v3645_v24, %s3556_s14  ;;  %1093 = vrot.lane.b32.xlu2 %v3653_v30, %s3558_s1  ;;  %v3661_v43 = vpack.c.b16 %v597_v34, %v596_v41 }
  0xe1   :  { %v515_v45 = vpop.f32.mrf.mxu3 }
  0xe2   :  { %2433 = vrot.lane.b32.xlu0 %v3653_v30, %s3556_s14  ;;  %v495_v36 = vpop.f32.mrf.mxu2  ;;  %v581_v52 = vpack.c.bf16 %v515_v45, %v515_v45 }
  0xe3   :  { %v378_v39 = vpop.f32.mrf.mxu0  ;;  %v573_v40 = vpack.c.bf16 %v495_v36, %v495_v36  ;;  %v3200_v36 = vld [vmem:[#allocation2 + $0x88] sm:$0xff] }
  0xe4   :  { %v526_v48 = vpack.c.bf16 %v378_v39, %v378_v39  ;;  %v1165_v56 = vunpack.c.l.b16 %v581_v52  ;;  %v3201_v52 = vld [vmem:[#allocation2 + $0x90] sm:$0xff] }
  0xe5   :  { %v1084_v42 = vunpack.c.l.b16 %v573_v40 }
  0xe6   :  { %417 = vmatmul.bf16.gmra.mxu0 %v3195_v37  ;;  %v672_v53 = vunpack.c.l.b16 %v526_v48  ;;  %v3677_v60 = vpack.c.b16 %v1165_v56, %v1164_v55 }
  0xe7   :  { %v3663_v44 = vpack.c.b16 %v1084_v42, %v1083_v38 }
  0xe8   :  { %608 = vrot.lane.b32.xlu1 %v3661_v43, %s3558_s1 }
  0xea   :  { %1095 = vrot.lane.b32.xlu0 %v3663_v44, %s3558_s1 }
  0xeb   :  { %v380_v49 = vpop.f32.mrf.mxu0 }
  0xec   :  { %v527_v51 = vpack.c.bf16 %v380_v49, %v380_v49 }
  0xee   :  { %v673_v54 = vunpack.c.l.b16 %v527_v51 }
  0xf0   :  { %1997 = vrot.lane.b32.xlu1 %v3661_v43, %s3556_s14  ;;  %v3671_v57 = vpack.c.b16 %v673_v54, %v672_v53 }
  0xf2   :  { %2435 = vrot.lane.b32.xlu0 %v3663_v44, %s3556_s14  ;;  %684 = vrot.lane.b32.xlu2 %v3671_v57, %s3558_s1 }
  0xf3   :  { %v383_v59 = vpop.f32.mrf.mxu0 }
  0xf4   :  { %v528_v61 = vpack.c.bf16 %v383_v59, %v383_v59 }
  0xf6   :  { %422 = vmatmul.bf16.gmra.mxu0 %v3196_v58  ;;  %v674_v0 = vunpack.c.l.b16 %v528_v61 }
  0xf8   :  { %1176 = vrot.lane.b32.xlu1 %v3677_v60, %s3558_s1 }
  0xfa   :  { %2064 = vrot.lane.b32.xlu0 %v3671_v57, %s3556_s14 }
  0xfb   :  { %v385_v62 = vpop.f32.mrf.mxu0 }
  0xfc   :  { %v529_v63 = vpack.c.bf16 %v385_v62, %v385_v62 }
  0xfe   :  { %v675_v3 = vunpack.c.l.b16 %v529_v63 }
 0x100   :  { %2508 = vrot.lane.b32.xlu1 %v3677_v60, %s3556_s14  ;;  %v3685_v4 = vpack.c.b16 %v675_v3, %v674_v0  ;;  %v3202_v3 = vld [vmem:[#allocation2 + $0x98] sm:$0xff] }
 0x102   :  { %686 = vrot.lane.b32.xlu2 %v3685_v4, %s3558_s1 }
 0x103   :  { %v388_v6 = vpop.f32.mrf.mxu0 }
 0x104   :  { %v530_v7 = vpack.c.bf16 %v388_v6, %v388_v6 }
 0x106   :  { %427 = vmatmul.bf16.gmra.mxu0 %v3197_v5  ;;  %v676_v11 = vunpack.c.l.b16 %v530_v7 }
 0x108   :  { %2066 = vrot.lane.b32.xlu1 %v3685_v4, %s3556_s14 }
 0x10b   :  { %v390_v9 = vpop.f32.mrf.mxu0 }
 0x10c   :  { %v531_v10 = vpack.c.bf16 %v390_v9, %v390_v9 }
 0x10e   :  { %v677_v12 = vunpack.c.l.b16 %v531_v10 }
 0x110   :  { %v3691_v13 = vpack.c.b16 %v677_v12, %v676_v11 }
 0x112   :  { %688 = vrot.lane.b32.xlu0 %v3691_v13, %s3558_s1 }
 0x113   :  { %v393_v15 = vpop.f32.mrf.mxu0 }
 0x114   :  { %v532_v16 = vpack.c.bf16 %v393_v15, %v393_v15 }
 0x116   :  { %432 = vmatmul.bf16.gmra.mxu0 %v3198_v14  ;;  %v678_v19 = vunpack.c.l.b16 %v532_v16 }
 0x11a   :  { %2068 = vrot.lane.b32.xlu0 %v3691_v13, %s3556_s14 }
 0x11b   :  { %v395_v17 = vpop.f32.mrf.mxu0 }
 0x11c   :  { %v533_v18 = vpack.c.bf16 %v395_v17, %v395_v17 }
 0x11e   :  { %v679_v20 = vunpack.c.l.b16 %v533_v18  ;;  %v3742_v18 = vpop.permute.xlu2 %1991 }
 0x11f   :  { %5381 = vst [vmem:[#allocation11_spill] sm:$0xff] %v3742_v18 }
 0x120   :  { %v3697_v21 = vpack.c.b16 %v679_v20, %v678_v19  ;;  %v3203_v19 = vld [vmem:[#allocation2 + $0xa0] sm:$0xff] }
 0x122   :  { %2070 = vrot.lane.b32.xlu0 %v3697_v21, %s3556_s14  ;;  %690 = vrot.lane.b32.xlu1 %v3697_v21, %s3558_s1 }
 0x123   :  { %v398_v25 = vpop.f32.mrf.mxu0 }
 0x124   :  { %v534_v26 = vpack.c.bf16 %v398_v25, %v398_v25  ;;  %v3711_v38 = vpop.permute.xlu0 %602 }
 0x126   :  { %437 = vmatmul.bf16.gmra.mxu0 %v3199_v22  ;;  %v753_v31 = vunpack.c.l.b16 %v534_v26  ;;  %v3749_v25 = vpop.permute.xlu2 %1172 }
 0x12a   :  { %v3703_v27 = vpop.permute.xlu1 %1170 }
 0x12b   :  { %v400_v28 = vpop.f32.mrf.mxu0 }
 0x12c   :  { %v535_v29 = vpack.c.bf16 %v400_v28, %v400_v28  ;;  %v3719_v50 = vpop.permute.xlu0 %1089 }
 0x12e   :  { %v754_v32 = vunpack.c.l.b16 %v535_v29 }
 0x130   :  { %v3705_v33 = vpack.c.b16 %v754_v32, %v753_v31 }
 0x132   :  { %v3707_v34 = vpop.permute.xlu1 %2502  ;;  %765 = vrot.lane.b32.xlu2 %v3705_v33, %s3558_s1 }
 0x133   :  { %v403_v37 = vpop.f32.mrf.mxu0 }
 0x134   :  { %v536_v39 = vpack.c.bf16 %v403_v37, %v403_v37  ;;  %v3727_v58 = vpop.permute.xlu0 %2429 }
 0x135   :  { %5379 = vst [vmem:[#allocation9_spill] sm:$0xff] %v3727_v58 }
 0x136   :  { %442 = vmatmul.bf16.gmra.mxu0 %v3200_v36  ;;  %v755_v45 = vunpack.c.l.b16 %v536_v39 }
 0x13a   :  { %v3713_v40 = vpop.permute.xlu1 %1993  ;;  %2137 = vrot.lane.b32.xlu2 %v3705_v33, %s3556_s14 }
 0x13b   :  { %5378 = vst [vmem:[#allocation8_spill] sm:$0xff] %v3713_v40  ;;  %v405_v41 = vpop.f32.mrf.mxu0 }
 0x13c   :  { %v537_v42 = vpack.c.bf16 %v405_v41, %v405_v41  ;;  %v605_v6 = vpop.permute.xlu0 %604 }
 0x13d   :  { %v627_v31 = vsel %vm610_vm0, %v605_v6, 0 }
 0x13e   :  { %v756_v48 = vunpack.c.l.b16 %v537_v42  ;;  %v3204_v42 = vld [vmem:[#allocation2 + $0xa8] sm:$0xff] }
 0x140   :  { %v3717_v49 = vpack.c.b16 %v756_v48, %v755_v45  ;;  %v624_v48 = vsel %vm610_vm0, %v3711_v38, 0 }
 0x142   :  { %v3721_v51 = vpop.permute.xlu1 %1091  ;;  %2139 = vrot.lane.b32.xlu2 %v3717_v49, %s3556_s14  ;;  %767 = vrot.lane.b32.xlu0 %v3717_v49, %s3558_s1 }
 0x143   :  { %v408_v53 = vpop.f32.mrf.mxu0 }
 0x144   :  { %v538_v54 = vpack.c.bf16 %v408_v53, %v408_v53  ;;  %v3738_v16 = vpop.permute.xlu0 %2431 }
 0x145   :  { %5380 = vst [vmem:[#allocation10_spill] sm:$0xff] %v3738_v16 }
 0x146   :  { %447 = vmatmul.bf16.gmra.mxu0 %v3201_v52  ;;  %v757_v61 = vunpack.c.l.b16 %v538_v54  ;;  %v3764_v52 = vpop.permute.xlu2 %2504 }
 0x14a   :  { %v607_v55 = vpop.permute.xlu1 %606 }
 0x14b   :  { %v410_v56 = vpop.f32.mrf.mxu0  ;;  %v630_v22 = vsel %vm610_vm0, %v607_v55, 0 }
 0x14c   :  { %v539_v59 = vpack.c.bf16 %v410_v56, %v410_v56  ;;  %v3751_v26 = vpop.permute.xlu0 %1174 }
 0x14e   :  { %v758_v62 = vunpack.c.l.b16 %v539_v59 }
 0x150   :  { %v3729_v63 = vpack.c.b16 %v758_v62, %v757_v61  ;;  %v3772_v61 = vpop.permute.xlu2 %1995 }
 0x151   :  { %5384 = vst [vmem:[#allocation14_spill] sm:$0xff] %v3772_v61 }
 0x152   :  { %v3731_v0 = vpop.permute.xlu1 %2506  ;;  %769 = vrot.lane.b32.xlu1 %v3729_v63, %s3558_s1 }
 0x153   :  { %v413_v5 = vpop.f32.mrf.mxu0 }
 0x154   :  { %v540_v7 = vpack.c.bf16 %v413_v5, %v413_v5  ;;  %v3766_v53 = vpop.permute.xlu0 %2433 }
 0x155   :  { %5383 = vst [vmem:[#allocation13_spill] sm:$0xff] %v3766_v53 }
 0x156   :  { %452 = vmatmul.bf16.gmra.mxu0 %v3202_v3  ;;  %v759_v14 = vunpack.c.l.b16 %v540_v7  ;;  %v3205_v7 = vld [vmem:[#allocation2 + $0xb0] sm:$0xff] }
 0x15a   :  { %v609_v9 = vpop.permute.xlu1 %608  ;;  %2141 = vrot.lane.b32.xlu1 %v3729_v63, %s3556_s14 }
 0x15b   :  { %v415_v10 = vpop.f32.mrf.mxu0  ;;  %v633_v11 = vsel %vm610_vm0, %v609_v9, 0 }
 0x15c   :  { %v541_v12 = vpack.c.bf16 %v415_v10, %v415_v10  ;;  %639 = vmatpush.bf16.xpose.msra.mxu1 %v633_v11  ;;  %v3774_v62 = vpop.permute.xlu0 %1095  ;;  %v3782_v10 = vpop.permute.xlu2 %1093 }
 0x15e   :  { %v760_v15 = vunpack.c.l.b16 %v541_v12 }
 0x160   :  { %v3740_v17 = vpack.c.b16 %v760_v15, %v759_v14 }
 0x162   :  { %2143 = vrot.lane.b32.xlu0 %v3740_v17, %s3556_s14  ;;  %771 = vrot.lane.b32.xlu2 %v3740_v17, %s3558_s1  ;;  %v3754_v36 = vpop.permute.xlu1 %1997 }
 0x163   :  { %v418_v20 = vpop.f32.mrf.mxu0  ;;  %5382 = vst [vmem:[#allocation12_spill] sm:$0xff] %v3754_v36 }
 0x164   :  { %640 = vmatpush.bf16.xpose.msra.mxu1 %v630_v22  ;;  %v542_v28 = vpack.c.bf16 %v418_v20, %v418_v20  ;;  %v685_v22 = vpop.permute.xlu2 %684 }
 0x166   :  { %457 = vmatmul.bf16.gmra.mxu0 %v3203_v19  ;;  %v834_v37 = vunpack.c.l.b16 %v542_v28 }
 0x16a   :  { %v3768_v54 = vpop.permute.xlu1 %1176 }
 0x16b   :  { %v420_v29 = vpop.f32.mrf.mxu0 }
 0x16c   :  { %v543_v32 = vpack.c.bf16 %v420_v29, %v420_v29  ;;  %641 = vmatpush.bf16.xpose.msra.mxu1 %v627_v31 }
 0x16e   :  { %v835_v39 = vunpack.c.l.b16 %v543_v32 }
 0x170   :  { %v3756_v41 = vpack.c.b16 %v835_v39, %v834_v37  ;;  %v687_v37 = vpop.permute.xlu2 %686 }
 0x172   :  { %2210 = vrot.lane.b32.xlu1 %v3756_v41, %s3556_s14  ;;  %846 = vrot.lane.b32.xlu0 %v3756_v41, %s3558_s1  ;;  %v3778_v6 = vpop.permute.xlu1 %2508 }
 0x173   :  { %v423_v45 = vpop.f32.mrf.mxu0 }
 0x174   :  { %642 = vmatpush.bf16.xpose.msra.mxu1 %v624_v48  ;;  %v544_v55 = vpack.c.bf16 %v423_v45, %v423_v45 }
 0x176   :  { %462 = vmatmul.bf16.gmra.mxu0 %v3204_v42  ;;  %v836_v3 = vunpack.c.l.b16 %v544_v55 }
 0x17a   :  { %v3790_v14 = vpop.permute.xlu1 %2066 }
 0x17b   :  { %v425_v56 = vpop.f32.mrf.mxu0  ;;  %3119 = vmatmul.msk.bf16.vlgmr.msra.gmra.mxu1 %vm610_vm0, %v3607_v35  ;;  %v3784_v35 = vpop.permute.xlu0 %2435 }
 0x17c   :  { %v545_v59 = vpack.c.bf16 %v425_v56, %v425_v56  ;;  %5385 = vst [vmem:[#allocation15_spill] sm:$0xff] %v3784_v35 }
 0x17e   :  { %v837_v38 = vunpack.c.l.b16 %v545_v59 }
 0x180   :  { %v3776_v5 = vpack.c.b16 %v837_v38, %v836_v3 }
 0x182   :  { %848 = vrot.lane.b32.xlu1 %v3776_v5, %s3558_s1 }
 0x183   :  { %v428_v9 = vpop.f32.mrf.mxu0  ;;  %v3794_v29 = vpop.permute.xlu0 %2064 }
 0x184   :  { %v546_v11 = vpack.c.bf16 %v428_v9, %v428_v9  ;;  %v708_v9 = vsel %vm610_vm0, %v687_v37, 0 }
 0x186   :  { %467 = vmatmul.bf16.gmra.mxu0 %v3205_v7  ;;  %v838_v19 = vunpack.c.l.b16 %v546_v11 }
 0x18a   :  { %2212 = vrot.lane.b32.xlu1 %v3776_v5, %s3556_s14 }
 0x18b   :  { %v430_v12 = vpop.f32.mrf.mxu0  ;;  %3120 = vmatmul.msk.bf16.gmra.mxu1 %vm610_vm0, %v3627_v2  ;;  %v689_v39 = vpop.permute.xlu0 %688 }
 0x18c   :  { %v547_v15 = vpack.c.bf16 %v430_v12, %v430_v12  ;;  %v711_v55 = vsel %vm610_vm0, %v689_v39, 0  ;;  %v766_v3 = vpop.permute.xlu2 %765 }
 0x18e   :  { %v839_v20 = vunpack.c.l.b16 %v547_v15 }
 0x190   :  { %v3792_v28 = vpack.c.b16 %v839_v20, %v838_v19  ;;  %v705_v19 = vsel %vm610_vm0, %v685_v22, 0 }
 0x192   :  { %2214 = vrot.lane.b32.xlu0 %v3792_v28, %s3556_s14  ;;  %850 = vrot.lane.b32.xlu2 %v3792_v28, %s3558_s1 }
 0x193   :  { %v433_v31 = vpop.f32.mrf.mxu0 }
 0x194   :  { %v691_v32 = vpop.permute.xlu1 %690  ;;  %v548_v42 = vpack.c.bf16 %v433_v31, %v433_v31 }
 0x195   :  { %v714_v2 = vsel %vm610_vm0, %v691_v32, 0 }
 0x196   :  { %720 = vmatpush.bf16.xpose.msrb.mxu2 %v714_v2  ;;  %v840_v56 = vunpack.c.l.b16 %v548_v42 }
 0x19b   :  { %v435_v45 = vpop.f32.mrf.mxu0  ;;  %3121 = vmatmul.msk.bf16.gmra.mxu1 %vm610_vm0, %v3643_v23  ;;  %v3811_v23 = vpop.permute.xlu2 %2137 }
 0x19c   :  { %v549_v48 = vpack.c.bf16 %v435_v45, %v435_v45 }
 0x19e   :  { %v841_v59 = vunpack.c.l.b16 %v549_v48  ;;  %721 = vmatpush.bf16.xpose.msrb.mxu2 %v711_v55 }
 0x1a0   :  { %v3804_v38 = vpack.c.b16 %v841_v59, %v840_v56 }
 0x1a2   :  { %2216 = vrot.lane.b32.xlu2 %v3804_v38, %s3556_s14  ;;  %852 = vrot.lane.b32.xlu0 %v3804_v38, %s3558_s1 }
 0x1a3   :  { %v438_v7 = vpop.f32.mrf.mxu0  ;;  %v3822_v37 = vpop.permute.xlu2 %2139 }
 0x1a4   :  { %v550_v11 = vpack.c.bf16 %v438_v7, %v438_v7 }
 0x1a6   :  { %722 = vmatpush.bf16.xpose.msrb.mxu2 %v708_v9  ;;  %v915_v20 = vunpack.c.l.b16 %v550_v11 }
 0x1ab   :  { %v440_v12 = vpop.f32.mrf.mxu0  ;;  %3122 = vmatmul.msk.bf16.gmra.mxu1 %vm610_vm0, %v3661_v43  ;;  %v3826_v43 = vpop.permute.xlu0 %2068 }
 0x1ac   :  { %v551_v15 = vpack.c.bf16 %v440_v12, %v440_v12 }
 0x1ae   :  { %v916_v31 = vunpack.c.l.b16 %v551_v15  ;;  %723 = vmatpush.bf16.xpose.msrb.mxu2 %v705_v19 }
 0x1b0   :  { %v3816_v32 = vpack.c.b16 %v916_v31, %v915_v20 }
 0x1b2   :  { %2283 = vrot.lane.b32.xlu0 %v3816_v32, %s3556_s14  ;;  %927 = vrot.lane.b32.xlu1 %v3816_v32, %s3558_s1 }
 0x1b3   :  { %v443_v2 = vpop.f32.mrf.mxu0  ;;  %v3831_v7 = vpop.permute.xlu0 %2070 }
 0x1b4   :  { %v552_v22 = vpack.c.bf16 %v443_v2, %v443_v2 }
 0x1b5   :  { %3123 = vmatmul.msk.bf16.vlgmr.msrb.gmra.mxu2 %vm610_vm0, %v3671_v57 }
 0x1b6   :  { %v917_v55 = vunpack.c.l.b16 %v552_v22 }
 0x1bb   :  { %v445_v39 = vpop.f32.mrf.mxu0  ;;  %v768_v12 = vpop.permute.xlu0 %767 }
 0x1bc   :  { %v553_v42 = vpack.c.bf16 %v445_v39, %v445_v39  ;;  %v772_v45 = vpop.permute.xlu2 %771  ;;  %v789_v31 = vsel %vm610_vm0, %v768_v12, 0  ;;  %v3206_v39 = vld [vmem:[#allocation2 + $0xb8] sm:$0xff] }
 0x1bd   :  { %v795_v48 = vsel %vm610_vm0, %v772_v45, 0  ;;  %472 = vmatmul.bf16.gmra.mxu0 %v3206_v39  ;;  %v786_v45 = vsel %vm610_vm0, %v766_v3, 0  ;;  %v1231_v3 = vlaneseq }
 0x1be   :  { %v918_v56 = vunpack.c.l.b16 %v553_v42  ;;  %801 = vmatpush.bf16.xpose.msrb.mxu3 %v795_v48 }
 0x1c0   :  { %v3829_v59 = vpack.c.b16 %v918_v56, %v917_v55 }
 0x1c2   :  { %929 = vrot.lane.b32.xlu2 %v3829_v59, %s3558_s1 }
 0x1c3   :  { %v448_v9 = vpop.f32.mrf.mxu0 }
 0x1c4   :  { %v770_v57 = vpop.permute.xlu1 %769  ;;  %v554_v15 = vpack.c.bf16 %v448_v9, %v448_v9 }
 0x1c5   :  { %3124 = vmatmul.msk.bf16.gmra.mxu2 %vm610_vm0, %v3685_v4  ;;  %v792_v11 = vsel %vm610_vm0, %v770_v57, 0 }
 0x1c6   :  { %802 = vmatpush.bf16.xpose.msrb.mxu3 %v792_v11  ;;  %v919_v2 = vunpack.c.l.b16 %v554_v15 }
 0x1ca   :  { %2285 = vrot.lane.b32.xlu2 %v3829_v59, %s3556_s14 }
 0x1cb   :  { %v450_v19 = vpop.f32.mrf.mxu0 }
 0x1cc   :  { %v555_v20 = vpack.c.bf16 %v450_v19, %v450_v19  ;;  %v3928_v58 = vpop.permute.xlu1 %2141 }
 0x1ce   :  { %v920_v22 = vunpack.c.l.b16 %v555_v20  ;;  %803 = vmatpush.bf16.xpose.msrb.mxu3 %v789_v31 }
 0x1d0   :  { %v3841_v42 = vpack.c.b16 %v920_v22, %v919_v2  ;;  %v3864_v2 = vand.u32 127, %v1231_v3 }
 0x1d2   :  { %931 = vrot.lane.b32.xlu0 %v3841_v42, %s3558_s1 }
 0x1d3   :  { %v453_v4 = vpop.f32.mrf.mxu0 }
 0x1d4   :  { %v556_v48 = vpack.c.bf16 %v453_v4, %v453_v4 }
 0x1d5   :  { %3125 = vmatmul.msk.bf16.gmra.mxu2 %vm610_vm0, %v3691_v13 }
 0x1d6   :  { %804 = vmatpush.bf16.xpose.msrb.mxu3 %v786_v45  ;;  %v921_v9 = vunpack.c.l.b16 %v556_v48 }
 0x1da   :  { %2287 = vrot.lane.b32.xlu0 %v3841_v42, %s3556_s14 }
 0x1db   :  { %v455_v55 = vpop.f32.mrf.mxu0 }
 0x1dc   :  { %v557_v56 = vpack.c.bf16 %v455_v55, %v455_v55  ;;  %v3884_v55 = vpop.permute.xlu0 %2143 }
 0x1dd   :  { %3127 = vmatmul.msk.bf16.vlgmr.msrb.gmra.mxu3 %vm610_vm0, %v3705_v33  ;;  %v3862_v33 = vshrl.u32 %v1231_v3, 7 }
 0x1de   :  { %v922_v57 = vunpack.c.l.b16 %v557_v56 }
 0x1df   :  { %v1235_v22 = vadd.s32 24, %v3862_v33  ;;  %vm3935_vm8 = vcmp.ge.s32.totalorder %v3862_v33, %v3864_v2 }
 0x1e0   :  { %v3852_v11 = vpack.c.b16 %v922_v57, %v921_v9  ;;  %v1233_v9 = vadd.s32 8, %v3862_v33  ;;  %v1234_v57 = vadd.s32 16, %v3862_v33 }
 0x1e1   :  { %vm3870_vm1 = vcmp.ge.s32.totalorder %v1235_v22, %v3864_v2 }
 0x1e2   :  { %2289 = vrot.lane.b32.xlu0 %v3852_v11, %s3556_s14  ;;  %933 = vrot.lane.b32.xlu1 %v3852_v11, %s3558_s1  ;;  %vm3891_vm3 = vcmp.ge.s32.totalorder %v1233_v9, %v3864_v2  ;;  %vm3896_vm4 = vcmp.ge.s32.totalorder %v1234_v57, %v3864_v2 }
 0x1e3   :  { %v458_v13 = vpop.f32.mrf.mxu0 }
 0x1e4   :  { %v558_v12 = vpack.c.bf16 %v458_v13, %v458_v13  ;;  %v847_v3 = vpop.permute.xlu0 %846 }
 0x1e5   :  { %3126 = vmatmul.msk.bf16.gmra.mxu2 %vm610_vm0, %v3697_v21 }
 0x1e6   :  { %v996_v20 = vunpack.c.l.b16 %v558_v12 }
 0x1eb   :  { %v460_v15 = vpop.f32.mrf.mxu0 }
 0x1ec   :  { %v559_v19 = vpack.c.bf16 %v460_v15, %v460_v15  ;;  %v851_v61 = vpop.permute.xlu2 %850 }
 0x1ed   :  { %3128 = vmatmul.msk.bf16.gmra.mxu3 %vm610_vm0, %v3717_v49  ;;  %v1236_v49 = vadd.s32 32, %v3862_v33 }
 0x1ee   :  { %v997_v31 = vunpack.c.l.b16 %v559_v19  ;;  %v1238_v19 = vadd.s32 48, %v3862_v33 }
 0x1ef   :  { %vm3878_vm2 = vcmp.ge.s32.totalorder %v1236_v49, %v3864_v2 }
 0x1f0   :  { %v3867_v39 = vpack.c.b16 %v997_v31, %v996_v20  ;;  %vm3910_vm6 = vcmp.ge.s32.totalorder %v1238_v19, %v3864_v2 }
 0x1f2   :  { %5386 = vst [vmem:[#allocation16_spill] sm:$0xff] %v3867_v39  ;;  %1008 = vrot.lane.b32.xlu2 %v3867_v39, %s3558_s1 }
 0x1f3   :  { %v463_v45 = vpop.f32.mrf.mxu0 }
 0x1f4   :  { %v560_v16 = vpack.c.bf16 %v463_v45, %v463_v45 }
 0x1f8   :  { %v644_v4 = vpop.f32.mrf.mxu1 }
 0x1fa   :  { %2356 = vrot.lane.b32.xlu2 %v3867_v39, %s3556_s14  ;;  %v3931_v39 = vpop.permute.xlu1 %2210 }
 0x1fb   :  { %v465_v13 = vpop.f32.mrf.mxu0 }
 0x1fc   :  { %v561_v53 = vpack.c.bf16 %v465_v13, %v465_v13 }
 0x1fd   :  { %3129 = vmatmul.msk.bf16.gmra.mxu3 %vm610_vm0, %v3729_v63 }
 0x1fe   :  { %v999_v18 = vunpack.c.l.b16 %v561_v53 }
 0x200   :  { %v646_v56 = vpop.f32.mrf.mxu1 }
 0x201   :  { %v3903_v20 = vsel %vm3891_vm3, %v646_v56, -inf }
 0x202   :  { %v1334_v9 = vsel %vm1330_vm5, %v3903_v20, -inf }
 0x203   :  { %v468_v56 = vpop.f32.mrf.mxu0 }
 0x204   :  { %v3918_v57 = vpop.permute.xlu0 %2214  ;;  %v562_v40 = vpack.c.bf16 %v468_v56, %v468_v56 }
 0x205   :  { %5397 = vst [vmem:[#allocation17_spill] sm:$0xff] %v3918_v57 }
 0x206   :  { %v1000_v13 = vunpack.c.l.b16 %v562_v40 }
 0x208   :  { %v649_v63 = vpop.f32.mrf.mxu1 }
 0x209   :  { %v3907_v31 = vsel %vm3896_vm4, %v649_v63, -inf  ;;  %v1239_v63 = vadd.s32 56, %v3862_v33 }
 0x20a   :  { %v1337_v49 = vsel %vm1330_vm5, %v3907_v31, -inf }
 0x20b   :  { %vm3924_vm7 = vcmp.ge.s32.totalorder %v1239_v63, %v3864_v2 }
 0x20c   :  { %1335 = vmax.xlane.f32.xlu0 %v1334_v9  ;;  %1338 = vmax.xlane.f32.xlu1 %v1337_v49  ;;  %v470_v49 = vpop.f32.mrf.mxu0  ;;  %v998_v9 = vunpack.c.l.b16 %v560_v16  ;;  %v3944_v16 = vsel %vm3935_vm8, %v644_v4, -inf  ;;  %v1116_v4 = vsel %vm610_vm0, %v3782_v10, 0 }
 0x20d   :  { %3130 = vmatmul.msk.bf16.gmra.mxu3 %vm610_vm0, %v3740_v17  ;;  %v563_v17 = vpack.c.bf16 %v470_v49, %v470_v49  ;;  %v1331_v56 = vsel %vm1330_vm5, %v3944_v16, -inf }
 0x20e   :  { %v3939_v45 = vpack.c.b16 %v999_v18, %v998_v9  ;;  %v867_v18 = vsel %vm610_vm0, %v847_v3, 0  ;;  %v1113_v3 = vsel %vm610_vm0, %v3721_v51, 0 }
 0x20f   :  { %v1001_v36 = vunpack.c.l.b16 %v563_v17 }
 0x211   :  { %v3948_v53 = vpack.c.b16 %v1001_v36, %v1000_v13  ;;  %v1119_v36 = vsel %vm610_vm0, %v3774_v62, 0  ;;  %v1237_v62 = vadd.s32 40, %v3862_v33 }
 0x213   :  { %5402 = vst [vmem:[#allocation18_spill] sm:$0xff] %v3948_v53  ;;  %vm3970_vm9 = vcmp.ge.s32.totalorder %v1237_v62, %v3864_v2 }
 0x214   :  { %v853_v35 = vpop.permute.xlu0 %852 }
 0x215   :  { %v876_v57 = vsel %vm610_vm0, %v853_v35, 0  ;;  %v873_v35 = vsel %vm610_vm0, %v851_v61, 0  ;;  %v651_v61 = vpop.f32.mrf.mxu1 }
 0x216   :  { %882 = vmatpush.bf16.xpose.msrb.mxu1 %v876_v57  ;;  %v849_v57 = vpop.permute.xlu1 %848 }
 0x217   :  { %v870_v40 = vsel %vm610_vm0, %v849_v57, 0 }
 0x21d   :  { %v654_v9 = vpop.f32.mrf.mxu1 }
 0x21e   :  { %883 = vmatpush.bf16.xpose.msrb.mxu1 %v873_v35  ;;  %v3974_v10 = vpop.permute.xlu1 %2212  ;;  %v1110_v35 = vsel %vm610_vm0, %v3719_v50, 0 }
 0x220   :  { %1010 = vrot.lane.b32.xlu0 %v3939_v45, %s3558_s1 }
 0x223   :  { %1332 = vmax.xlane.f32.xlu2 %v1331_v56 }
 0x225   :  { %1012 = vrot.lane.b32.xlu1 %v3948_v53, %s3558_s1  ;;  %v656_v13 = vpop.f32.mrf.mxu1 }
 0x226   :  { %884 = vmatpush.bf16.xpose.msrb.mxu1 %v870_v40  ;;  %v3982_v51 = vsel %vm3970_vm9, %v656_v13, -inf  ;;  %v928_v57 = vpop.permute.xlu1 %927 }
 0x227   :  { %v1346_v2 = vsel %vm1330_vm5, %v3982_v51, -inf }
 0x22d   :  { %2360 = vrot.lane.b32.xlu1 %v3948_v53, %s3556_s14  ;;  %v659_v50 = vpop.f32.mrf.mxu1 }
 0x22e   :  { %885 = vmatpush.bf16.xpose.msrb.mxu1 %v867_v18  ;;  %v3997_v18 = vpop.permute.xlu0 %2283 }
 0x235   :  { %3131 = vmatmul.msk.bf16.vlgmr.msrb.gmra.mxu1 %vm610_vm0, %v3756_v41  ;;  %v5403_v41 = vmov 0 }
 0x236   :  { %1125 = vmatpush.bf16.xpose.msra.mxu1 %v1119_v36  ;;  %v5404_v41 = vsel %vm3970_vm9, 4294967295, %v5403_v41 }
 0x237   :  { %5405 = vst [vmem:[#allocation19_spill] sm:$0xff] %v5404_v41 }
 0x238   :  { %v725_v49 = vpop.f32.mrf.mxu2 }
 0x23b   :  { %2358 = vrot.lane.b32.xlu2 %v3939_v45, %s3556_s14 }
 0x23e   :  { %1126 = vmatpush.bf16.xpose.msra.mxu1 %v1116_v4 }
 0x240   :  { %v727_v17 = vpop.f32.mrf.mxu2 }
 0x244   :  { %v932_v62 = vpop.permute.xlu0 %931 }
 0x245   :  { %3132 = vmatmul.msk.bf16.gmra.mxu1 %vm610_vm0, %v3776_v5  ;;  %v3992_v5 = vsel %vm3935_vm8, %v725_v49, -inf  ;;  %v954_v13 = vsel %vm610_vm0, %v932_v62, 0 }
 0x246   :  { %1127 = vmatpush.bf16.xpose.msra.mxu1 %v1113_v3  ;;  %v1355_v40 = vsel %vm1330_vm5, %v3992_v5, -inf }
 0x248   :  { %v3984_v33 = vpop.f32.mrf.mxu2 }
 0x24a   :  { %1347 = vmax.xlane.f32.xlu0 %v1346_v2 }
 0x24e   :  { %1128 = vmatpush.bf16.xpose.msra.mxu1 %v1110_v35 }
 0x250   :  { %v732_v56 = vpop.f32.mrf.mxu2 }
 0x251   :  { %v4011_v4 = vsel %vm3870_vm1, %v732_v56, -inf }
 0x252   :  { %1356 = vmax.xlane.f32.xlu0 %v1355_v40  ;;  %v1364_v3 = vsel %vm1330_vm5, %v4011_v4, -inf }
 0x255   :  { %3133 = vmatmul.msk.bf16.gmra.mxu1 %vm610_vm0, %v3792_v28  ;;  %v4019_v28 = vsel %vm3891_vm3, %v727_v17, -inf }
 0x256   :  { %2092 = vmatpush.bf16.msrb.mxu1 %v3831_v7  ;;  %v4001_v7 = vsel %vm3910_vm6, %v659_v50, -inf  ;;  %v1358_v35 = vsel %vm1330_vm5, %v4019_v28, -inf  ;;  %v4028_v50 = vsel %vm3870_vm1, %v651_v61, -inf  ;;  %v4043_v61 = vsel %vm3878_vm2, %v654_v9, -inf }
 0x257   :  { %v1340_v17 = vsel %vm1330_vm5, %v4028_v50, -inf  ;;  %v1343_v62 = vsel %vm1330_vm5, %v4043_v61, -inf  ;;  %v1200_v9 = vsel %vm610_vm0, %v3768_v54, 0  ;;  %v1197_v54 = vsel %vm610_vm0, %v3751_v26, 0 }
 0x258   :  { %v735_v49 = vpop.f32.mrf.mxu2 }
 0x259   :  { %v4032_v40 = vsel %vm3878_vm2, %v735_v49, -inf }
 0x25a   :  { %2093 = vmatpush.bf16.msrb.mxu1 %v3826_v43  ;;  %v934_v43 = vpop.permute.xlu1 %933  ;;  %1365 = vmax.xlane.f32.xlu0 %v1364_v3 }
 0x25b   :  { %v957_v36 = vsel %vm610_vm0, %v934_v43, 0 }
 0x25c   :  { %963 = vmatpush.bf16.xpose.msra.mxu2 %v957_v36  ;;  %v1367_v36 = vsel %vm1330_vm5, %v4032_v40, -inf }
 0x25e   :  { %2094 = vmatpush.bf16.msrb.mxu1 %v3790_v14  ;;  %v1349_v14 = vsel %vm1330_vm5, %v4001_v7, -inf }
 0x25f   :  { %1350 = vmax.xlane.f32.xlu1 %v1349_v14 }
 0x260   :  { %v4024_v2 = vpop.f32.mrf.mxu2 }
 0x262   :  { %2095 = vmatpush.bf16.msrb.mxu1 %v3794_v29  ;;  %v4015_v29 = vpop.permute.xlu2 %2216 }
 0x264   :  { %964 = vmatpush.bf16.xpose.msra.mxu2 %v954_v13  ;;  %1341 = vmax.xlane.f32.xlu2 %v1340_v17  ;;  %v473_v13 = vpop.f32.mrf.mxu0 }
 0x265   :  { %3134 = vmatmul.msk.bf16.gmra.mxu1 %vm610_vm0, %v3804_v38  ;;  %v2288_v38 = vpop.permute.xlu0 %2287 }
 0x267   :  { %1359 = vmax.xlane.f32.xlu1 %v1358_v35  ;;  %v948_v35 = vsel %vm610_vm0, %v928_v57, 0 }
 0x268   :  { %v740_v14 = vpop.f32.mrf.mxu2 }
 0x269   :  { %v4047_v49 = vsel %vm3910_vm6, %v740_v14, -inf  ;;  %v4068_v14 = vpop.f32.mrf.mxu3 }
 0x26a   :  { %v930_v56 = vpop.permute.xlu2 %929  ;;  %v1373_v3 = vsel %vm1330_vm5, %v4047_v49, -inf }
 0x26b   :  { %v951_v43 = vsel %vm610_vm0, %v930_v56, 0  ;;  %1374 = vmax.xlane.f32.xlu0 %v1373_v3  ;;  %v564_v3 = vpack.c.bf16 %v473_v13, %v473_v13 }
 0x26c   :  { %965 = vmatpush.bf16.xpose.msra.mxu2 %v951_v43  ;;  %1344 = vmax.xlane.f32.xlu2 %v1343_v62  ;;  %v475_v57 = vpop.f32.mrf.mxu0 }
 0x26d   :  { %v565_v62 = vpack.c.bf16 %v475_v57, %v475_v57 }
 0x26f   :  { %1368 = vmax.xlane.f32.xlu1 %v1367_v36  ;;  %v2290_v36 = vpop.permute.xlu0 %2289 }
 0x270   :  { %v742_v56 = vpop.f32.mrf.mxu2 }
 0x271   :  { %v4058_v17 = vsel %vm3924_vm7, %v742_v56, -inf  ;;  %v1003_v56 = vunpack.c.l.b16 %v565_v62  ;;  %v808_v57 = vpop.f32.mrf.mxu3 }
 0x272   :  { %v1376_v43 = vsel %vm1330_vm5, %v4058_v17, -inf }
 0x274   :  { %966 = vmatpush.bf16.xpose.msra.mxu2 %v948_v35  ;;  %v2286_v35 = vpop.permute.xlu2 %2285 }
 0x275   :  { %3143 = vmatmul.msk.bf16.vlgmr.msra.gmra.mxu1 %vm610_vm0, %v3615_v47 }
 0x276   :  { %2311 = vmatpush.bf16.msra.mxu1 %v2290_v36 }
 0x277   :  { %1377 = vmax.xlane.f32.xlu1 %v1376_v43 }
 0x27a   :  { %2312 = vmatpush.bf16.msra.mxu1 %v2288_v38 }
 0x27b   :  { %3135 = vmatmul.msk.bf16.vlgmr.msra.gmra.mxu2 %vm610_vm0, %v3816_v32  ;;  %v1194_v32 = vsel %vm610_vm0, %v3749_v25, 0  ;;  %v1191_v25 = vsel %vm610_vm0, %v3703_v27, 0  ;;  %v811_v27 = vpop.f32.mrf.mxu3 }
 0x27c   :  { %1206 = vmatpush.bf16.xpose.msrb.mxu2 %v1200_v9  ;;  %v1002_v9 = vunpack.c.l.b16 %v564_v3  ;;  %v4077_v38 = vpop.permute.xlu2 %1008 }
 0x27e   :  { %2313 = vmatpush.bf16.msra.mxu1 %v2286_v35 }
 0x27f   :  { %v1336_v43 = vpop.xlane.xlu0 %1335  ;;  %v1339_v47 = vpop.xlane.xlu1 %1338 }
 0x280   :  { %v1524_v36 = vsub.f32 %v3903_v20, %v1336_v43  ;;  %v1525_v26 = vsub.f32 %v3907_v31, %v1339_v47 }
 0x282   :  { %v1589_v53 = vmul.f32 1.442695, %v1524_v36  ;;  %v1591_v13 = vmul.f32 1.442695, %v1525_v26  ;;  %2314 = vmatpush.bf16.msra.mxu1 %v3997_v18 }
 0x284   :  { %1207 = vmatpush.bf16.xpose.msrb.mxu2 %v1197_v54  ;;  %v4074_v54 = vpack.c.b16 %v1003_v56, %v1002_v9  ;;  %3247 = vpow2.f32 %v1589_v53 }
 0x285   :  { %3249 = vpow2.f32 %v1591_v13  ;;  %3144 = vmatmul.msk.bf16.gmra.mxu1 %vm610_vm0, %v3635_v8  ;;  %v4096_v8 = vpop.permute.xlu2 %2356  ;;  %v4139_v13 = vpop.f32.mrf.mxu3 }
 0x286   :  { %1014 = vrot.lane.b32.xlu2 %v4074_v54, %s3558_s1 }
 0x28a   :  { %v3248_v20 = vpop.eup %3247 }
 0x28b   :  { %3136 = vmatmul.msk.bf16.gmra.mxu2 %vm610_vm0, %v3829_v59  ;;  %v4088_v31 = vpop.eup %3249  ;;  %v1718_v53 = vsel %vm1330_vm5, %v3248_v20, 0.0  ;;  %v1908_v9 = vpack.c.bf16 %v3248_v20, %v3248_v20 }
 0x28c   :  { %1208 = vmatpush.bf16.xpose.msrb.mxu2 %v1194_v32  ;;  %1719 = vadd.xlane.f32.xlu0 %v1718_v53  ;;  %v1721_v59 = vsel %vm1330_vm5, %v4088_v31, 0.0 }
 0x28d   :  { %1722 = vadd.xlane.f32.xlu1 %v1721_v59 }
 0x28e   :  { %2362 = vrot.lane.b32.xlu2 %v4074_v54, %s3556_s14 }
 0x292   :  { %v4131_v36 = vpop.permute.xlu0 %1010 }
 0x294   :  { %1209 = vmatpush.bf16.xpose.msrb.mxu2 %v1191_v25 }
 0x295   :  { %3145 = vmatmul.msk.bf16.gmra.mxu1 %vm610_vm0, %v3653_v30  ;;  %v661_v30 = vpop.f32.mrf.mxu1 }
 0x297   :  { %v4137_v26 = vpop.permute.xlu1 %1012 }
 0x29b   :  { %3137 = vmatmul.msk.bf16.gmra.mxu2 %vm610_vm0, %v3841_v42 }
 0x29c   :  { %2165 = vmatpush.bf16.msra.mxu2 %v3884_v55  ;;  %v4101_v55 = vsel %vm3891_vm3, %v808_v57, -inf }
 0x29d   :  { %v1382_v18 = vsel %vm1330_vm5, %v4101_v55, -inf }
 0x29e   :  { %1383 = vmax.xlane.f32.xlu0 %v1382_v18 }
 0x29f   :  { %v4151_v59 = vpop.permute.xlu1 %2360 }
 0x2a0   :  { %2166 = vmatpush.bf16.msra.mxu2 %v3928_v58  ;;  %v4105_v58 = vsel %vm3896_vm4, %v811_v27, -inf  ;;  %v4153_v27 = vpop.f32.mrf.mxu3 }
 0x2a1   :  { %5406 = vst [vmem:[#allocation20_spill] sm:$0xff] %v4105_v58  ;;  %v1385_v3 = vsel %vm1330_vm5, %v4105_v58, -inf }
 0x2a2   :  { %1386 = vmax.xlane.f32.xlu1 %v1385_v3 }
 0x2a4   :  { %2167 = vmatpush.bf16.msra.mxu2 %v3822_v37  ;;  %v1333_v37 = vpop.xlane.xlu2 %1332 }
 0x2a5   :  { %v1523_v62 = vsub.f32 %v3944_v16, %v1333_v37  ;;  %3146 = vmatmul.msk.bf16.gmra.mxu1 %vm610_vm0, %v3663_v44  ;;  %v4129_v16 = vsel %vm3924_vm7, %v661_v30, -inf  ;;  %v4144_v44 = vsel %vm3896_vm4, %v3984_v33, -inf  ;;  %v4158_v33 = vsel %vm3970_vm9, %v4024_v2, -inf }
 0x2a6   :  { %v1361_v20 = vsel %vm1330_vm5, %v4144_v44, -inf  ;;  %v1370_v18 = vsel %vm1330_vm5, %v4158_v33, -inf }
 0x2a7   :  { %v1587_v35 = vmul.f32 1.442695, %v1523_v62 }
 0x2a8   :  { %2168 = vmatpush.bf16.msra.mxu2 %v3811_v23  ;;  %v4117_v23 = vunpack.c.l.b16 %v1908_v9  ;;  %v818_v9 = vpop.f32.mrf.mxu3 }
 0x2a9   :  { %3251 = vpow2.f32 %v1587_v35 }
 0x2ab   :  { %3138 = vmatmul.msk.bf16.gmra.mxu2 %vm610_vm0, %v3852_v11  ;;  %v1352_v11 = vsel %vm1330_vm5, %v4129_v16, -inf }
 0x2ac   :  { %v4176_v30 = vpop.permute.xlu2 %2358 }
 0x2af   :  { %v3252_v56 = vpop.eup %3251 }
 0x2b0   :  { %v1907_v32 = vpack.c.bf16 %v3252_v56, %v3252_v56 }
 0x2b2   :  { %v4119_v43 = vunpack.c.l.b16 %v1907_v32  ;;  %v887_v47 = vpop.f32.mrf.mxu1  ;;  %v1715_v32 = vsel %vm1330_vm5, %v3252_v56, 0.0 }
 0x2b7   :  { %1353 = vmax.xlane.f32.xlu2 %v1352_v11 }
 0x2ba   :  { %v4146_v57 = vpop.f32.mrf.mxu1 }
 0x2bb   :  { %3147 = vmatmul.msk.bf16.vlgmr.msrb.gmra.mxu2 %vm610_vm0, %v3613_v46 }
 0x2bd   :  { %v1348_v25 = vpop.xlane.xlu0 %1347 }
 0x2be   :  { %v1528_v46 = vsub.f32 %v3982_v51, %v1348_v25 }
 0x2bf   :  { %1362 = vmax.xlane.f32.xlu2 %v1361_v20 }
 0x2c0   :  { %v1597_v53 = vmul.f32 1.442695, %v1528_v46  ;;  %v4183_v46 = vsel %vm3935_vm8, %v4068_v14, -inf }
 0x2c1   :  { %5408 = vst [vmem:[#allocation22_spill] sm:$0xff] %v4183_v46 }
 0x2c2   :  { %3253 = vpow2.f32 %v1597_v53  ;;  %v4164_v51 = vpop.f32.mrf.mxu1 }
 0x2c5   :  { %v1357_v37 = vpop.xlane.xlu0 %1356 }
 0x2c6   :  { %v1531_v2 = vsub.f32 %v3992_v5, %v1357_v37  ;;  %v4192_v37 = vsel %vm3935_vm8, %v887_v47, -inf }
 0x2c7   :  { %1371 = vmax.xlane.f32.xlu2 %v1370_v18  ;;  %v1379_v18 = vsel %vm1330_vm5, %v4183_v46, -inf  ;;  %5409 = vst [vmem:[#allocation23_spill] sm:$0xff] %v4192_v37 }
 0x2c8   :  { %v4166_v3 = vpop.eup %3253  ;;  %v1603_v11 = vmul.f32 1.442695, %v1531_v2 }
 0x2c9   :  { %v1730_v62 = vsel %vm1330_vm5, %v4166_v3, 0.0 }
 0x2ca   :  { %1731 = vadd.xlane.f32.xlu1 %v1730_v62  ;;  %v894_v25 = vpop.f32.mrf.mxu1  ;;  %3255 = vpow2.f32 %v1603_v11 }
 0x2cb   :  { %3148 = vmatmul.msk.bf16.gmra.mxu2 %vm610_vm0, %v3625_v1  ;;  %v4174_v1 = vsel %vm3970_vm9, %v818_v9, -inf }
 0x2cc   :  { %5407 = vst [vmem:[#allocation21_spill] sm:$0xff] %v4174_v1  ;;  %v1394_v20 = vsel %vm1330_vm5, %v4174_v1, -inf }
 0x2cd   :  { %v4194_v62 = vpop.xlane.xlu0 %1365 }
 0x2cf   :  { %1716 = vadd.xlane.f32.xlu2 %v1715_v32 }
 0x2d0   :  { %v4197_v2 = vpop.eup %3255 }
 0x2d1   :  { %v1915_v47 = vpack.c.bf16 %v4197_v2, %v4197_v2 }
 0x2d2   :  { %v1351_v35 = vpop.xlane.xlu1 %1350  ;;  %1395 = vmax.xlane.f32.xlu1 %v1394_v20  ;;  %v4201_v32 = vpop.f32.mrf.mxu1 }
 0x2d7   :  { %1380 = vmax.xlane.f32.xlu2 %v1379_v18  ;;  %v1342_v14 = vpop.xlane.xlu2 %1341  ;;  %v2052_v18 = vunpack.c.l.b16 %v1915_v47 }
 0x2d8   :  { %v1526_v9 = vsub.f32 %v4028_v50, %v1342_v14 }
 0x2da   :  { %v1360_v5 = vpop.xlane.xlu1 %1359 }
 0x2db   :  { %v1532_v56 = vsub.f32 %v4019_v28, %v1360_v5  ;;  %3149 = vmatmul.msk.bf16.gmra.mxu2 %vm610_vm0, %v3645_v24  ;;  %v1403_v28 = vsel %vm1330_vm5, %v4192_v37, -inf  ;;  %v1593_v24 = vmul.f32 1.442695, %v1526_v9 }
 0x2dc   :  { %1404 = vmax.xlane.f32.xlu1 %v1403_v28  ;;  %v1909_v28 = vpack.c.bf16 %v4088_v31, %v4088_v31 }
 0x2dd   :  { %v1605_v53 = vmul.f32 1.442695, %v1532_v56 }
 0x2de   :  { %v1375_v56 = vpop.xlane.xlu0 %1374 }
 0x2df   :  { %3257 = vpow2.f32 %v1605_v53  ;;  %v1537_v53 = vsub.f32 %v4047_v49, %v1375_v56  ;;  %v1345_v50 = vpop.xlane.xlu2 %1344 }
 0x2e0   :  { %3259 = vpow2.f32 %v1593_v24  ;;  %v1527_v9 = vsub.f32 %v4043_v61, %v1345_v50  ;;  %v1529_v24 = vsub.f32 %v4001_v7, %v1351_v35  ;;  %v4219_v7 = vunpack.c.l.b16 %v1909_v28 }
 0x2e1   :  { %v1615_v49 = vmul.f32 1.442695, %v1537_v53  ;;  %v4260_v28 = vsel %vm3878_vm2, %v4153_v27, -inf }
 0x2e2   :  { %v1369_v20 = vpop.xlane.xlu1 %1368  ;;  %v1595_v46 = vmul.f32 1.442695, %v1527_v9  ;;  %v1599_v31 = vmul.f32 1.442695, %v1529_v24  ;;  %v1035_v24 = vsel %vm610_vm0, %v4137_v26, 0  ;;  %v1391_v27 = vsel %vm1330_vm5, %v4260_v28, -inf }
 0x2e3   :  { %v1535_v42 = vsub.f32 %v4032_v40, %v1369_v20  ;;  %v4214_v40 = vpop.f32.mrf.mxu1 }
 0x2e4   :  { %3261 = vpow2.f32 %v1595_v46  ;;  %v1912_v46 = vpack.c.bf16 %v4166_v3, %v4166_v3 }
 0x2e5   :  { %v3258_v11 = vpop.eup %3257  ;;  %3263 = vpow2.f32 %v1615_v49 }
 0x2e6   :  { %v1916_v5 = vpack.c.bf16 %v3258_v11, %v3258_v11  ;;  %v1742_v37 = vsel %vm1330_vm5, %v3258_v11, 0.0  ;;  %v3260_v58 = vpop.eup %3259  ;;  %v4249_v56 = vunpack.c.l.b16 %v1912_v46  ;;  %v1032_v46 = vsel %vm610_vm0, %v4131_v36, 0 }
 0x2e7   :  { %1743 = vadd.xlane.f32.xlu1 %v1742_v37  ;;  %v1910_v1 = vpack.c.bf16 %v3260_v58, %v3260_v58  ;;  %v1724_v47 = vsel %vm1330_vm5, %v3260_v58, 0.0  ;;  %v4225_v58 = vsel %vm3870_vm1, %v894_v25, -inf }
 0x2e8   :  { %v2053_v14 = vunpack.c.l.b16 %v1916_v5  ;;  %v1611_v5 = vmul.f32 1.442695, %v1535_v42  ;;  %1725 = vadd.xlane.f32.xlu2 %v1724_v47  ;;  %v1015_v42 = vpop.permute.xlu2 %1014 }
 0x2e9   :  { %v4221_v61 = vunpack.c.l.b16 %v1910_v1  ;;  %v4234_v1 = vsel %vm3870_vm1, %v4139_v13, -inf }
 0x2ea   :  { %v2060_v41 = vpack.c.b16 %v2053_v14, %v2052_v18  ;;  %v1378_v35 = vpop.xlane.xlu1 %1377  ;;  %3265 = vpow2.f32 %v1611_v5  ;;  %v3262_v37 = vpop.eup %3261  ;;  %v1388_v13 = vsel %vm1330_vm5, %v4234_v1, -inf }
 0x2eb   :  { %3150 = vmatmul.msk.bf16.gmra.mxu2 %vm610_vm0, %v3677_v60  ;;  %v1038_v60 = vsel %vm610_vm0, %v1015_v42, 0  ;;  %3267 = vpow2.f32 %v1599_v31  ;;  %v1911_v11 = vpack.c.bf16 %v3262_v37, %v3262_v37  ;;  %v1727_v20 = vsel %vm1330_vm5, %v3262_v37, 0.0  ;;  %v4244_v3 = vpop.eup %3263  ;;  %v902_v50 = vpop.f32.mrf.mxu1 }
 0x2ec   :  { %3155 = vmatmul.msk.bf16.vlgmr.msrb.gmra.mxu1 %vm1330_vm5, %v2060_v41  ;;  %v1538_v41 = vsub.f32 %v4058_v17, %v1378_v35  ;;  %1044 = vmatpush.bf16.xpose.msra.mxu3 %v1038_v60  ;;  %v1412_v17 = vsel %vm1330_vm5, %v4225_v58, -inf  ;;  %v1029_v37 = vsel %vm610_vm0, %v4077_v38, 0  ;;  %v5411_v38 = vld [vmem:[#allocation14_spill] sm:$0xff] }
 0x2ed   :  { %2530 = vmatpush.bf16.msrb.mxu1 %v3778_v6  ;;  %v1988_v6 = vpack.c.b16 %v4221_v61, %v4219_v7  ;;  %1728 = vadd.xlane.f32.xlu0 %v1727_v20 }
 0x2ee   :  { %v1617_v25 = vmul.f32 1.442695, %v1538_v41  ;;  %v821_v41 = vpop.f32.mrf.mxu3 }
 0x2ef   :  { %1413 = vmax.xlane.f32.xlu1 %v1412_v17  ;;  %v4286_v60 = vsel %vm3910_vm6, %v821_v41, -inf }
 0x2f0   :  { %3269 = vpow2.f32 %v1617_v25  ;;  %1389 = vmax.xlane.f32.xlu2 %v1388_v13  ;;  %v4251_v53 = vpop.eup %3265  ;;  %v2363_v18 = vpop.permute.xlu2 %2362  ;;  %v1397_v17 = vsel %vm1330_vm5, %v4286_v60, -inf  ;;  %v1739_v13 = vsel %vm1330_vm5, %v4197_v2, 0.0  ;;  %v5413_v2 = vld [vmem:[#allocation8_spill] sm:$0xff] }
 0x2f1   :  { %2531 = vmatpush.bf16.msrb.mxu1 %v3731_v0  ;;  %v4247_v0 = vunpack.c.l.b16 %v1911_v11  ;;  %v4255_v9 = vpop.eup %3267  ;;  %2384 = vmatpush.bf16.msrb.mxu2 %v2363_v18  ;;  %v1751_v47 = vsel %vm1330_vm5, %v4251_v53, 0.0  ;;  %v5410_v11 = vld [vmem:[#allocation12_spill] sm:$0xff] }
 0x2f2   :  { %v1733_v31 = vsel %vm1330_vm5, %v4255_v9, 0.0  ;;  %v5412_v18 = vld [vmem:[#allocation16_spill] sm:$0xff] }
 0x2f3   :  { %v1989_v14 = vpack.c.b16 %v4249_v56, %v4247_v0  ;;  %v904_v25 = vpop.f32.mrf.mxu1 }
 0x2f4   :  { %1045 = vmatpush.bf16.xpose.msra.mxu3 %v1035_v24  ;;  %v5414_v24 = vld [vmem:[#allocation11_spill] sm:$0xff] }
 0x2f5   :  { %2532 = vmatpush.bf16.msrb.mxu1 %v3764_v52  ;;  %v1921_v52 = vpack.c.bf16 %v4244_v3, %v4244_v3  ;;  %1392 = vmax.xlane.f32.xlu0 %v1391_v27 }
 0x2f6   :  { %v3270_v49 = vpop.eup %3269  ;;  %2385 = vmatpush.bf16.msrb.mxu2 %v4151_v59 }
 0x2f7   :  { %v1922_v5 = vpack.c.bf16 %v3270_v49, %v3270_v49  ;;  %1752 = vadd.xlane.f32.xlu1 %v1751_v47  ;;  %v4273_v35 = vunpack.c.l.b16 %v1921_v52  ;;  %v1760_v36 = vsel %vm1330_vm5, %v3270_v49, 0.0  ;;  %v5415_v47 = vld [vmem:[#allocation17_spill] sm:$0xff] }
 0x2f8   :  { %1734 = vadd.xlane.f32.xlu2 %v1733_v31 }
 0x2f9   :  { %2533 = vmatpush.bf16.msrb.mxu1 %v3707_v34  ;;  %v4275_v26 = vunpack.c.l.b16 %v1922_v5  ;;  %v4280_v34 = vsel %vm3910_vm6, %v902_v50, -inf  ;;  %v4332_v5 = vsel %vm3878_vm2, %v4201_v32, -inf }
 0x2fa   :  { %2386 = vmatpush.bf16.msrb.mxu2 %v4176_v30  ;;  %v1421_v59 = vsel %vm1330_vm5, %v4280_v34, -inf  ;;  %v1534_v30 = vsub.f32 %v4011_v4, %v4194_v62  ;;  %v4314_v4 = vsel %vm3891_vm3, %v4146_v57, -inf }
 0x2fb   :  { %v2063_v42 = vpack.c.b16 %v4275_v26, %v4273_v35  ;;  %v1130_v20 = vpop.f32.mrf.mxu1  ;;  %v1406_v52 = vsel %vm1330_vm5, %v4314_v4, -inf }
 0x2fc   :  { %1046 = vmatpush.bf16.xpose.msra.mxu3 %v1032_v46  ;;  %v1609_v50 = vmul.f32 1.442695, %v1534_v30 }
 0x2fe   :  { %2387 = vmatpush.bf16.msrb.mxu2 %v4096_v8  ;;  %v4306_v8 = vsel %vm3935_vm8, %v1130_v20, -inf  ;;  %3271 = vpow2.f32 %v1609_v50  ;;  %v4336_v27 = vpop.f32.mrf.mxu2 }
 0x2ff   :  { %1422 = vmax.xlane.f32.xlu1 %v1421_v59  ;;  %v1475_v62 = vsel %vm1330_vm5, %v4306_v8, -inf  ;;  %v4341_v31 = vpop.xlane.xlu0 %1719  ;;  %v5416_v59 = vld [vmem:[#allocation18_spill] sm:$0xff] }
 0x300   :  { %1398 = vmax.xlane.f32.xlu2 %v1397_v17 }
 0x303   :  { %v1132_v41 = vpop.f32.mrf.mxu1 }
 0x304   :  { %1047 = vmatpush.bf16.xpose.msra.mxu3 %v1029_v37  ;;  %v4323_v49 = vpop.eup %3271 }
 0x305   :  { %v1748_v57 = vsel %vm1330_vm5, %v4323_v49, 0.0 }
 0x306   :  { %v4345_v32 = vpop.f32.mrf.mxu2 }
 0x307   :  { %1761 = vadd.xlane.f32.xlu1 %v1760_v36  ;;  %v4355_v36 = vpop.xlane.xlu1 %1722 }
 0x308   :  { %1740 = vadd.xlane.f32.xlu2 %v1739_v13  ;;  %5417 = vst [vmem:[#allocation12_spill] sm:$0xff] %v4355_v36 }
 0x30b   :  { %3139 = vmatmul.msk.bf16.vlgmr.msra.gmra.mxu3 %vm610_vm0, %v5412_v18  ;;  %v4357_v30 = vpop.f32.mrf.mxu1 }
 0x30c   :  { %2019 = vmatpush.bf16.msrb.mxu3 %v5410_v11 }
 0x30e   :  { %v973_v13 = vpop.f32.mrf.mxu2 }
 0x30f   :  { %1476 = vmax.xlane.f32.xlu1 %v1475_v62 }
 0x310   :  { %2020 = vmatpush.bf16.msrb.mxu3 %v5411_v38  ;;  %1407 = vmax.xlane.f32.xlu2 %v1406_v52 }
 0x311   :  { %v1384_v46 = vpop.xlane.xlu0 %1383 }
 0x312   :  { %v1540_v17 = vsub.f32 %v4101_v55, %v1384_v46 }
 0x313   :  { %v4372_v52 = vpop.f32.mrf.mxu1 }
 0x314   :  { %2021 = vmatpush.bf16.msrb.mxu3 %v5413_v2  ;;  %v1621_v20 = vmul.f32 1.442695, %v1540_v17  ;;  %v1918_v17 = vpack.c.bf16 %v4323_v49, %v4323_v49 }
 0x315   :  { %v4370_v2 = vpop.xlane.xlu1 %1386 }
 0x318   :  { %2022 = vmatpush.bf16.msrb.mxu3 %v5414_v24  ;;  %1749 = vadd.xlane.f32.xlu2 %v1748_v57  ;;  %v823_v57 = vpop.f32.mrf.mxu3 }
 0x31b   :  { %3140 = vmatmul.msk.bf16.gmra.mxu3 %vm610_vm0, %v3939_v45 }
 0x31c   :  { %2238 = vmatpush.bf16.msra.mxu3 %v4015_v29  ;;  %v1415_v29 = vsel %vm1330_vm5, %v4332_v5, -inf }
 0x320   :  { %2239 = vmatpush.bf16.msra.mxu3 %v5415_v47  ;;  %1416 = vmax.xlane.f32.xlu2 %v1415_v29 }
 0x324   :  { %2240 = vmatpush.bf16.msra.mxu3 %v3974_v10  ;;  %v1757_v10 = vsel %vm1330_vm5, %v4244_v3, 0.0 }
 0x328   :  { %2241 = vmatpush.bf16.msra.mxu3 %v3931_v39  ;;  %1758 = vadd.xlane.f32.xlu2 %v1757_v10  ;;  %v4351_v39 = vsel %vm3924_vm7, %v904_v25, -inf  ;;  %v4363_v25 = vsel %vm3891_vm3, %v1132_v41, -inf  ;;  %v4383_v41 = vpop.f32.mrf.mxu2 }
 0x329   :  { %v1424_v3 = vsel %vm1330_vm5, %v4351_v39, -inf  ;;  %v1478_v38 = vsel %vm1330_vm5, %v4363_v25, -inf }
 0x32a   :  { %v1354_v45 = vpop.xlane.xlu2 %1353 }
 0x32b   :  { %3141 = vmatmul.msk.bf16.gmra.mxu3 %vm610_vm0, %v5416_v59  ;;  %v1530_v37 = vsub.f32 %v4129_v16, %v1354_v45  ;;  %v1913_v16 = vpack.c.bf16 %v4255_v9, %v4255_v9  ;;  %v4390_v45 = vsel %vm3924_vm7, %v823_v57, -inf }
 0x32d   :  { %v1601_v11 = vmul.f32 1.442695, %v1530_v37 }
 0x32f   :  { %3273 = vpow2.f32 %v1601_v11 }
 0x330   :  { %1425 = vmax.xlane.f32.xlu2 %v1424_v3  ;;  %3275 = vpow2.f32 %v1621_v20 }
 0x332   :  { %v1363_v50 = vpop.xlane.xlu2 %1362 }
 0x333   :  { %v1533_v55 = vsub.f32 %v4144_v44, %v1363_v50  ;;  %v4375_v44 = vunpack.c.l.b16 %v1913_v16  ;;  %v1400_v50 = vsel %vm1330_vm5, %v4390_v45, -inf  ;;  %v2055_v16 = vunpack.c.l.b16 %v1918_v17 }
 0x335   :  { %v3274_v18 = vpop.eup %3273  ;;  %v1607_v62 = vmul.f32 1.442695, %v1533_v55 }
 0x336   :  { %v1914_v24 = vpack.c.bf16 %v3274_v18, %v3274_v18  ;;  %v1736_v47 = vsel %vm1330_vm5, %v3274_v18, 0.0  ;;  %v4379_v9 = vpop.eup %3275 }
 0x337   :  { %3277 = vpow2.f32 %v1607_v62  ;;  %1737 = vadd.xlane.f32.xlu0 %v1736_v47  ;;  %v1766_v37 = vsel %vm1330_vm5, %v4379_v9, 0.0  ;;  %v4409_v62 = vsel %vm3896_vm4, %v4164_v51, -inf  ;;  %v5419_v51 = vpack.c.b16 %v4117_v23, %v4119_v43  ;;  %v5423_v43 = vld [vmem:[#allocation13_spill] sm:$0xff] }
 0x338   :  { %1479 = vmax.xlane.f32.xlu2 %v1478_v38  ;;  %v4377_v29 = vunpack.c.l.b16 %v1914_v24  ;;  %v4402_v38 = vsel %vm3896_vm4, %v973_v13, -inf  ;;  %v4411_v24 = vpop.f32.mrf.mxu2  ;;  %v1409_v13 = vsel %vm1330_vm5, %v4409_v62, -inf }
 0x339   :  { %v1433_v47 = vsel %vm1330_vm5, %v4402_v38, -inf }
 0x33a   :  { %v1372_v10 = vpop.xlane.xlu2 %1371 }
 0x33b   :  { %3142 = vmatmul.msk.bf16.gmra.mxu3 %vm610_vm0, %v4074_v54  ;;  %v1536_v59 = vsub.f32 %v4158_v33, %v1372_v10  ;;  %v1140_v33 = vpop.f32.mrf.mxu1 }
 0x33d   :  { %v3278_v3 = vpop.eup %3277  ;;  %v1613_v54 = vmul.f32 1.442695, %v1536_v59  ;;  %v4396_v20 = vpop.xlane.xlu1 %1731  ;;  %v4420_v59 = vsel %vm3878_vm2, %v1140_v33, -inf }
 0x33e   :  { %v1917_v11 = vpack.c.bf16 %v3278_v3, %v3278_v3  ;;  %5418 = vst [vmem:[#allocation14_spill] sm:$0xff] %v4396_v20  ;;  %v1487_v33 = vsel %vm1330_vm5, %v4420_v59, -inf }
 0x33f   :  { %1401 = vmax.xlane.f32.xlu0 %v1400_v50  ;;  %3279 = vpow2.f32 %v1613_v54  ;;  %v5420_v54 = vld [vmem:[#allocation15_spill] sm:$0xff]  ;;  %v5421_v50 = vld [vmem:[#allocation21_spill] sm:$0xff] }
 0x340   :  { %1767 = vadd.xlane.f32.xlu2 %v1766_v37  ;;  %v2054_v55 = vunpack.c.l.b16 %v1917_v11  ;;  %v980_v23 = vpop.f32.mrf.mxu2 }
 0x342   :  { %v4404_v49 = vpop.xlane.xlu2 %1716  ;;  %v2061_v18 = vpack.c.b16 %v2055_v16, %v2054_v55  ;;  %v5422_v16 = vld [vmem:[#allocation22_spill] sm:$0xff] }
 0x343   :  { %v4426_v17 = vpop.f32.mrf.mxu1 }
 0x344   :  { %3156 = vmatmul.msk.bf16.gmra.mxu1 %vm1330_vm5, %v2061_v18 }
 0x345   :  { %v3280_v57 = vpop.eup %3279  ;;  %v1396_v10 = vpop.xlane.xlu1 %1395 }
 0x346   :  { %v1920_v37 = vpack.c.bf16 %v3280_v57, %v3280_v57  ;;  %v1544_v55 = vsub.f32 %v5421_v50, %v1396_v10  ;;  %v1754_v7 = vsel %vm1330_vm5, %v3280_v57, 0.0  ;;  %v4490_v57 = vsel %vm3935_vm8, %v4336_v27, -inf }
 0x347   :  { %1410 = vmax.xlane.f32.xlu0 %v1409_v13  ;;  %v1427_v27 = vsel %vm1330_vm5, %v4490_v57, -inf }
 0x348   :  { %1434 = vmax.xlane.f32.xlu2 %v1433_v47  ;;  %v1919_v47 = vpack.c.bf16 %v4251_v53, %v4251_v53  ;;  %v2057_v46 = vunpack.c.l.b16 %v1920_v37  ;;  %v5425_v53 = vld [vmem:[#allocation10_spill] sm:$0xff]  ;;  %v4511_v26 = vpop.f32.mrf.mxu2 }
 0x34a   :  { %v1381_v11 = vpop.xlane.xlu2 %1380  ;;  %v2056_v10 = vunpack.c.l.b16 %v1919_v47 }
 0x34b   :  { %3151 = vmatmul.msk.bf16.vlgmr.msrb.gmra.mxu3 %vm1330_vm5, %v5419_v51  ;;  %v1539_v18 = vsub.f32 %v5422_v16, %v1381_v11  ;;  %v1745_v51 = vsel %vm1330_vm5, %v3278_v3, 0.0  ;;  %v4439_v11 = vsel %vm3970_vm9, %v980_v23, -inf  ;;  %v1924_v3 = vpack.c.bf16 %v4379_v9, %v4379_v9  ;;  %v4449_v37 = vpop.f32.mrf.mxu1 }
 0x34c   :  { %2457 = vmatpush.bf16.msrb.mxu3 %v5420_v54  ;;  %v1629_v54 = vmul.f32 1.442695, %v1544_v55  ;;  %v2062_v16 = vpack.c.b16 %v2057_v46, %v2056_v10  ;;  %v1442_v55 = vsel %vm1330_vm5, %v4439_v11, -inf  ;;  %v5426_v46 = vld [vmem:[#allocation9_spill] sm:$0xff]  ;;  %v5428_v10 = vld [vmem:[#allocation20_spill] sm:$0xff] }
 0x34d   :  { %v1619_v13 = vmul.f32 1.442695, %v1539_v18  ;;  %v4445_v18 = vsel %vm3970_vm9, %v4214_v40, -inf  ;;  %v2126_v9 = vunpack.c.l.b16 %v1924_v3  ;;  %v4472_v3 = vsel %vm3891_vm3, %v4345_v32, -inf }
 0x34e   :  { %v1430_v61 = vsel %vm1330_vm5, %v4472_v3, -inf }
 0x34f   :  { %3281 = vpow2.f32 %v1619_v13  ;;  %1746 = vadd.xlane.f32.xlu0 %v1745_v51  ;;  %v1418_v13 = vsel %vm1330_vm5, %v4445_v18, -inf }
 0x350   :  { %1488 = vmax.xlane.f32.xlu2 %v1487_v33  ;;  %2458 = vmatpush.bf16.msrb.mxu3 %v5423_v43  ;;  %3283 = vpow2.f32 %v1629_v54  ;;  %v1405_v43 = vpop.xlane.xlu1 %1404 }
 0x354   :  { %2459 = vmatpush.bf16.msrb.mxu3 %v5425_v53  ;;  %3157 = vmatmul.msk.bf16.gmra.mxu1 %vm1330_vm5, %v2062_v16  ;;  %v1541_v53 = vsub.f32 %v5428_v10, %v4370_v2  ;;  %v1147_v2 = vpop.f32.mrf.mxu1 }
 0x355   :  { %v3282_v47 = vpop.eup %3281 }
 0x356   :  { %v1923_v33 = vpack.c.bf16 %v3282_v47, %v3282_v47  ;;  %v1763_v40 = vsel %vm1330_vm5, %v3282_v47, 0.0  ;;  %v4460_v54 = vpop.eup %3283 }
 0x357   :  { %1419 = vmax.xlane.f32.xlu0 %v1418_v13  ;;  %1764 = vadd.xlane.f32.xlu1 %v1763_v40 }
 0x358   :  { %1443 = vmax.xlane.f32.xlu2 %v1442_v55  ;;  %2460 = vmatpush.bf16.msrb.mxu3 %v5426_v46  ;;  %v2125_v23 = vunpack.c.l.b16 %v1923_v33  ;;  %v5429_v55 = vld [vmem:[#allocation23_spill] sm:$0xff]  ;;  %v1778_v33 = vsel %vm1330_vm5, %v4460_v54, 0.0  ;;  %v1623_v46 = vmul.f32 1.442695, %v1541_v53 }
 0x359   :  { %v1547_v47 = vsub.f32 %v5429_v55, %v1405_v43  ;;  %v4495_v43 = vsel %vm3870_vm1, %v4372_v52, -inf }
 0x35a   :  { %v2133_v16 = vpack.c.b16 %v2126_v9, %v2125_v23  ;;  %3285 = vpow2.f32 %v1623_v46  ;;  %v4485_v9 = vsel %vm3924_vm7, %v1147_v2, -inf  ;;  %v1484_v10 = vsel %vm1330_vm5, %v4495_v43, -inf }
 0x35b   :  { %v4458_v51 = vpop.xlane.xlu2 %1725  ;;  %3152 = vmatmul.msk.bf16.gmra.mxu3 %vm1330_vm5, %v1988_v6  ;;  %v1635_v6 = vmul.f32 1.442695, %v1547_v47 }
 0x35c   :  { %5427 = vst [vmem:[#allocation16_spill] sm:$0xff] %v4458_v51  ;;  %3159 = vmatmul.msk.bf16.vlgmr.msra.gmra.mxu2 %vm1330_vm5, %v2133_v16 }
 0x35d   :  { %3287 = vpow2.f32 %v1635_v6 }
 0x35f   :  { %1755 = vadd.xlane.f32.xlu0 %v1754_v7  ;;  %1431 = vmax.xlane.f32.xlu1 %v1430_v61 }
 0x360   :  { %1779 = vadd.xlane.f32.xlu2 %v1778_v33  ;;  %v4480_v13 = vpop.xlane.xlu0 %1728  ;;  %v3286_v53 = vpop.eup %3285  ;;  %v4521_v33 = vsel %vm3896_vm4, %v4357_v30, -inf  ;;  %v4532_v30 = vsel %vm3878_vm2, %v4411_v24, -inf  ;;  %v1928_v24 = vpack.c.bf16 %v4460_v54, %v4460_v54 }
 0x361   :  { %5430 = vst [vmem:[#allocation8_spill] sm:$0xff] %v4480_v13  ;;  %v1925_v55 = vpack.c.bf16 %v3286_v53, %v3286_v53  ;;  %v1481_v0 = vsel %vm1330_vm5, %v4521_v33, -inf }
 0x362   :  { %v2130_v54 = vunpack.c.l.b16 %v1928_v24 }
 0x363   :  { %v1390_v32 = vpop.xlane.xlu2 %1389  ;;  %v4509_v35 = vpop.eup %3287  ;;  %v2127_v56 = vunpack.c.l.b16 %v1925_v55  ;;  %v5432_v55 = vpack.c.b16 %v4377_v29, %v4375_v44 }
 0x364   :  { %v1542_v40 = vsub.f32 %v4234_v1, %v1390_v32  ;;  %3158 = vmatmul.msk.bf16.gmra.mxu1 %vm1330_vm5, %v2063_v42  ;;  %v1496_v1 = vsel %vm1330_vm5, %v4485_v9, -inf  ;;  %v1787_v7 = vsel %vm1330_vm5, %v4509_v35, 0.0  ;;  %v985_v32 = vpop.f32.mrf.mxu2 }
 0x366   :  { %v1625_v23 = vmul.f32 1.442695, %v1542_v40 }
 0x367   :  { %1428 = vmax.xlane.f32.xlu0 %v1427_v27  ;;  %1485 = vmax.xlane.f32.xlu1 %v1484_v10  ;;  %v1439_v27 = vsel %vm1330_vm5, %v4532_v30, -inf }
 0x368   :  { %3289 = vpow2.f32 %v1625_v23  ;;  %1497 = vmax.xlane.f32.xlu2 %v1496_v1  ;;  %v1393_v52 = vpop.xlane.xlu0 %1392  ;;  %v1769_v1 = vsel %vm1330_vm5, %v3286_v53, 0.0  ;;  %v4554_v53 = vsel %vm3870_vm1, %v4383_v41, -inf }
 0x369   :  { %v1543_v42 = vsub.f32 %v4260_v28, %v1393_v52  ;;  %v1436_v44 = vsel %vm1330_vm5, %v4554_v53, -inf }
 0x36b   :  { %v4507_v16 = vpop.xlane.xlu2 %1734  ;;  %3153 = vmatmul.msk.bf16.gmra.mxu3 %vm1330_vm5, %v1989_v14  ;;  %v1627_v46 = vmul.f32 1.442695, %v1543_v42 }
 0x36c   :  { %5431 = vst [vmem:[#allocation11_spill] sm:$0xff] %v4507_v16 }
 0x36d   :  { %3291 = vpow2.f32 %v1627_v46  ;;  %v4556_v46 = vpop.f32.mrf.mxu2 }
 0x36e   :  { %v3290_v47 = vpop.eup %3289 }
 0x36f   :  { %v1926_v2 = vpack.c.bf16 %v3290_v47, %v3290_v47  ;;  %v1772_v61 = vsel %vm1330_vm5, %v3290_v47, 0.0  ;;  %1482 = vmax.xlane.f32.xlu0 %v1481_v0 }
 0x370   :  { %1788 = vadd.xlane.f32.xlu2 %v1787_v7  ;;  %1773 = vadd.xlane.f32.xlu1 %v1772_v61  ;;  %v4562_v7 = vpop.xlane.xlu1 %1743 }
 0x371   :  { %v2128_v14 = vunpack.c.l.b16 %v1926_v2 }
 0x373   :  { %v1399_v28 = vpop.xlane.xlu2 %1398  ;;  %v2134_v6 = vpack.c.b16 %v2128_v14, %v2127_v56  ;;  %v3292_v40 = vpop.eup %3291 }
 0x374   :  { %v1545_v23 = vsub.f32 %v4286_v60, %v1399_v28  ;;  %v1927_v10 = vpack.c.bf16 %v3292_v40, %v3292_v40  ;;  %v4549_v60 = vsel %vm3910_vm6, %v4449_v37, -inf  ;;  %v1775_v56 = vsel %vm1330_vm5, %v3292_v40, 0.0 }
 0x375   :  { %3160 = vmatmul.msk.bf16.gmra.mxu2 %vm1330_vm5, %v2134_v6  ;;  %v1493_v29 = vsel %vm1330_vm5, %v4549_v60, -inf  ;;  %v1213_v28 = vpop.f32.mrf.mxu2  ;;  %v1931_v6 = vpack.c.bf16 %v4509_v35, %v4509_v35 }
 0x376   :  { %v1631_v42 = vmul.f32 1.442695, %v1545_v23  ;;  %v2129_v47 = vunpack.c.l.b16 %v1927_v10  ;;  %v4580_v23 = vsel %vm3924_vm7, %v985_v32, -inf }
 0x377   :  { %1770 = vadd.xlane.f32.xlu0 %v1769_v1 }
 0x378   :  { %1440 = vmax.xlane.f32.xlu1 %v1439_v27  ;;  %3293 = vpow2.f32 %v1631_v42  ;;  %v2135_v2 = vpack.c.b16 %v2130_v54, %v2129_v47  ;;  %v1414_v40 = vpop.xlane.xlu1 %1413 }
 0x379   :  { %v1550_v24 = vsub.f32 %v4225_v58, %v1414_v40 }
 0x37b   :  { %v4538_v52 = vpop.xlane.xlu2 %1740  ;;  %3154 = vmatmul.msk.bf16.gmra.mxu3 %vm1330_vm5, %v5432_v55  ;;  %v1448_v55 = vsel %vm1330_vm5, %v4580_v23, -inf  ;;  %v1641_v54 = vmul.f32 1.442695, %v1550_v24 }
 0x37e   :  { %v4566_v61 = vpop.eup %3293 }
 0x37f   :  { %1437 = vmax.xlane.f32.xlu0 %v1436_v44  ;;  %v1781_v14 = vsel %vm1330_vm5, %v4566_v61, 0.0  ;;  %v1929_v36 = vpack.c.bf16 %v4566_v61, %v4566_v61  ;;  %v4657_v61 = vsel %vm3935_vm8, %v4556_v46, -inf }
 0x380   :  { %1494 = vmax.xlane.f32.xlu1 %v1493_v29  ;;  %v1216_v29 = vpop.f32.mrf.mxu2 }
 0x381   :  { %v4601_v58 = vsel %vm3896_vm4, %v1216_v29, -inf }
 0x382   :  { %5433 = vst [vmem:[#allocation17_spill] sm:$0xff] %v4601_v58 }
 0x383   :  { %v1408_v37 = vpop.xlane.xlu2 %1407 }
 0x384   :  { %v1548_v41 = vsub.f32 %v4314_v4, %v1408_v37  ;;  %v4576_v4 = vsel %vm3970_vm9, %v4426_v17, -inf  ;;  %v2198_v17 = vunpack.c.l.b16 %v1931_v6  ;;  %v4597_v37 = vsel %vm3910_vm6, %v4511_v26, -inf }
 0x385   :  { %3161 = vmatmul.msk.bf16.gmra.mxu2 %vm1330_vm5, %v2135_v2  ;;  %v1490_v35 = vsel %vm1330_vm5, %v4576_v4, -inf  ;;  %v4612_v26 = vsel %vm3891_vm3, %v1213_v28, -inf }
 0x386   :  { %v1637_v0 = vmul.f32 1.442695, %v1548_v41  ;;  %v1445_v41 = vsel %vm1330_vm5, %v4597_v37, -inf  ;;  %v1502_v40 = vsel %vm1330_vm5, %v4612_v26, -inf }
 0x387   :  { %1776 = vadd.xlane.f32.xlu0 %v1775_v56  ;;  %v1505_v56 = vsel %vm1330_vm5, %v4601_v58, -inf }
 0x388   :  { %3295 = vpow2.f32 %v1637_v0  ;;  %1782 = vadd.xlane.f32.xlu1 %v1781_v14 }
 0x389   :  { %3297 = vpow2.f32 %v1641_v54 }
 0x38a   :  { %3299 = vrcp.f32 %v4538_v52 }
 0x38e   :  { %v3296_v1 = vpop.eup %3295  ;;  %v1049_v10 = vpop.f32.mrf.mxu3 }
 0x38f   :  { %v1932_v27 = vpack.c.bf16 %v3296_v1, %v3296_v1  ;;  %v4584_v42 = vsel %vm3935_vm8, %v1049_v10, -inf  ;;  %1491 = vmax.xlane.f32.xlu0 %v1490_v35  ;;  %v1790_v0 = vsel %vm1330_vm5, %v3296_v1, 0.0  ;;  %v3298_v14 = vpop.eup %3297  ;;  %v4619_v1 = vpop.xlane.xlu1 %1752 }
 0x390   :  { %v1451_v32 = vsel %vm1330_vm5, %v4584_v42, -inf  ;;  %1449 = vmax.xlane.f32.xlu1 %v1448_v55  ;;  %v4627_v55 = vpop.xlane.xlu2 %1749  ;;  %v3300_v29 = vpop.eup %3299 }
 0x391   :  { %v2199_v47 = vunpack.c.l.b16 %v1932_v27  ;;  %1452 = vmax.xlane.f32.xlu2 %v1451_v32  ;;  %v1796_v27 = vsel %vm1330_vm5, %v3298_v14, 0.0 }
 0x393   :  { %v2206_v44 = vpack.c.b16 %v2199_v47, %v2198_v17 }
 0x395   :  { %3163 = vmatmul.msk.bf16.vlgmr.msra.gmra.mxu3 %vm1330_vm5, %v2206_v44 }
 0x396   :  { %v4603_v2 = vpop.f32.mrf.mxu3 }
 0x397   :  { %1446 = vmax.xlane.f32.xlu0 %v1445_v41  ;;  %v4634_v47 = vpop.xlane.xlu1 %1422 }
 0x398   :  { %1791 = vadd.xlane.f32.xlu1 %v1790_v0  ;;  %v1417_v32 = vpop.xlane.xlu2 %1416  ;;  %v2097_v0 = vpop.f32.mrf.mxu1  ;;  %v1553_v12 = vsub.f32 %v4280_v34, %v4634_v47 }
 0x399   :  { %1506 = vmax.xlane.f32.xlu2 %v1505_v56 }
 0x39e   :  { %v4614_v6 = vpop.f32.mrf.mxu3 }
 0x3a0   :  { %1503 = vmax.xlane.f32.xlu1 %v1502_v40  ;;  %v2627_v40 = vmul.f32 %v3300_v29, %v2097_v0  ;;  %v4642_v52 = vpop.xlane.xlu2 %1758  ;;  %v2131_v0 = vunpack.c.l.b16 %v1929_v36 }
 0x3a1   :  { %1797 = vadd.xlane.f32.xlu2 %v1796_v27  ;;  %v4639_v27 = vpop.xlane.xlu1 %1761  ;;  %5435 = vst [vmem:[#allocation15_spill] sm:$0xff] %v4642_v52 }
 0x3a2   :  { %5434 = vst [vmem:[#allocation18_spill] sm:$0xff] %v4639_v27 }
 0x3a6   :  { %v1056_v10 = vpop.f32.mrf.mxu3 }
 0x3a7   :  { %v4623_v35 = vsel %vm3870_vm1, %v1056_v10, -inf }
 0x3a8   :  { %v1460_v28 = vsel %vm1330_vm5, %v4623_v35, -inf  ;;  %v5448_v19 = vld [vmem:[#allocation15_spill] sm:$0xff] }
 0x3a9   :  { %1461 = vmax.xlane.f32.xlu2 %v1460_v28  ;;  %v4652_v51 = vpop.xlane.xlu1 %1476 }
 0x3aa   :  { %v4629_v17 = vpop.xlane.xlu0 %1737 }
 0x3ae   :  { %v4631_v24 = vpop.f32.mrf.mxu3 }
 0x3b2   :  { %v1402_v44 = vpop.xlane.xlu0 %1401 }
 0x3b3   :  { %v1546_v54 = vsub.f32 %v4390_v45, %v1402_v44 }
 0x3b5   :  { %v1633_v56 = vmul.f32 1.442695, %v1546_v54 }
 0x3b6   :  { %v4637_v41 = vpop.f32.mrf.mxu3 }
 0x3b7   :  { %3301 = vpow2.f32 %v1633_v56 }
 0x3b9   :  { %2691 = vrot.lane.b32.xlu1 %v2627_v40, %s3559_s3  ;;  %v4650_v40 = vpop.f32.mrf.mxu1 }
 0x3ba   :  { %v1411_v10 = vpop.xlane.xlu0 %1410 }
 0x3bb   :  { %v1549_v28 = vsub.f32 %v4409_v62, %v1411_v10  ;;  %v1551_v10 = vsub.f32 %v4332_v5, %v1417_v32 }
 0x3bd   :  { %v3302_v44 = vpop.eup %3301  ;;  %v1639_v16 = vmul.f32 1.442695, %v1549_v28  ;;  %v1934_v28 = vpack.c.bf16 %v3298_v14, %v3298_v14 }
 0x3be   :  { %v4647_v45 = vpop.f32.mrf.mxu3  ;;  %v1930_v54 = vpack.c.bf16 %v3302_v44, %v3302_v44  ;;  %v1784_v29 = vsel %vm1330_vm5, %v3302_v44, 0.0  ;;  %v1426_v44 = vpop.xlane.xlu2 %1425 }
 0x3bf   :  { %3303 = vpow2.f32 %v1639_v16  ;;  %1785 = vadd.xlane.f32.xlu0 %v1784_v29  ;;  %v1499_v29 = vsel %vm1330_vm5, %v4657_v61, -inf }
 0x3c0   :  { %v2132_v56 = vunpack.c.l.b16 %v1930_v54 }
 0x3c1   :  { %v2102_v13 = vpop.f32.mrf.mxu1 }
 0x3c2   :  { %v1747_v58 = vpop.xlane.xlu0 %1746  ;;  %v2136_v62 = vpack.c.b16 %v2132_v56, %v2131_v0  ;;  %v1643_v0 = vmul.f32 1.442695, %v1551_v10  ;;  %v2201_v56 = vunpack.c.l.b16 %v1934_v28 }
 0x3c3   :  { %3305 = vrcp.f32 %v1747_v58 }
 0x3c4   :  { %3162 = vmatmul.msk.bf16.gmra.mxu2 %vm1330_vm5, %v2136_v62  ;;  %3307 = vpow2.f32 %v1643_v0  ;;  %v4671_v62 = vsel %vm3891_vm3, %v4603_v2, -inf }
 0x3c5   :  { %v3304_v36 = vpop.eup %3303 }
 0x3c6   :  { %v4661_v16 = vpop.f32.mrf.mxu3  ;;  %v1933_v54 = vpack.c.bf16 %v3304_v36, %v3304_v36 }
 0x3c7   :  { %5436 = vst [vmem:[#allocation21_spill] sm:$0xff] %v4661_v16  ;;  %1500 = vmax.xlane.f32.xlu0 %v1499_v29 }
 0x3c8   :  { %v2200_v63 = vunpack.c.l.b16 %v1933_v54  ;;  %v1454_v54 = vsel %vm1330_vm5, %v4671_v62, -inf }
 0x3c9   :  { %v3306_v46 = vpop.eup %3305 }
 0x3ca   :  { %v1420_v20 = vpop.xlane.xlu0 %1419  ;;  %v4665_v5 = vpop.xlane.xlu1 %1764  ;;  %v2629_v58 = vmul.f32 %v3306_v46, %v2102_v13  ;;  %v2207_v14 = vpack.c.b16 %v2201_v56, %v2200_v63 }
 0x3cb   :  { %5437 = vst [vmem:[#allocation22_spill] sm:$0xff] %v4665_v5  ;;  %v1552_v32 = vsub.f32 %v4445_v18, %v1420_v20  ;;  %v1480_v13 = vpop.xlane.xlu2 %1479  ;;  %v3308_v29 = vpop.eup %3307  ;;  %v1554_v20 = vsub.f32 %v4351_v39, %v1426_v44  ;;  %v1793_v39 = vsel %vm1330_vm5, %v3304_v36, 0.0 }
 0x3cc   :  { %2695 = vrot.lane.b32.xlu2 %v2629_v58, %s3559_s3  ;;  %3164 = vmatmul.msk.bf16.gmra.mxu3 %vm1330_vm5, %v2207_v14  ;;  %v1935_v56 = vpack.c.bf16 %v3308_v29, %v3308_v29  ;;  %v1647_v14 = vmul.f32 1.442695, %v1553_v12  ;;  %v1799_v16 = vsel %vm1330_vm5, %v3308_v29, 0.0 }
 0x3cd   :  { %v1645_v28 = vmul.f32 1.442695, %v1552_v32  ;;  %v1649_v58 = vmul.f32 1.442695, %v1554_v20 }
 0x3ce   :  { %v4675_v10 = vpop.f32.mrf.mxu3  ;;  %v2202_v34 = vunpack.c.l.b16 %v1935_v56  ;;  %v4705_v56 = vsel %vm3896_vm4, %v4614_v6, -inf }
 0x3cf   :  { %3309 = vpow2.f32 %v1645_v28  ;;  %1455 = vmax.xlane.f32.xlu0 %v1454_v54  ;;  %v4692_v28 = vpop.f32.mrf.mxu2 }
 0x3d0   :  { %3311 = vpow2.f32 %v1649_v58 }
 0x3d1   :  { %3313 = vpow2.f32 %v1647_v14 }
 0x3d2   :  { %v4682_v18 = vpop.xlane.xlu0 %1755  ;;  %v1432_v2 = vpop.xlane.xlu1 %1431 }
 0x3d3   :  { %v1556_v0 = vsub.f32 %v4472_v3, %v1432_v2  ;;  %v4694_v3 = vpop.xlane.xlu2 %1767 }
 0x3d4   :  { %5438 = vst [vmem:[#allocation13_spill] sm:$0xff] %v4694_v3 }
 0x3d5   :  { %v4687_v46 = vpop.eup %3309  ;;  %v1653_v44 = vmul.f32 1.442695, %v1556_v0 }
 0x3d6   :  { %v4685_v63 = vpop.f32.mrf.mxu3  ;;  %v1936_v32 = vpack.c.bf16 %v4687_v46, %v4687_v46  ;;  %v4707_v58 = vpop.eup %3311 }
 0x3d7   :  { %1794 = vadd.xlane.f32.xlu0 %v1793_v39  ;;  %3315 = vpow2.f32 %v1653_v44  ;;  %v4709_v14 = vpop.eup %3313  ;;  %v1572_v39 = vsub.f32 %v4363_v25, %v1480_v13  ;;  %v1938_v44 = vpack.c.bf16 %v4707_v58, %v4707_v58 }
 0x3d8   :  { %v2203_v47 = vunpack.c.l.b16 %v1936_v32 }
 0x3da   :  { %v1429_v54 = vpop.xlane.xlu0 %1428  ;;  %v4696_v2 = vpop.xlane.xlu1 %1485  ;;  %v2208_v20 = vpack.c.b16 %v2203_v47, %v2202_v34  ;;  %v1571_v47 = vsub.f32 %v4306_v8, %v4652_v51 }
 0x3db   :  { %v1555_v12 = vsub.f32 %v4490_v57, %v1429_v54  ;;  %v1457_v57 = vsel %vm1330_vm5, %v4705_v56, -inf  ;;  %v1221_v34 = vpop.f32.mrf.mxu2  ;;  %v1937_v54 = vpack.c.bf16 %v4709_v14, %v4709_v14  ;;  %v1435_v25 = vpop.xlane.xlu2 %1434 }
 0x3dc   :  { %3165 = vmatmul.msk.bf16.gmra.mxu3 %vm1330_vm5, %v2208_v20 }
 0x3dd   :  { %v1651_v0 = vmul.f32 1.442695, %v1555_v12  ;;  %v4711_v32 = vpop.eup %3315  ;;  %v1685_v12 = vmul.f32 1.442695, %v1572_v39 }
 0x3de   :  { %v4700_v36 = vpop.f32.mrf.mxu3  ;;  %v1940_v13 = vpack.c.bf16 %v4711_v32, %v4711_v32 }
 0x3df   :  { %5439 = vst [vmem:[#allocation19_spill] sm:$0xff] %v4700_v36  ;;  %3317 = vpow2.f32 %v1651_v0  ;;  %v2205_v0 = vunpack.c.l.b16 %v1938_v44  ;;  %v1683_v36 = vmul.f32 1.442695, %v1571_v47  ;;  %v1557_v44 = vsub.f32 %v4402_v38, %v1435_v25 }
 0x3e0   :  { %3319 = vrcp.f32 %v4562_v7  ;;  %v2272_v8 = vunpack.c.l.b16 %v1940_v13  ;;  %v1574_v25 = vsub.f32 %v4495_v43, %v4696_v2  ;;  %v4776_v43 = vsel %vm3970_vm9, %v4637_v41, -inf }
 0x3e1   :  { %3321 = vpow2.f32 %v1685_v12 }
 0x3e2   :  { %v1483_v15 = vpop.xlane.xlu0 %1482  ;;  %3323 = vpow2.f32 %v1683_v36  ;;  %v1655_v36 = vmul.f32 1.442695, %v1557_v44 }
 0x3e3   :  { %v4719_v6 = vpop.xlane.xlu1 %1773  ;;  %1458 = vmax.xlane.f32.xlu1 %v1457_v57  ;;  %v1223_v29 = vpop.f32.mrf.mxu2 }
 0x3e4   :  { %5440 = vst [vmem:[#allocation10_spill] sm:$0xff] %v4719_v6  ;;  %v2204_v6 = vunpack.c.l.b16 %v1937_v54  ;;  %3325 = vpow2.f32 %v1655_v36  ;;  %v1466_v36 = vsel %vm1330_vm5, %v4776_v43, -inf }
 0x3e5   :  { %v4729_v7 = vpop.eup %3317 }
 0x3e6   :  { %v4727_v20 = vpop.f32.mrf.mxu3  ;;  %v1939_v57 = vpack.c.bf16 %v4729_v7, %v4729_v7  ;;  %v3320_v3 = vpop.eup %3319  ;;  %v2209_v39 = vpack.c.b16 %v2205_v0, %v2204_v6 }
 0x3e7   :  { %5441 = vst [vmem:[#allocation9_spill] sm:$0xff] %v4727_v20  ;;  %v2628_v52 = vmul.f32 %v3320_v3, %v4650_v40  ;;  %v4745_v40 = vsel %vm3878_vm2, %v1221_v34, -inf  ;;  %v4747_v3 = vpop.xlane.xlu2 %1488 }
 0x3e8   :  { %v2271_v51 = vunpack.c.l.b16 %v1939_v57  ;;  %v1511_v38 = vsel %vm1330_vm5, %v4745_v40, -inf }
 0x3ea   :  { %v2279_v5 = vpack.c.b16 %v2272_v8, %v2271_v51  ;;  %v4735_v27 = vpop.xlane.xlu0 %1770 }
 0x3eb   :  { %v1441_v20 = vpop.xlane.xlu1 %1440  ;;  %1800 = vadd.xlane.f32.xlu1 %v1799_v16  ;;  %2693 = vrot.lane.b32.xlu0 %v2628_v52, %s3559_s3  ;;  %v4749_v16 = vpop.eup %3321  ;;  %v4757_v52 = vsel %vm3970_vm9, %v1223_v29, -inf }
 0x3ec   :  { %3166 = vmatmul.msk.bf16.gmra.mxu3 %vm1330_vm5, %v2209_v39  ;;  %3167 = vmatmul.msk.bf16.vlgmr.msra.gmra.mxu1 %vm1330_vm5, %v2279_v5  ;;  %v4751_v6 = vpop.eup %3323  ;;  %v1573_v5 = vsub.f32 %v4521_v33, %v1483_v15  ;;  %v1956_v34 = vpack.c.bf16 %v4749_v16, %v4749_v16  ;;  %v1514_v12 = vsel %vm1330_vm5, %v4757_v52, -inf  ;;  %v1559_v29 = vsub.f32 %v4532_v30, %v1441_v20 }
 0x3ed   :  { %v1955_v0 = vpack.c.bf16 %v4751_v6, %v4751_v6  ;;  %v4778_v44 = vpop.eup %3325  ;;  %v1805_v30 = vsel %vm1330_vm5, %v4709_v14, 0.0  ;;  %v4807_v14 = vsel %vm3910_vm6, %v4647_v45, -inf }
 0x3ee   :  { %v4741_v47 = vpop.f32.mrf.mxu3  ;;  %v1687_v15 = vmul.f32 1.442695, %v1573_v5  ;;  %v2418_v51 = vunpack.c.l.b16 %v1956_v34  ;;  %v1941_v41 = vpack.c.bf16 %v4778_v44, %v4778_v44 }
 0x3ef   :  { %v2417_v2 = vunpack.c.l.b16 %v1955_v0  ;;  %v1444_v39 = vpop.xlane.xlu2 %1443 }
 0x3f0   :  { %v1560_v50 = vsub.f32 %v4439_v11, %v1444_v39  ;;  %v2273_v0 = vunpack.c.l.b16 %v1941_v41 }
 0x3f2   :  { %v1438_v54 = vpop.xlane.xlu0 %1437 }
 0x3f3   :  { %1512 = vmax.xlane.f32.xlu1 %v1511_v38  ;;  %v1558_v13 = vsub.f32 %v4554_v53, %v1438_v54  ;;  %v4769_v57 = vpop.xlane.xlu1 %1494  ;;  %v1689_v53 = vmul.f32 1.442695, %v1574_v25  ;;  %v2425_v38 = vpack.c.b16 %v2418_v51, %v2417_v2  ;;  %v1659_v54 = vmul.f32 1.442695, %v1559_v29 }
 0x3f4   :  { %v1575_v2 = vsub.f32 %v4420_v59, %v4747_v3 }
 0x3f5   :  { %v1657_v8 = vmul.f32 1.442695, %v1558_v13  ;;  %1515 = vmax.xlane.f32.xlu2 %v1514_v12  ;;  %v1661_v12 = vmul.f32 1.442695, %v1560_v50 }
 0x3f6   :  { %v4771_v33 = vpop.f32.mrf.mxu3 }
 0x3f7   :  { %3327 = vpow2.f32 %v1657_v8  ;;  %v4823_v59 = vpop.xlane.xlu2 %1779 }
 0x3f8   :  { %3329 = vpow2.f32 %v1687_v15  ;;  %5443 = vst [vmem:[#allocation23_spill] sm:$0xff] %v4823_v59 }
 0x3f9   :  { %3331 = vpow2.f32 %v1689_v53 }
 0x3fa   :  { %v4783_v5 = vpop.xlane.xlu0 %1776  ;;  %3333 = vrcp.f32 %v4629_v17 }
 0x3fb   :  { %5442 = vst [vmem:[#allocation20_spill] sm:$0xff] %v4783_v5  ;;  %1467 = vmax.xlane.f32.xlu1 %v1466_v36  ;;  %v4798_v25 = vpop.xlane.xlu1 %1782  ;;  %3335 = vpow2.f32 %v1659_v54  ;;  %v1469_v36 = vsel %vm1330_vm5, %v4807_v14, -inf  ;;  %v1691_v54 = vmul.f32 1.442695, %v1575_v2 }
 0x3fc   :  { %3175 = vmatmul.msk.bf16.vlgmr.msrb.gmra.mxu3 %vm1330_vm5, %v2425_v38  ;;  %3337 = vpow2.f32 %v1661_v12  ;;  %v4816_v38 = vpop.f32.mrf.mxu1 }
 0x3fd   :  { %v4793_v20 = vpop.eup %3327  ;;  %1806 = vadd.xlane.f32.xlu2 %v1805_v30 }
 0x3fe   :  { %v4789_v34 = vpop.f32.mrf.mxu3  ;;  %v1942_v11 = vpack.c.bf16 %v4793_v20, %v4793_v20  ;;  %v4800_v13 = vpop.eup %3329 }
 0x3ff   :  { %v4802_v8 = vpop.eup %3331  ;;  %v1957_v17 = vpack.c.bf16 %v4800_v13, %v4800_v13  ;;  %v1498_v59 = vpop.xlane.xlu2 %1497 }
 0x400   :  { %v2274_v15 = vunpack.c.l.b16 %v1942_v11  ;;  %v3334_v29 = vpop.eup %3333  ;;  %v1958_v45 = vpack.c.bf16 %v4802_v8, %v4802_v8 }
 0x401   :  { %v2419_v3 = vunpack.c.l.b16 %v1957_v17 }
 0x402   :  { %v1492_v51 = vpop.xlane.xlu0 %1491  ;;  %v2280_v53 = vpack.c.b16 %v2274_v15, %v2273_v0  ;;  %v2420_v11 = vunpack.c.l.b16 %v1958_v45 }
 0x403   :  { %v1576_v39 = vsub.f32 %v4576_v4, %v1492_v51  ;;  %v4825_v4 = vpop.eup %3335  ;;  %v1450_v12 = vpop.xlane.xlu1 %1449 }
 0x404   :  { %3168 = vmatmul.msk.bf16.gmra.mxu1 %vm1330_vm5, %v2280_v53  ;;  %v4827_v0 = vpop.eup %3337  ;;  %v1943_v15 = vpack.c.bf16 %v4825_v4, %v4825_v4  ;;  %v2426_v53 = vpack.c.b16 %v2420_v11, %v2419_v3 }
 0x405   :  { %v1693_v41 = vmul.f32 1.442695, %v1576_v39  ;;  %1470 = vmax.xlane.f32.xlu2 %v1469_v36  ;;  %v1562_v39 = vsub.f32 %v4580_v23, %v1450_v12  ;;  %v1944_v2 = vpack.c.bf16 %v4827_v0, %v4827_v0  ;;  %v2107_v36 = vpop.f32.mrf.mxu1  ;;  %v4844_v23 = vsel %vm3870_vm1, %v4692_v28, -inf }
 0x406   :  { %v2041_v50 = vpop.f32.mrf.mxu3  ;;  %v2275_v45 = vunpack.c.l.b16 %v1943_v15  ;;  %v1578_v15 = vsub.f32 %v4485_v9, %v1498_v59  ;;  %v1508_v21 = vsel %vm1330_vm5, %v4844_v23, -inf }
 0x407   :  { %v4821_v30 = vmul.f32 %v3334_v29, %v2041_v50  ;;  %3339 = vpow2.f32 %v1693_v41  ;;  %v2276_v5 = vunpack.c.l.b16 %v1944_v2 }
 0x408   :  { %3341 = vrcp.f32 %v4619_v1  ;;  %v1665_v1 = vmul.f32 1.442695, %v1562_v39 }
 0x409   :  { %3343 = vpow2.f32 %v1691_v54  ;;  %v1577_v54 = vsub.f32 %v4549_v60, %v4769_v57  ;;  %v2281_v12 = vpack.c.b16 %v2276_v5, %v2275_v45 }
 0x40a   :  { %v1447_v51 = vpop.xlane.xlu0 %1446 }
 0x40b   :  { %v1561_v17 = vsub.f32 %v4597_v37, %v1447_v51  ;;  %v1695_v60 = vmul.f32 1.442695, %v1577_v54  ;;  %v1697_v51 = vmul.f32 1.442695, %v1578_v15  ;;  %v4860_v59 = vpop.xlane.xlu1 %1791 }
 0x40c   :  { %3176 = vmatmul.msk.bf16.gmra.mxu3 %vm1330_vm5, %v2426_v53 }
 0x40d   :  { %v1663_v29 = vmul.f32 1.442695, %v1561_v17  ;;  %v4837_v50 = vpop.eup %3339  ;;  %v2109_v9 = vpop.f32.mrf.mxu1  ;;  %v4867_v17 = vsel %vm3878_vm2, %v4631_v24, -inf }
 0x40e   :  { %v3342_v41 = vpop.eup %3341  ;;  %v1960_v11 = vpack.c.bf16 %v4837_v50, %v4837_v50  ;;  %v1463_v45 = vsel %vm1330_vm5, %v4867_v17, -inf }
 0x40f   :  { %v4839_v3 = vpop.eup %3343  ;;  %v2631_v37 = vmul.f32 %v3342_v41, %v2107_v36  ;;  %3345 = vpow2.f32 %v1663_v29 }
 0x410   :  { %3347 = vrcp.f32 %v4682_v18  ;;  %v1959_v28 = vpack.c.bf16 %v4839_v3, %v4839_v3  ;;  %v2422_v18 = vunpack.c.l.b16 %v1960_v11 }
 0x411   :  { %3349 = vpow2.f32 %v1665_v1 }
 0x412   :  { %v2421_v53 = vunpack.c.l.b16 %v1959_v28  ;;  %3351 = vpow2.f32 %v1695_v60  ;;  %v4889_v28 = vpop.xlane.xlu2 %1788 }
 0x413   :  { %3353 = vpow2.f32 %v1697_v51  ;;  %v1504_v11 = vpop.xlane.xlu1 %1503 }
 0x414   :  { %2699 = vrot.lane.b32.xlu1 %v2631_v37, %s3559_s3  ;;  %3169 = vmatmul.msk.bf16.gmra.mxu1 %vm1330_vm5, %v2281_v12  ;;  %v2427_v29 = vpack.c.b16 %v2422_v18, %v2421_v53  ;;  %3355 = vrcp.f32 %v4404_v49 }
 0x415   :  { %1509 = vmax.xlane.f32.xlu0 %v1508_v21  ;;  %v4858_v57 = vpop.eup %3345  ;;  %v1802_v21 = vsel %vm1330_vm5, %v4687_v46, 0.0  ;;  %3357 = vrcp.f32 %v4627_v55  ;;  %v1580_v46 = vsub.f32 %v4612_v26, %v1504_v11 }
 0x416   :  { %v3348_v5 = vpop.eup %3347  ;;  %v1945_v2 = vpack.c.bf16 %v4858_v57, %v4858_v57 }
 0x417   :  { %v4862_v39 = vpop.eup %3349  ;;  %v2632_v36 = vmul.f32 %v3348_v5, %v2109_v9 }
 0x418   :  { %v1946_v1 = vpack.c.bf16 %v4862_v39, %v4862_v39  ;;  %v2277_v48 = vunpack.c.l.b16 %v1945_v2  ;;  %v4877_v24 = vpop.eup %3351  ;;  %v4910_v26 = vpop.f32.mrf.mxu3 }
 0x419   :  { %v4879_v37 = vpop.eup %3353  ;;  %v1961_v54 = vpack.c.bf16 %v4877_v24, %v4877_v24 }
 0x41a   :  { %v2278_v41 = vunpack.c.l.b16 %v1946_v1  ;;  %v1962_v15 = vpack.c.bf16 %v4879_v37, %v4879_v37  ;;  %v3356_v18 = vpop.eup %3355  ;;  %v1453_v2 = vpop.xlane.xlu2 %1452 }
 0x41b   :  { %v2423_v60 = vunpack.c.l.b16 %v1961_v54  ;;  %v2619_v49 = vmul.f32 %v3356_v18, %v4675_v10  ;;  %v1563_v54 = vsub.f32 %v4584_v42, %v1453_v2 }
 0x41c   :  { %3177 = vmatmul.msk.bf16.gmra.mxu3 %vm1330_vm5, %v2427_v29  ;;  %v2282_v12 = vpack.c.b16 %v2278_v41, %v2277_v48  ;;  %v2424_v51 = vunpack.c.l.b16 %v1962_v15  ;;  %v1701_v48 = vmul.f32 1.442695, %v1580_v46 }
 0x41d   :  { %1464 = vmax.xlane.f32.xlu0 %v1463_v45  ;;  %2701 = vrot.lane.b32.xlu2 %v2632_v36, %s3559_s3  ;;  %v4900_v36 = vpop.f32.mrf.mxu2  ;;  %v3358_v45 = vpop.eup %3357 }
 0x41e   :  { %v2428_v53 = vpack.c.b16 %v2424_v51, %v2423_v60  ;;  %v2630_v1 = vmul.f32 %v3358_v45, %v4816_v38  ;;  %3359 = vpow2.f32 %v1701_v48  ;;  %v1667_v38 = vmul.f32 1.442695, %v1563_v54 }
 0x420   :  { %v4931_v46 = vpop.f32.mrf.mxu3 }
 0x422   :  { %v4903_v10 = vpop.xlane.xlu2 %1506 }
 0x424   :  { %3170 = vmatmul.msk.bf16.gmra.mxu1 %vm1330_vm5, %v2282_v12  ;;  %v1808_v12 = vsel %vm1330_vm5, %v4707_v58, 0.0 }
 0x425   :  { %1803 = vadd.xlane.f32.xlu0 %v1802_v21  ;;  %v1228_v15 = vpop.f32.mrf.mxu2  ;;  %v4912_v21 = vpop.eup %3359 }
 0x426   :  { %v4916_v60 = vsel %vm3924_vm7, %v1228_v15, -inf  ;;  %v1964_v51 = vpack.c.bf16 %v4912_v21, %v4912_v21 }
 0x427   :  { %v1520_v58 = vsel %vm1330_vm5, %v4916_v60, -inf }
 0x42a   :  { %v4918_v42 = vpop.xlane.xlu2 %1797 }
 0x42b   :  { %v2692_v5 = vpop.permute.xlu1 %2691 }
 0x42c   :  { %v4893_v9 = vsel %vm610_vm0, %v2619_v49, %v2692_v5  ;;  %3178 = vmatmul.msk.bf16.gmra.mxu3 %vm1330_vm5, %v2428_v53  ;;  %v1859_v53 = vsel %vm1330_vm5, %v4751_v6, 0.0  ;;  %v1862_v6 = vsel %vm1330_vm5, %v4749_v16, 0.0 }
 0x432   :  { %v4897_v29 = vpop.xlane.xlu0 %1785  ;;  %v1462_v54 = vpop.xlane.xlu2 %1461 }
 0x433   :  { %v1566_v15 = vsub.f32 %v4623_v35, %v1462_v54  ;;  %v1868_v35 = vsel %vm1330_vm5, %v4802_v8, 0.0 }
 0x439   :  { %2697 = vrot.lane.b32.xlu0 %v2630_v1, %s3559_s3 }
 0x43a   :  { %v1501_v41 = vpop.xlane.xlu0 %1500 }
 0x43b   :  { %v1579_v55 = vsub.f32 %v4657_v61, %v1501_v41 }
 0x43d   :  { %v1699_v11 = vmul.f32 1.442695, %v1579_v55 }
 0x43e   :  { %1809 = vadd.xlane.f32.xlu1 %v1808_v12 }
 0x43f   :  { %3361 = vpow2.f32 %v1699_v11  ;;  %v1814_v11 = vsel %vm1330_vm5, %v4711_v32, 0.0 }
 0x440   :  { %3363 = vpow2.f32 %v1667_v38 }
 0x442   :  { %v1456_v18 = vpop.xlane.xlu0 %1455 }
 0x443   :  { %v1564_v61 = vsub.f32 %v4671_v62, %v1456_v18  ;;  %v2491_v62 = vunpack.c.l.b16 %v1964_v51 }
 0x445   :  { %v4925_v49 = vpop.eup %3361  ;;  %v1669_v5 = vmul.f32 1.442695, %v1564_v61 }
 0x446   :  { %1521 = vmax.xlane.f32.xlu1 %v1520_v58  ;;  %v1963_v2 = vpack.c.bf16 %v4925_v49, %v4925_v49  ;;  %1860 = vadd.xlane.f32.xlu2 %v1859_v53  ;;  %v4933_v1 = vpop.eup %3363 }
 0x447   :  { %3365 = vpow2.f32 %v1669_v5  ;;  %v1947_v55 = vpack.c.bf16 %v4933_v1, %v4933_v1  ;;  %v1673_v5 = vmul.f32 1.442695, %v1566_v15 }
 0x448   :  { %v2490_v45 = vunpack.c.l.b16 %v1963_v2 }
 0x449   :  { %v2344_v61 = vunpack.c.l.b16 %v1947_v55 }
 0x44a   :  { %v2498_v48 = vpack.c.b16 %v2491_v62, %v2490_v45  ;;  %v1795_v41 = vpop.xlane.xlu0 %1794  ;;  %v2112_v62 = vpop.f32.mrf.mxu1 }
 0x44b   :  { %3367 = vrcp.f32 %v1795_v41 }
 0x44c   :  { %3179 = vmatmul.msk.bf16.vlgmr.msrb.gmra.mxu1 %vm1330_vm5, %v2498_v48  ;;  %3369 = vrcp.f32 %v4341_v31 }
 0x44d   :  { %v4940_v12 = vpop.eup %3365  ;;  %3371 = vpow2.f32 %v1673_v5 }
 0x44e   :  { %1863 = vadd.xlane.f32.xlu1 %v1862_v6  ;;  %v1948_v38 = vpack.c.bf16 %v4940_v12, %v4940_v12  ;;  %1815 = vadd.xlane.f32.xlu2 %v1814_v11  ;;  %v5444_v6 = vld [vmem:[#allocation18_spill] sm:$0xff] }
 0x44f   :  { %v2248_v18 = vpop.f32.mrf.mxu3 }
 0x450   :  { %v2345_v58 = vunpack.c.l.b16 %v1948_v38 }
 0x451   :  { %v3368_v51 = vpop.eup %3367 }
 0x452   :  { %v2352_v53 = vpack.c.b16 %v2345_v58, %v2344_v61  ;;  %v4947_v2 = vmul.f32 %v3368_v51, %v2248_v18  ;;  %v3370_v41 = vpop.eup %3369  ;;  %v4972_v18 = vpop.permute.xlu2 %2695 }
 0x453   :  { %v4956_v54 = vpop.eup %3371  ;;  %v2620_v55 = vmul.f32 %v3370_v41, %v4685_v63  ;;  %v2114_v63 = vpop.f32.mrf.mxu1  ;;  %v5447_v41 = vld [vmem:[#allocation21_spill] sm:$0xff] }
 0x454   :  { %3171 = vmatmul.msk.bf16.vlgmr.msrb.gmra.mxu2 %vm1330_vm5, %v2352_v53  ;;  %v1950_v15 = vpack.c.bf16 %v4956_v54, %v4956_v54 }
 0x456   :  { %v1459_v16 = vpop.xlane.xlu1 %1458  ;;  %1869 = vadd.xlane.f32.xlu2 %v1868_v35  ;;  %v2347_v5 = vunpack.c.l.b16 %v1950_v15  ;;  %v5445_v35 = vld [vmem:[#allocation22_spill] sm:$0xff] }
 0x457   :  { %v1565_v32 = vsub.f32 %v4705_v56, %v1459_v16  ;;  %v4954_v48 = vpop.f32.mrf.mxu3  ;;  %v4966_v56 = vsel %vm3910_vm6, %v4900_v36, -inf }
 0x458   :  { %v1517_v58 = vsel %vm1330_vm5, %v4966_v56, -inf }
 0x459   :  { %v1671_v45 = vmul.f32 1.442695, %v1565_v32 }
 0x45b   :  { %3373 = vpow2.f32 %v1671_v45 }
 0x45c   :  { %3375 = vrcp.f32 %v5444_v6 }
 0x45d   :  { %v2694_v31 = vpop.permute.xlu0 %2693 }
 0x45e   :  { %v1801_v11 = vpop.xlane.xlu1 %1800  ;;  %v4961_v8 = vsel %vm610_vm0, %v2620_v55, %v2694_v31  ;;  %v4985_v55 = vsel %vm3924_vm7, %v5447_v41, -inf  ;;  %v2170_v31 = vpop.f32.mrf.mxu2 }
 0x45f   :  { %3377 = vrcp.f32 %v1801_v11  ;;  %v2253_v22 = vpop.f32.mrf.mxu3  ;;  %v1472_v11 = vsel %vm1330_vm5, %v4985_v55, -inf }
 0x460   :  { %3379 = vrcp.f32 %v5445_v35 }
 0x461   :  { %v4970_v38 = vpop.eup %3373 }
 0x462   :  { %v1949_v61 = vpack.c.bf16 %v4970_v38, %v4970_v38  ;;  %v3376_v51 = vpop.eup %3375 }
 0x463   :  { %1518 = vmax.xlane.f32.xlu0 %v1517_v58  ;;  %v2634_v16 = vmul.f32 %v3376_v51, %v2114_v63 }
 0x464   :  { %v2346_v53 = vunpack.c.l.b16 %v1949_v61 }
 0x465   :  { %v3378_v36 = vpop.eup %3377 }
 0x466   :  { %v4979_v32 = vmul.f32 %v3378_v36, %v2253_v22  ;;  %v2353_v45 = vpack.c.b16 %v2347_v5, %v2346_v53  ;;  %v3380_v15 = vpop.eup %3379  ;;  %v1513_v51 = vpop.xlane.xlu1 %1512  ;;  %v5449_v22 = vld [vmem:[#allocation14_spill] sm:$0xff] }
 0x467   :  { %2705 = vrot.lane.b32.xlu1 %v2634_v16, %s3559_s3  ;;  %v2635_v63 = vmul.f32 %v3380_v15, %v2170_v31  ;;  %v4990_v61 = vpop.f32.mrf.mxu3 }
 0x468   :  { %5446 = vst [vmem:[#allocation18_spill] sm:$0xff] %v4979_v32  ;;  %3172 = vmatmul.msk.bf16.gmra.mxu2 %vm1330_vm5, %v2353_v45  ;;  %v1516_v6 = vpop.xlane.xlu2 %1515  ;;  %v5451_v45 = vld [vmem:[#allocation8_spill] sm:$0xff] }
 0x46b   :  { %1473 = vmax.xlane.f32.xlu0 %v1472_v11 }
 0x46e   :  { %2723 = vrot.lane.b32.xlu2 %v2635_v63, %s3556_s14  ;;  %v1468_v31 = vpop.xlane.xlu1 %1467 }
 0x46f   :  { %v2258_v53 = vpop.f32.mrf.mxu3 }
 0x470   :  { %v1807_v58 = vpop.xlane.xlu2 %1806 }
 0x471   :  { %3381 = vrcp.f32 %v1807_v58  ;;  %v5452_v58 = vld [vmem:[#allocation17_spill] sm:$0xff] }
 0x472   :  { %3383 = vrcp.f32 %v5448_v19  ;;  %v1581_v19 = vsub.f32 %v5452_v58, %v4903_v10 }
 0x473   :  { %3385 = vrcp.f32 %v5449_v22 }
 0x474   :  { %3387 = vrcp.f32 %v5451_v45 }
 0x477   :  { %v3382_v5 = vpop.eup %3381 }
 0x478   :  { %v4995_v36 = vpop.xlane.xlu2 %1470  ;;  %v4997_v16 = vmul.f32 %v3382_v5, %v2258_v53  ;;  %v3384_v35 = vpop.eup %3383  ;;  %v1703_v53 = vmul.f32 1.442695, %v1581_v19 }
 0x479   :  { %v2633_v41 = vmul.f32 %v3384_v35, %v2112_v62  ;;  %v3386_v11 = vpop.eup %3385 }
 0x47a   :  { %5450 = vst [vmem:[#allocation22_spill] sm:$0xff] %v4997_v16  ;;  %v2624_v15 = vmul.f32 %v3386_v11, %v4771_v33  ;;  %v3388_v32 = vpop.eup %3387  ;;  %3389 = vpow2.f32 %v1703_v53  ;;  %v1568_v33 = vsub.f32 %v4776_v43, %v1468_v31 }
 0x47b   :  { %v2623_v5 = vmul.f32 %v3388_v32, %v4741_v47  ;;  %v1817_v47 = vsel %vm1330_vm5, %v4778_v44, 0.0 }
 0x47c   :  { %v1677_v11 = vmul.f32 1.442695, %v1568_v33 }
 0x47f   :  { %2703 = vrot.lane.b32.xlu0 %v2633_v41, %s3559_s3 }
 0x480   :  { %v2702_v63 = vpop.permute.xlu2 %2701  ;;  %v5013_v10 = vpop.eup %3389 }
 0x481   :  { %v5005_v22 = vsel %vm610_vm0, %v2624_v15, %v2702_v63  ;;  %v1584_v15 = vsub.f32 %v4757_v52, %v1516_v6  ;;  %v1965_v43 = vpack.c.bf16 %v5013_v10, %v5013_v10 }
 0x483   :  { %v1709_v31 = vmul.f32 1.442695, %v1584_v15  ;;  %v2492_v44 = vunpack.c.l.b16 %v1965_v43  ;;  %v2172_v15 = vpop.f32.mrf.mxu2 }
 0x486   :  { %v2700_v16 = vpop.permute.xlu1 %2699 }
 0x487   :  { %v5009_v62 = vsel %vm610_vm0, %v2623_v5, %v2700_v16  ;;  %v1583_v16 = vsub.f32 %v4745_v40, %v1513_v51  ;;  %v1823_v40 = vsel %vm1330_vm5, %v4825_v4, 0.0 }
 0x488   :  { %v1510_v35 = vpop.xlane.xlu0 %1509 }
 0x489   :  { %v1582_v45 = vsub.f32 %v4844_v23, %v1510_v35  ;;  %v1707_v6 = vmul.f32 1.442695, %v1583_v16 }
 0x48b   :  { %v1705_v41 = vmul.f32 1.442695, %v1582_v45 }
 0x48d   :  { %3391 = vpow2.f32 %v1705_v41 }
 0x48e   :  { %3393 = vpow2.f32 %v1677_v11 }
 0x490   :  { %v1465_v32 = vpop.xlane.xlu0 %1464 }
 0x491   :  { %1818 = vadd.xlane.f32.xlu1 %v1817_v47  ;;  %v1567_v63 = vsub.f32 %v4867_v17, %v1465_v32  ;;  %v1871_v17 = vsel %vm1330_vm5, %v4839_v3, 0.0  ;;  %v1877_v3 = vsel %vm1330_vm5, %v4877_v24, 0.0  ;;  %v2175_v24 = vpop.f32.mrf.mxu2 }
 0x493   :  { %v5022_v23 = vpop.eup %3391  ;;  %v1675_v58 = vmul.f32 1.442695, %v1567_v63  ;;  %v5453_v63 = vld [vmem:[#allocation16_spill] sm:$0xff] }
 0x494   :  { %v1966_v52 = vpack.c.bf16 %v5022_v23, %v5022_v23  ;;  %v5028_v51 = vpop.eup %3393 }
 0x495   :  { %3395 = vpow2.f32 %v1675_v58  ;;  %v1952_v53 = vpack.c.bf16 %v5028_v51, %v5028_v51 }
 0x496   :  { %v2493_v19 = vunpack.c.l.b16 %v1966_v52  ;;  %3397 = vpow2.f32 %v1709_v31  ;;  %v2260_v52 = vpop.f32.mrf.mxu3 }
 0x497   :  { %1824 = vadd.xlane.f32.xlu2 %v1823_v40  ;;  %3399 = vpow2.f32 %v1707_v6  ;;  %v2349_v45 = vunpack.c.l.b16 %v1952_v53  ;;  %v1811_v6 = vsel %vm1330_vm5, %v4729_v7, 0.0  ;;  %v5454_v40 = vld [vmem:[#allocation9_spill] sm:$0xff] }
 0x498   :  { %v2499_v5 = vpack.c.b16 %v2493_v19, %v2492_v44  ;;  %3401 = vrcp.f32 %v5453_v63  ;;  %v5051_v43 = vpop.xlane.xlu0 %1803 }
 0x499   :  { %1872 = vadd.xlane.f32.xlu1 %v1871_v17  ;;  %3403 = vrcp.f32 %v4735_v27  ;;  %v2177_v7 = vpop.f32.mrf.mxu2 }
 0x49a   :  { %3180 = vmatmul.msk.bf16.gmra.mxu1 %vm1330_vm5, %v2499_v5 }
 0x49b   :  { %v5035_v35 = vpop.eup %3395 }
 0x49c   :  { %v1951_v4 = vpack.c.bf16 %v5035_v35, %v5035_v35  ;;  %v5039_v33 = vpop.eup %3397 }
 0x49d   :  { %v5043_v11 = vpop.eup %3399  ;;  %v1968_v47 = vpack.c.bf16 %v5039_v33, %v5039_v33 }
 0x49e   :  { %v2348_v41 = vunpack.c.l.b16 %v1951_v4  ;;  %v1967_v16 = vpack.c.bf16 %v5043_v11, %v5043_v11  ;;  %v3402_v19 = vpop.eup %3401 }
 0x49f   :  { %1878 = vadd.xlane.f32.xlu2 %v1877_v3  ;;  %v2495_v31 = vunpack.c.l.b16 %v1968_v47  ;;  %v2622_v17 = vmul.f32 %v3402_v19, %v5454_v40  ;;  %v3404_v4 = vpop.eup %3403  ;;  %v1865_v3 = vsel %vm1330_vm5, %v4800_v13, 0.0  ;;  %v2462_v47 = vpop.f32.mrf.mxu3  ;;  %v5456_v40 = vld [vmem:[#allocation13_spill] sm:$0xff] }
 0x4a0   :  { %v2354_v32 = vpack.c.b16 %v2349_v45, %v2348_v41  ;;  %v2494_v58 = vunpack.c.l.b16 %v1967_v16  ;;  %v5455_v45 = vld [vmem:[#allocation10_spill] sm:$0xff]  ;;  %v2637_v27 = vmul.f32 %v3404_v4, %v2175_v24 }
 0x4a1   :  { %3405 = vrcp.f32 %v5455_v45 }
 0x4a2   :  { %3173 = vmatmul.msk.bf16.gmra.mxu2 %vm1330_vm5, %v2354_v32  ;;  %v2500_v44 = vpack.c.b16 %v2495_v31, %v2494_v58  ;;  %v1820_v31 = vsel %vm1330_vm5, %v4793_v20, 0.0 }
 0x4a7   :  { %v3406_v32 = vpop.eup %3405  ;;  %v5070_v13 = vpop.f32.mrf.mxu3 }
 0x4a8   :  { %v2638_v16 = vmul.f32 %v3406_v32, %v2177_v7 }
 0x4a9   :  { %1812 = vadd.xlane.f32.xlu0 %v1811_v6 }
 0x4aa   :  { %3181 = vmatmul.msk.bf16.gmra.mxu1 %vm1330_vm5, %v2500_v44 }
 0x4ab   :  { %v2698_v5 = vpop.permute.xlu0 %2697 }
 0x4ac   :  { %v5059_v53 = vsel %vm610_vm0, %v2622_v17, %v2698_v5 }
 0x4af   :  { %v5077_v17 = vpop.f32.mrf.mxu3 }
 0x4b1   :  { %v1810_v41 = vpop.xlane.xlu1 %1809  ;;  %1866 = vadd.xlane.f32.xlu0 %v1865_v3 }
 0x4b2   :  { %3407 = vrcp.f32 %v1810_v41  ;;  %2727 = vrot.lane.b32.xlu1 %v2637_v27, %s3556_s14 }
 0x4b7   :  { %2729 = vrot.lane.b32.xlu2 %v2638_v16, %s3556_s14  ;;  %v2469_v41 = vpop.f32.mrf.mxu3 }
 0x4b8   :  { %v3408_v63 = vpop.eup %3407 }
 0x4b9   :  { %v5068_v58 = vmul.f32 %v3408_v63, %v2260_v52  ;;  %1821 = vadd.xlane.f32.xlu0 %v1820_v31  ;;  %v1861_v24 = vpop.xlane.xlu2 %1860  ;;  %v1522_v5 = vpop.xlane.xlu1 %1521 }
 0x4ba   :  { %3409 = vrcp.f32 %v1861_v24  ;;  %v1586_v52 = vsub.f32 %v4916_v60, %v1522_v5 }
 0x4bb   :  { %3411 = vrcp.f32 %v5456_v40  ;;  %v1826_v40 = vsel %vm1330_vm5, %v4827_v0, 0.0 }
 0x4bc   :  { %v1713_v16 = vmul.f32 1.442695, %v1586_v52  ;;  %v1880_v52 = vsel %vm1330_vm5, %v4879_v37, 0.0 }
 0x4c0   :  { %v3410_v6 = vpop.eup %3409 }
 0x4c1   :  { %v5072_v44 = vpop.xlane.xlu2 %1815  ;;  %v5074_v19 = vmul.f32 %v3410_v6, %v2462_v47  ;;  %v3412_v45 = vpop.eup %3411 }
 0x4c2   :  { %v2636_v20 = vmul.f32 %v3412_v45, %v2172_v15  ;;  %v5081_v3 = vpop.xlane.xlu1 %1863  ;;  %v1569_v15 = vsub.f32 %v4807_v14, %v4995_v36  ;;  %v2180_v45 = vpop.f32.mrf.mxu2 }
 0x4c4   :  { %v1679_v5 = vmul.f32 1.442695, %v1569_v15 }
 0x4c9   :  { %v1870_v4 = vpop.xlane.xlu2 %1869 }
 0x4ca   :  { %3413 = vrcp.f32 %v1870_v4  ;;  %v2182_v37 = vpop.f32.mrf.mxu2 }
 0x4cb   :  { %3415 = vpow2.f32 %v1713_v16 }
 0x4cd   :  { %2725 = vrot.lane.b32.xlu0 %v2636_v20, %s3556_s14 }
 0x4d0   :  { %v3414_v27 = vpop.eup %3413 }
 0x4d1   :  { %v2724_v7 = vpop.permute.xlu2 %2723  ;;  %v5083_v47 = vmul.f32 %v3414_v27, %v2469_v41 }
 0x4d2   :  { %v5087_v32 = vsel %vm1330_vm5, %v4893_v9, %v2724_v7  ;;  %v5098_v9 = vpop.eup %3415 }
 0x4d3   :  { %v1970_v36 = vpack.c.bf16 %v5098_v9, %v5098_v9 }
 0x4d6   :  { %v1519_v63 = vpop.xlane.xlu0 %1518 }
 0x4d7   :  { %v1585_v31 = vsub.f32 %v4966_v56, %v1519_v63  ;;  %v1832_v56 = vsel %vm1330_vm5, %v4862_v39, 0.0  ;;  %v5457_v63 = vld [vmem:[#allocation11_spill] sm:$0xff] }
 0x4d9   :  { %v2706_v60 = vpop.permute.xlu1 %2705  ;;  %v1711_v24 = vmul.f32 1.442695, %v1585_v31 }
 0x4da   :  { %v5094_v6 = vsel %vm610_vm0, %v4821_v30, %v2706_v60 }
 0x4db   :  { %3417 = vpow2.f32 %v1711_v24 }
 0x4dc   :  { %1827 = vadd.xlane.f32.xlu1 %v1826_v40  ;;  %3419 = vpow2.f32 %v1679_v5 }
 0x4de   :  { %v1474_v4 = vpop.xlane.xlu0 %1473 }
 0x4df   :  { %v1570_v14 = vsub.f32 %v4985_v55, %v1474_v4  ;;  %v2497_v55 = vunpack.c.l.b16 %v1970_v36  ;;  %v2185_v36 = vpop.f32.mrf.mxu2 }
 0x4e0   :  { %1833 = vadd.xlane.f32.xlu2 %v1832_v56  ;;  %v5458_v56 = vld [vmem:[#allocation23_spill] sm:$0xff] }
 0x4e1   :  { %v5105_v30 = vpop.eup %3417  ;;  %v1681_v0 = vmul.f32 1.442695, %v1570_v14 }
 0x4e2   :  { %v1969_v20 = vpack.c.bf16 %v5105_v30, %v5105_v30  ;;  %v5111_v41 = vpop.eup %3419 }
 0x4e3   :  { %3421 = vpow2.f32 %v1681_v0  ;;  %v1953_v7 = vpack.c.bf16 %v5111_v41, %v5111_v41 }
 0x4e4   :  { %1881 = vadd.xlane.f32.xlu1 %v1880_v52  ;;  %v2496_v27 = vunpack.c.l.b16 %v1969_v20  ;;  %3423 = vrcp.f32 %v5457_v63  ;;  %v1874_v52 = vsel %vm1330_vm5, %v4837_v50, 0.0 }
 0x4e5   :  { %v2350_v31 = vunpack.c.l.b16 %v1953_v7  ;;  %3425 = vrcp.f32 %v4798_v25 }
 0x4e6   :  { %v2501_v39 = vpack.c.b16 %v2497_v55, %v2496_v27  ;;  %3427 = vrcp.f32 %v5458_v56  ;;  %v5459_v27 = vld [vmem:[#allocation20_spill] sm:$0xff] }
 0x4e7   :  { %3429 = vrcp.f32 %v5459_v27 }
 0x4e8   :  { %3182 = vmatmul.msk.bf16.gmra.mxu1 %vm1330_vm5, %v2501_v39 }
 0x4e9   :  { %v5116_v16 = vpop.eup %3421 }
 0x4ea   :  { %v1954_v15 = vpack.c.bf16 %v5116_v16, %v5116_v16  ;;  %v3424_v40 = vpop.eup %3423 }
 0x4eb   :  { %v2625_v5 = vmul.f32 %v3424_v40, %v4789_v34  ;;  %v3426_v0 = vpop.eup %3425  ;;  %v1829_v34 = vsel %vm1330_vm5, %v4858_v57, 0.0  ;;  %v1886_v40 = vsel %vm1330_vm5, %v4912_v21, 0.0 }
 0x4ec   :  { %v2351_v60 = vunpack.c.l.b16 %v1954_v15  ;;  %v2641_v20 = vmul.f32 %v3426_v0, %v2185_v36  ;;  %v3428_v55 = vpop.eup %3427  ;;  %v1835_v0 = vsel %vm1330_vm5, %v4933_v1, 0.0  ;;  %v1838_v1 = vsel %vm1330_vm5, %v4940_v12, 0.0 }
 0x4ed   :  { %v2640_v25 = vmul.f32 %v3428_v55, %v2182_v37  ;;  %v3430_v7 = vpop.eup %3429 }
 0x4ee   :  { %v2355_v24 = vpack.c.b16 %v2351_v60, %v2350_v31  ;;  %v2639_v63 = vmul.f32 %v3430_v7, %v2180_v45  ;;  %v5460_v31 = vld [vmem:[#allocation12_spill] sm:$0xff]  ;;  %v5461_v45 = vld [vmem:[#allocation19_spill] sm:$0xff] }
 0x4ef   :  { %3431 = vrcp.f32 %v5460_v31  ;;  %v5188_v31 = vpop.f32.mrf.mxu1 }
 0x4f0   :  { %3174 = vmatmul.msk.bf16.gmra.mxu2 %vm1330_vm5, %v2355_v24  ;;  %3433 = vrcp.f32 %v4889_v28 }
 0x4f1   :  { %v2704_v4 = vpop.permute.xlu0 %2703  ;;  %3435 = vrcp.f32 %v4860_v59 }
 0x4f2   :  { %v2881_v14 = vsel %vm610_vm0, %v2625_v5, %v2704_v4  ;;  %3437 = vrcp.f32 %v4897_v29  ;;  %v1889_v29 = vsel %vm1330_vm5, %v5013_v10, 0.0 }
 0x4f3   :  { %3439 = vrcp.f32 %v4918_v42 }
 0x4f4   :  { %3441 = vrcp.f32 %v5051_v43 }
 0x4f5   :  { %v3432_v24 = vpop.eup %3431  ;;  %3443 = vrcp.f32 %v5081_v3 }
 0x4f6   :  { %v2621_v5 = vmul.f32 %v3432_v24, %v5461_v45  ;;  %v3434_v21 = vpop.eup %3433 }
 0x4f7   :  { %1875 = vadd.xlane.f32.xlu0 %v1874_v52  ;;  %v3436_v52 = vpop.eup %3435  ;;  %v5198_v10 = vpop.f32.mrf.mxu1 }
 0x4f8   :  { %2735 = vrot.lane.b32.xlu2 %v2641_v20, %s3556_s14  ;;  %v2877_v4 = vsel %vm610_vm0, %v2621_v5, %v4972_v18  ;;  %v1883_v18 = vsel %vm1330_vm5, %v4925_v49, 0.0  ;;  %v2643_v20 = vmul.f32 %v3434_v21, %v4910_v26  ;;  %v2644_v55 = vmul.f32 %v3436_v52, %v4931_v46  ;;  %v2187_v49 = vpop.f32.mrf.mxu2  ;;  %v3438_v26 = vpop.eup %3437 }
 0x4f9   :  { %v2472_v21 = vpop.f32.mrf.mxu3 }
 0x4fd   :  { %2733 = vrot.lane.b32.xlu1 %v2640_v25, %s3556_s14 }
 0x4ff   :  { %1830 = vadd.xlane.f32.xlu0 %v1829_v34  ;;  %v5203_v5 = vpop.f32.mrf.mxu1 }
 0x504   :  { %v5135_v15 = vpop.xlane.xlu1 %1818 }
 0x50a   :  { %v5133_v39 = vpop.xlane.xlu2 %1824 }
 0x50c   :  { %v5141_v60 = vpop.xlane.xlu1 %1872 }
 0x50d   :  { %3445 = vrcp.f32 %v5141_v60 }
 0x512   :  { %v5137_v50 = vpop.xlane.xlu2 %1878 }
 0x513   :  { %2731 = vrot.lane.b32.xlu0 %v2639_v63, %s3556_s14  ;;  %v1895_v63 = vsel %vm1330_vm5, %v5043_v11, 0.0  ;;  %v1898_v11 = vsel %vm1330_vm5, %v5039_v33, 0.0 }
 0x51a   :  { %v2730_v37 = vpop.permute.xlu2 %2729 }
 0x51b   :  { %v5145_v57 = vsel %vm1330_vm5, %v5059_v53, %v2730_v37  ;;  %v1841_v53 = vsel %vm1330_vm5, %v4970_v38, 0.0  ;;  %v2642_v38 = vmul.f32 %v3438_v26, %v2187_v49 }
 0x51c   :  { %v5169_v28 = vpop.xlane.xlu0 %1812 }
 0x521   :  { %1887 = vadd.xlane.f32.xlu2 %v1886_v40 }
 0x524   :  { %v2728_v56 = vpop.permute.xlu1 %2727  ;;  %v5174_v25 = vpop.xlane.xlu0 %1866 }
 0x525   :  { %v5153_v36 = vsel %vm1330_vm5, %v2877_v4, %v2728_v56 }
 0x527   :  { %1836 = vadd.xlane.f32.xlu1 %v1835_v0  ;;  %v1892_v0 = vsel %vm1330_vm5, %v5022_v23, 0.0 }
 0x529   :  { %1842 = vadd.xlane.f32.xlu2 %v1841_v53  ;;  %v5217_v53 = vpop.f32.mrf.mxu1 }
 0x52c   :  { %v5182_v12 = vpop.xlane.xlu0 %1821 }
 0x53d   :  { %1884 = vadd.xlane.f32.xlu0 %v1883_v18 }
 0x53f   :  { %v2726_v37 = vpop.permute.xlu0 %2725 }
 0x540   :  { %2755 = vrot.lane.b32.xlu1 %v2643_v20, %s3558_s1  ;;  %v2474_v20 = vpop.f32.mrf.mxu3 }
 0x541   :  { %2757 = vrot.lane.b32.xlu2 %v2644_v55, %s3558_s1 }
 0x545   :  { %1839 = vadd.xlane.f32.xlu0 %v1838_v1 }
 0x548   :  { %v5238_v49 = vpop.f32.mrf.mxu3 }
 0x54f   :  { %v5177_v34 = vpop.xlane.xlu1 %1827 }
 0x553   :  { %v5172_v59 = vpop.xlane.xlu2 %1833 }
 0x557   :  { %v1882_v7 = vpop.xlane.xlu1 %1881 }
 0x558   :  { %3447 = vrcp.f32 %v1882_v7  ;;  %v1904_v7 = vsel %vm1330_vm5, %v5098_v9, 0.0 }
 0x559   :  { %2737 = vrot.lane.b32.xlu0 %v2642_v38, %s3556_s14 }
 0x55b   :  { %v2736_v46 = vpop.permute.xlu2 %2735 }
 0x55c   :  { %v5180_v27 = vsel %vm1330_vm5, %v2881_v14, %v2736_v46  ;;  %v1844_v14 = vsel %vm1330_vm5, %v4956_v54, 0.0  ;;  %v1853_v54 = vsel %vm1330_vm5, %v5111_v41, 0.0 }
 0x56a   :  { %1890 = vadd.xlane.f32.xlu1 %v1889_v29  ;;  %1896 = vadd.xlane.f32.xlu2 %v1895_v63  ;;  %v5196_v45 = vpop.xlane.xlu0 %1875  ;;  %v2479_v29 = vpop.f32.mrf.mxu3 }
 0x56f   :  { %v2734_v24 = vpop.permute.xlu1 %2733 }
 0x570   :  { %v5192_v40 = vsel %vm1330_vm5, %v5005_v22, %v2734_v24  ;;  %v3440_v22 = vpop.eup %3439 }
 0x571   :  { %v2646_v56 = vmul.f32 %v3440_v22, %v4954_v48  ;;  %v5220_v48 = vpop.f32.mrf.mxu1  ;;  %v3442_v18 = vpop.eup %3441 }
 0x572   :  { %1845 = vadd.xlane.f32.xlu1 %v1844_v14  ;;  %v5205_v4 = vpop.xlane.xlu0 %1830  ;;  %v2648_v23 = vmul.f32 %v3442_v18, %v4990_v61  ;;  %v3444_v43 = vpop.eup %3443 }
 0x573   :  { %v2668_v55 = vmul.f32 %v3444_v43, %v5070_v13  ;;  %v3446_v61 = vpop.eup %3445  ;;  %v1850_v13 = vsel %vm1330_vm5, %v5028_v51, 0.0 }
 0x574   :  { %v2671_v38 = vmul.f32 %v3446_v61, %v2472_v21  ;;  %v3448_v46 = vpop.eup %3447  ;;  %v5462_v21 = vld [vmem:[#allocation22_spill] sm:$0xff] }
 0x57a   :  { %1899 = vadd.xlane.f32.xlu1 %v1898_v11 }
 0x582   :  { %1854 = vadd.xlane.f32.xlu1 %v1853_v54  ;;  %2761 = vrot.lane.b32.xlu2 %v2646_v56, %s3558_s1  ;;  %v2389_v54 = vpop.f32.mrf.mxu2 }
 0x583   :  { %1893 = vadd.xlane.f32.xlu0 %v1892_v0  ;;  %v1847_v0 = vsel %vm1330_vm5, %v5035_v35, 0.0 }
 0x585   :  { %v2732_v33 = vpop.permute.xlu0 %2731 }
 0x586   :  { %v5215_v42 = vsel %vm1330_vm5, %v5009_v62, %v2732_v33  ;;  %v5227_v62 = vpop.f32.mrf.mxu1 }
 0x58e   :  { %v5236_v1 = vpop.f32.mrf.mxu1 }
 0x594   :  { %v1888_v41 = vpop.xlane.xlu2 %1887 }
 0x597   :  { %2759 = vrot.lane.b32.xlu0 %v4947_v2, %s3558_s1  ;;  %v2884_v2 = vsel %vm1330_vm5, %v4961_v8, %v2726_v37  ;;  %v5244_v8 = vpop.f32.mrf.mxu1  ;;  %v2674_v37 = vmul.f32 %v3448_v46, %v2479_v29 }
 0x59a   :  { %v1837_v60 = vpop.xlane.xlu1 %1836 }
 0x59b   :  { %2765 = vrot.lane.b32.xlu1 %v2648_v23, %s3558_s1 }
 0x59c   :  { %v5229_v52 = vpop.xlane.xlu2 %1842 }
 0x59f   :  { %v2535_v11 = vpop.f32.mrf.mxu1 }
 0x5a3   :  { %2821 = vrot.lane.b32.xlu1 %v2668_v55, %s3556_s14  ;;  %v5463_v55 = vld [vmem:[#allocation18_spill] sm:$0xff] }
 0x5a4   :  { %v2758_v3 = vpop.permute.xlu2 %2757 }
 0x5a5   :  { %v2893_v26 = vsel %vm2891_vm10, %v2884_v2, %v2758_v3 }
 0x5a6   :  { %2926 = vst [vmem:[#allocation5 + $0x10] sm:$0xff] %v2893_v26  ;;  %v2391_v26 = vpop.f32.mrf.mxu2 }
 0x5a7   :  { %v2537_v43 = vpop.f32.mrf.mxu1 }
 0x5ab   :  { %2827 = vrot.lane.b32.xlu1 %v2671_v38, %s3556_s14  ;;  %1851 = vadd.xlane.f32.xlu2 %v1850_v13 }
 0x5af   :  { %v5268_v3 = vpop.f32.mrf.mxu1 }
 0x5b0   :  { %v1885_v63 = vpop.xlane.xlu0 %1884 }
 0x5b1   :  { %3449 = vrcp.f32 %v1885_v63 }
 0x5b2   :  { %v2756_v24 = vpop.permute.xlu1 %2755  ;;  %3451 = vrcp.f32 %v1837_v60 }
 0x5b3   :  { %v2892_v14 = vsel %vm2891_vm10, %v5087_v32, %v2756_v24  ;;  %2833 = vrot.lane.b32.xlu1 %v2674_v37, %s3556_s14  ;;  %1905 = vadd.xlane.f32.xlu2 %v1904_v7  ;;  %3453 = vrcp.f32 %v5174_v25 }
 0x5b4   :  { %2924 = vst [vmem:[#allocation5] sm:$0xff] %v2892_v14  ;;  %3455 = vrcp.f32 %v5196_v45 }
 0x5b5   :  { %3457 = vrcp.f32 %v1888_v41  ;;  %v5273_v41 = vpop.f32.mrf.mxu2 }
 0x5b7   :  { %v3450_v51 = vpop.eup %3449  ;;  %v2542_v13 = vpop.f32.mrf.mxu1 }
 0x5b8   :  { %v2675_v22 = vmul.f32 %v3450_v51, %v2535_v11  ;;  %v3452_v56 = vpop.eup %3451  ;;  %v1840_v32 = vpop.xlane.xlu0 %1839 }
 0x5b9   :  { %v2659_v33 = vmul.f32 %v3452_v56, %v2389_v54  ;;  %v3454_v23 = vpop.eup %3453  ;;  %3459 = vrcp.f32 %v1840_v32  ;;  %v1856_v32 = vsel %vm1330_vm5, %v5116_v16, 0.0 }
 0x5ba   :  { %v2669_v35 = vmul.f32 %v3454_v23, %v5077_v17  ;;  %v3456_v25 = vpop.eup %3455 }
 0x5bb   :  { %2851 = vrot.lane.b32.xlu1 %v2675_v22, %s3558_s1  ;;  %v2672_v2 = vmul.f32 %v3456_v25, %v2474_v20  ;;  %v3458_v61 = vpop.eup %3457 }
 0x5bc   :  { %v2676_v45 = vmul.f32 %v3458_v61, %v2537_v43 }
 0x5bd   :  { %v2396_v14 = vpop.f32.mrf.mxu2 }
 0x5bf   :  { %v3460_v60 = vpop.eup %3459  ;;  %v2545_v37 = vpop.f32.mrf.mxu1 }
 0x5c0   :  { %v2660_v20 = vmul.f32 %v3460_v60, %v2391_v26 }
 0x5c1   :  { %1848 = vadd.xlane.f32.xlu0 %v1847_v0 }
 0x5c3   :  { %2787 = vrot.lane.b32.xlu1 %v2659_v33, %s3559_s3 }
 0x5c5   :  { %v2399_v11 = vpop.f32.mrf.mxu2 }
 0x5cb   :  { %v2738_v9 = vpop.permute.xlu0 %2737  ;;  %2767 = vrot.lane.b32.xlu2 %v5462_v21, %s3558_s1 }
 0x5cc   :  { %v5260_v18 = vsel %vm1330_vm5, %v5094_v6, %v2738_v9 }
 0x5cd   :  { %v2401_v33 = vpop.f32.mrf.mxu2 }
 0x5d3   :  { %2823 = vrot.lane.b32.xlu2 %v2669_v35, %s3556_s14 }
 0x5d5   :  { %2763 = vrot.lane.b32.xlu0 %v5463_v55, %s3558_s1  ;;  %v2404_v43 = vpop.f32.mrf.mxu2 }
 0x5db   :  { %2829 = vrot.lane.b32.xlu2 %v2672_v2, %s3556_s14 }
 0x5dd   :  { %v1897_v6 = vpop.xlane.xlu2 %1896  ;;  %v1891_v17 = vpop.xlane.xlu1 %1890 }
 0x5de   :  { %3461 = vrcp.f32 %v1897_v6 }
 0x5e3   :  { %2853 = vrot.lane.b32.xlu2 %v2676_v45, %s3558_s1 }
 0x5e4   :  { %v3462_v29 = vpop.eup %3461 }
 0x5e5   :  { %v2762_v38 = vpop.permute.xlu2 %2761  ;;  %v1846_v63 = vpop.xlane.xlu1 %1845  ;;  %v2679_v24 = vmul.f32 %v3462_v29, %v2545_v37 }
 0x5e6   :  { %v2895_v46 = vsel %vm2891_vm10, %v5145_v57, %v2762_v38  ;;  %v1901_v57 = vsel %vm1330_vm5, %v5105_v30, 0.0 }
 0x5e7   :  { %2930 = vst [vmem:[#allocation5 + $0x30] sm:$0xff] %v2895_v46 }
 0x5eb   :  { %2789 = vrot.lane.b32.xlu2 %v2660_v20, %s3559_s3 }
 0x5ed   :  { %v1900_v51 = vpop.xlane.xlu1 %1899 }
 0x5f3   :  { %2859 = vrot.lane.b32.xlu2 %v2679_v24, %s3558_s1 }
 0x5f5   :  { %v1855_v54 = vpop.xlane.xlu1 %1854 }
 0x5f6   :  { %v1894_v7 = vpop.xlane.xlu0 %1893 }
 0x5f7   :  { %3463 = vrcp.f32 %v1894_v7 }
 0x5f8   :  { %3465 = vrcp.f32 %v1846_v63 }
 0x5f9   :  { %3467 = vrcp.f32 %v1855_v54 }
 0x5fa   :  { %3469 = vrcp.f32 %v5137_v50 }
 0x5fb   :  { %3471 = vrcp.f32 %v1891_v17 }
 0x5fd   :  { %v3464_v22 = vpop.eup %3463 }
 0x5fe   :  { %v2678_v56 = vmul.f32 %v3464_v22, %v2542_v13  ;;  %v3466_v0 = vpop.eup %3465 }
 0x5ff   :  { %1902 = vadd.xlane.f32.xlu0 %v1901_v57  ;;  %v2662_v9 = vmul.f32 %v3466_v0, %v2396_v14  ;;  %v3468_v30 = vpop.eup %3467 }
 0x600   :  { %2857 = vrot.lane.b32.xlu1 %v2678_v56, %s3558_s1  ;;  %v2665_v25 = vmul.f32 %v3468_v30, %v2404_v43 }
 0x607   :  { %1857 = vadd.xlane.f32.xlu0 %v1856_v32 }
 0x608   :  { %2793 = vrot.lane.b32.xlu1 %v2662_v9, %s3559_s3 }
 0x609   :  { %v2760_v21 = vpop.permute.xlu0 %2759 }
 0x60a   :  { %v2894_v23 = vsel %vm2891_vm10, %v5153_v36, %v2760_v21  ;;  %v3470_v36 = vpop.eup %3469 }
 0x60b   :  { %2928 = vst [vmem:[#allocation5 + $0x20] sm:$0xff] %v2894_v23  ;;  %v2673_v61 = vmul.f32 %v3470_v36, %v5238_v49 }
 0x60d   :  { %v2766_v35 = vpop.permute.xlu1 %2765 }
 0x60e   :  { %v2897_v55 = vsel %vm2891_vm10, %v5192_v40, %v2766_v35 }
 0x60f   :  { %2934 = vst [vmem:[#allocation5 + $0x50] sm:$0xff] %v2897_v55 }
 0x610   :  { %2799 = vrot.lane.b32.xlu1 %v2665_v25, %s3559_s3 }
 0x615   :  { %v2822_v63 = vpop.permute.xlu1 %2821 }
 0x61b   :  { %2769 = vrot.lane.b32.xlu0 %v5068_v58, %s3558_s1 }
 0x61e   :  { %v1852_v16 = vpop.xlane.xlu2 %1851 }
 0x623   :  { %2819 = vrot.lane.b32.xlu0 %v5074_v19, %s3556_s14  ;;  %v3472_v19 = vpop.eup %3471 }
 0x626   :  { %v1906_v2 = vpop.xlane.xlu2 %1905 }
 0x62b   :  { %2825 = vrot.lane.b32.xlu0 %v5083_v47, %s3556_s14  ;;  %v2677_v47 = vmul.f32 %v3472_v19, %v5268_v3 }
 0x62e   :  { %v2768_v6 = vpop.permute.xlu2 %2767 }
 0x62f   :  { %v2898_v40 = vsel %vm2891_vm10, %v5180_v27, %v2768_v6 }
 0x630   :  { %2936 = vst [vmem:[#allocation5 + $0x60] sm:$0xff] %v2898_v40 }
 0x633   :  { %2831 = vrot.lane.b32.xlu0 %v2673_v61, %s3556_s14 }
 0x634   :  { %v1849_v58 = vpop.xlane.xlu0 %1848 }
 0x635   :  { %3473 = vrcp.f32 %v1849_v58 }
 0x636   :  { %v5299_v26 = vpop.permute.xlu2 %2823  ;;  %3475 = vrcp.f32 %v5229_v52 }
 0x637   :  { %3477 = vrcp.f32 %v1852_v16 }
 0x638   :  { %3479 = vrcp.f32 %v5072_v44  ;;  %v2547_v44 = vpop.f32.mrf.mxu1 }
 0x639   :  { %3481 = vrcp.f32 %v1900_v51 }
 0x63b   :  { %v3474_v50 = vpop.eup %3473  ;;  %2855 = vrot.lane.b32.xlu0 %v2677_v47, %s3558_s1 }
 0x63c   :  { %v2663_v45 = vmul.f32 %v3474_v50, %v2399_v11  ;;  %v3476_v27 = vpop.eup %3475 }
 0x63d   :  { %v2661_v49 = vmul.f32 %v3476_v27, %v5273_v41  ;;  %v3478_v38 = vpop.eup %3477 }
 0x63e   :  { %2795 = vrot.lane.b32.xlu2 %v2663_v45, %s3559_s3  ;;  %v5305_v17 = vpop.permute.xlu2 %2829  ;;  %v2664_v13 = vmul.f32 %v3478_v38, %v2401_v33  ;;  %v3480_v46 = vpop.eup %3479 }
 0x63f   :  { %v2652_v20 = vmul.f32 %v3480_v46, %v5198_v10  ;;  %v3482_v29 = vpop.eup %3481  ;;  %v2406_v33 = vpop.f32.mrf.mxu2 }
 0x640   :  { %v2680_v7 = vmul.f32 %v3482_v29, %v2547_v44  ;;  %v2550_v22 = vpop.f32.mrf.mxu1 }
 0x643   :  { %2791 = vrot.lane.b32.xlu0 %v2661_v49, %s3559_s3 }
 0x646   :  { %v2854_v52 = vpop.permute.xlu2 %2853 }
 0x647   :  { %v2764_v60 = vpop.permute.xlu0 %2763 }
 0x648   :  { %v2896_v3 = vsel %vm2891_vm10, %v5215_v42, %v2764_v60  ;;  %v2828_v42 = vpop.permute.xlu1 %2827  ;;  %v2552_v23 = vpop.f32.mrf.mxu1 }
 0x649   :  { %2932 = vst [vmem:[#allocation5 + $0x40] sm:$0xff] %v2896_v3 }
 0x64b   :  { %2797 = vrot.lane.b32.xlu0 %v2664_v13, %s3559_s3 }
 0x64e   :  { %v2790_v41 = vpop.permute.xlu2 %2789 }
 0x64f   :  { %v2901_v37 = vsel %vm610_vm0, %v2652_v20, %v2790_v41 }
 0x650   :  { %v2909_v24 = vsel %vm1330_vm5, %v2901_v37, %v2822_v63  ;;  %v5318_v51 = vpop.permute.xlu1 %2833 }
 0x651   :  { %v2917_v14 = vsel %vm2891_vm10, %v2909_v24, %v2854_v52 }
 0x652   :  { %2927 = vst [vmem:[#allocation5 + $0x18] sm:$0xff] %v2917_v14 }
 0x653   :  { %2861 = vrot.lane.b32.xlu0 %v2680_v7, %s3558_s1 }
 0x656   :  { %v2860_v16 = vpop.permute.xlu2 %2859 }
 0x658   :  { %v2852_v54 = vpop.permute.xlu1 %2851 }
 0x660   :  { %v2788_v9 = vpop.permute.xlu1 %2787 }
 0x672   :  { %v1903_v11 = vpop.xlane.xlu0 %1902  ;;  %v2858_v43 = vpop.permute.xlu1 %2857 }
 0x673   :  { %3483 = vrcp.f32 %v1903_v11 }
 0x679   :  { %v3484_v10 = vpop.eup %3483 }
 0x67a   :  { %v1858_v57 = vpop.xlane.xlu0 %1857  ;;  %v2681_v56 = vmul.f32 %v3484_v10, %v2550_v22  ;;  %v2794_v19 = vpop.permute.xlu1 %2793 }
 0x67b   :  { %3485 = vrcp.f32 %v1858_v57 }
 0x67c   :  { %2863 = vrot.lane.b32.xlu1 %v2681_v56, %s3558_s1  ;;  %3487 = vrcp.f32 %v1906_v2 }
 0x67d   :  { %3489 = vrcp.f32 %v5169_v28 }
 0x67e   :  { %3491 = vrcp.f32 %v5133_v39 }
 0x67f   :  { %3493 = vrcp.f32 %v5182_v12 }
 0x680   :  { %3495 = vrcp.f32 %v5205_v4 }
 0x681   :  { %v3486_v0 = vpop.eup %3485  ;;  %3497 = vrcp.f32 %v5135_v15 }
 0x682   :  { %v2666_v32 = vmul.f32 %v3486_v0, %v2406_v33  ;;  %v3488_v21 = vpop.eup %3487  ;;  %v2800_v52 = vpop.permute.xlu1 %2799  ;;  %3499 = vrcp.f32 %v5177_v34 }
 0x683   :  { %v2682_v30 = vmul.f32 %v3488_v21, %v2552_v23  ;;  %v3490_v25 = vpop.eup %3489  ;;  %3501 = vrcp.f32 %v5172_v59 }
 0x684   :  { %2801 = vrot.lane.b32.xlu2 %v2666_v32, %s3559_s3  ;;  %v2651_v2 = vmul.f32 %v3490_v25, %v5188_v31  ;;  %v3492_v36 = vpop.eup %3491 }
 0x685   :  { %v2655_v39 = vmul.f32 %v3492_v36, %v5220_v48  ;;  %v3494_v58 = vpop.eup %3493 }
 0x686   :  { %v2900_v28 = vsel %vm610_vm0, %v2651_v2, %v2788_v9  ;;  %v2654_v31 = vmul.f32 %v3494_v58, %v5217_v53  ;;  %v3496_v38 = vpop.eup %3495 }
 0x687   :  { %v2657_v60 = vmul.f32 %v3496_v38, %v5236_v1  ;;  %v3498_v46 = vpop.eup %3497 }
 0x688   :  { %v2903_v45 = vsel %vm610_vm0, %v2654_v31, %v2794_v19  ;;  %v2653_v20 = vmul.f32 %v3498_v46, %v5203_v5  ;;  %v3500_v37 = vpop.eup %3499 }
 0x689   :  { %v2906_v4 = vsel %vm610_vm0, %v2657_v60, %v2800_v52  ;;  %v2656_v24 = vmul.f32 %v3500_v37, %v5227_v62  ;;  %v3502_v34 = vpop.eup %3501 }
 0x68c   :  { %2865 = vrot.lane.b32.xlu2 %v2682_v30, %s3558_s1 }
 0x68d   :  { %v2770_v35 = vpop.permute.xlu0 %2769 }
 0x68e   :  { %v2899_v55 = vsel %vm2891_vm10, %v5260_v18, %v2770_v35 }
 0x68f   :  { %2938 = vst [vmem:[#allocation5 + $0x70] sm:$0xff] %v2899_v55 }
 0x695   :  { %v2820_v6 = vpop.permute.xlu0 %2819 }
 0x696   :  { %v2908_v40 = vsel %vm1330_vm5, %v2900_v28, %v2820_v6 }
 0x697   :  { %v2916_v61 = vsel %vm2891_vm10, %v2908_v40, %v2852_v54 }
 0x698   :  { %2925 = vst [vmem:[#allocation5 + $0x8] sm:$0xff] %v2916_v61  ;;  %v2796_v18 = vpop.permute.xlu2 %2795 }
 0x699   :  { %v2904_v47 = vsel %vm610_vm0, %v2655_v39, %v2796_v18 }
 0x69a   :  { %v2912_v12 = vsel %vm1330_vm5, %v2904_v47, %v2828_v42  ;;  %v2658_v42 = vmul.f32 %v3502_v34, %v5244_v8 }
 0x69b   :  { %v2920_v50 = vsel %vm2891_vm10, %v2912_v12, %v2860_v16 }
 0x69c   :  { %2933 = vst [vmem:[#allocation5 + $0x48] sm:$0xff] %v2920_v50 }
 0x69d   :  { %v2826_v27 = vpop.permute.xlu0 %2825 }
 0x69e   :  { %v2911_v48 = vsel %vm1330_vm5, %v2903_v45, %v2826_v27 }
 0x69f   :  { %v2919_v49 = vsel %vm2891_vm10, %v2911_v48, %v2858_v43 }
 0x6a0   :  { %2931 = vst [vmem:[#allocation5 + $0x38] sm:$0xff] %v2919_v49 }
 0x6a5   :  { %v2832_v3 = vpop.permute.xlu0 %2831 }
 0x6a6   :  { %v2914_v53 = vsel %vm1330_vm5, %v2906_v4, %v2832_v3 }
 0x6ad   :  { %v2856_v13 = vpop.permute.xlu0 %2855 }
 0x6b5   :  { %v2792_v29 = vpop.permute.xlu0 %2791 }
 0x6b6   :  { %v2902_v41 = vsel %vm610_vm0, %v2653_v20, %v2792_v29 }
 0x6b7   :  { %v2910_v63 = vsel %vm1330_vm5, %v2902_v41, %v5299_v26 }
 0x6b8   :  { %v2918_v1 = vsel %vm2891_vm10, %v2910_v63, %v2856_v13 }
 0x6b9   :  { %2929 = vst [vmem:[#allocation5 + $0x28] sm:$0xff] %v2918_v1 }
 0x6bd   :  { %v2798_v44 = vpop.permute.xlu0 %2797 }
 0x6be   :  { %v2905_v15 = vsel %vm610_vm0, %v2656_v24, %v2798_v44 }
 0x6bf   :  { %v2913_v5 = vsel %vm1330_vm5, %v2905_v15, %v5305_v17 }
 0x6c5   :  { %v2862_v14 = vpop.permute.xlu0 %2861 }
 0x6c6   :  { %v2921_v7 = vsel %vm2891_vm10, %v2913_v5, %v2862_v14 }
 0x6c7   :  { %2935 = vst [vmem:[#allocation5 + $0x58] sm:$0xff] %v2921_v7 }
 0x6de   :  { %v2802_v26 = vpop.permute.xlu2 %2801 }
 0x6df   :  { %v2907_v11 = vsel %vm610_vm0, %v2658_v42, %v2802_v26 }
 0x6e0   :  { %v2915_v62 = vsel %vm1330_vm5, %v2907_v11, %v5318_v51 }
 0x6e6   :  { %v2866_v10 = vpop.permute.xlu2 %2865 }
 0x6e7   :  { %v2923_v22 = vsel %vm2891_vm10, %v2915_v62, %v2866_v10 }
 0x6e8   :  { %2939 = vst [vmem:[#allocation5 + $0x78] sm:$0xff] %v2923_v22 }
 0x6ee   :  { %v2864_v59 = vpop.permute.xlu1 %2863 }
 0x6ef   :  { %v2922_v8 = vsel %vm2891_vm10, %v2914_v53, %v2864_v59 }
 0x6f0   :  { %2937 = vst [vmem:[#allocation5 + $0x68] sm:$0xff] %v2922_v8 }
 0x6f1   :  { %2952 = dma.vmem_to_hbm [thread:$0]  %s2945_s5, 2048, %s2947_s8, [#allocation4], %s3561_s9, %s3561_s9, %s3562_s10  }
 0x6f2   :  { %3553 = dma.done.wait [#allocation4], 2048  }
 0x6f3   :  { %3554 = vsyncadd [#allocation4], 4294965248 }
 0x6f4   :  { %2957 = vsyncpa [#allocation3], 1 }
 0x6f5   :  { %2958 = vsyncpa [#allocation4], 1 }

</bundles_post_ra>
